<compile_context>
chip_gen: v6e
topology: v6e:2x2x1
jax: 0.10.0
libtpu: 0.0.40
codegen_flags: <defaults>
</compile_context>

<pallas_src>
import functools

import numpy as np
import jax
import jax.numpy as jnp
from jax.experimental import pallas as pl
from jax.experimental.pallas import tpu as pltpu

COMMITMENT_COST = 0.25
EMBEDDING_DIM = 256
NUM_EMBEDDINGS = 100
K_PAD = 128          # codebook padded to a lane-dense 128
TAPS = 9             # 3x3 conv taps
T_PAD = 16           # encoder tap rows (9 taps + 1 bias row) padded to a sublane multiple
TAP_PAD = 16         # decoder tap rows padded to a sublane multiple


# ----------------------------------------------------------------------------
# Fused Pallas kernel: encoder matmul -> VQ -> decoder contraction + tap shift/sum
# ----------------------------------------------------------------------------
def _fused_kernel(xpat_ref, w_enc_ref, emb_ref, e2_ref, w_dec_ref, mask_ref, dec_b_ref,
                  recon_ref, scalars_ref, *, batch, n_chan, h, w):
    B, C, HW = batch, n_chan, h * w

    # ---- encoder: block-diagonal (B*C, B*T) @ (B*T, HW); bias folded in as a 1s-tap column.
    # Latent rows land directly in torch's NCHW `.view(-1, embedding_dim)` order (row = (b, c)).
    z = jnp.dot(w_enc_ref[...], xpat_ref[...],
                preferred_element_type=jnp.float32)                      # (B*C, HW) f32

    # ---- VectorQuantizer: nearest codebook row per latent row.
    emb = emb_ref[...]                                                   # (Kp, D) f32
    # Distance matmul on the MXU with bf16 operands / f32 accumulate.  ||x||^2 dropped
    # (argmin-invariant); ||e||^2 stays f32; padded codes carry +1e30 so they never win.
    xe = jax.lax.dot_general(z.astype(jnp.bfloat16), emb.astype(jnp.bfloat16),
                             (((1,), (1,)), ((), ())),
                             preferred_element_type=jnp.float32)         # (B*C, Kp)
    score = e2_ref[...] - 2.0 * xe                                       # (B*C, Kp) f32
    kp = score.shape[1]
    min_s = jnp.min(score, axis=1, keepdims=True)                        # (B*C, 1)
    iota_k = jax.lax.broadcasted_iota(jnp.int32, score.shape, 1)
    idx = jnp.min(jnp.where(score <= min_s, iota_k, kp),
                  axis=1, keepdims=True)                                 # first-min index
    onehot = (iota_k == idx).astype(jnp.float32)                         # (B*C, Kp)
    q = jnp.dot(onehot, emb, preferred_element_type=jnp.float32)         # (B*C, D) exact gather

    # ---- loss + perplexity (single step: no cross-step accumulators, no pl.when phases).
    n_rows = B * C
    diff = q - z
    mse = jnp.sum(diff * diff, keepdims=True) * (1.0 / float(n_rows * HW))   # (1, 1)
    # forward value of q_latent_loss + commitment_cost * e_latent_loss == (1 + c) * mse
    loss = (1.0 + COMMITMENT_COST) * mse
    counts = jnp.sum(onehot, axis=0, keepdims=True)                      # (1, Kp), one reduce total
    avg = counts * (1.0 / float(n_rows))                                 # padded cols stay 0
    ent = jnp.sum(avg * jnp.log(avg + 1e-10), axis=1, keepdims=True)     # (1, 1)
    perp = jnp.exp(-ent)
    # merged scalar output: lane 0 = loss, lane 1 = perplexity, rest zero
    lane = jax.lax.broadcasted_iota(jnp.int32, (1, 8), 1)
    scalars_ref[...] = jnp.where(lane == 0, loss, jnp.where(lane == 1, perp, 0.0))

    # ---- decoder: block-diagonal channel contraction, then the 3x3 'same' tap shift/sum done
    # in-kernel on the HW lane axis via pltpu.roll (XLU) with precomputed border masks.
    proj = jnp.dot(w_dec_ref[...], q, preferred_element_type=jnp.float32)    # (B*TAP_PAD, HW)
    masks = mask_ref[...]                                                # (TAP_PAD, HW)
    dec_bias = dec_b_ref[...]                                            # (1, 1)
    rows = []
    for b in range(B):
        acc = None
        for di in range(3):
            for dj in range(3):
                tap = di * 3 + dj
                r0 = b * TAP_PAD + tap
                row = proj[r0:r0 + 1, :]                                 # (1, HW) static slice
                shift = (-((di - 1) * w + (dj - 1))) % HW                # static lane rotation
                rolled = row if shift == 0 else pltpu.roll(row, shift, axis=1)
                contrib = masks[tap:tap + 1, :] * rolled
                acc = contrib if acc is None else acc + contrib
        rows.append(acc)
    recon_ref[...] = jnp.concatenate(rows, axis=0) + dec_bias            # (B, HW) lane-dense


def _vqvae_fused_call(xpat_s, packed, batch, h, w):
    HW = h * w
    C = EMBEDDING_DIM
    kernel = functools.partial(_fused_kernel, batch=batch, n_chan=C, h=h, w=w)
    full2d = lambda i: (0, 0)
    return pl.pallas_call(
        kernel,
        out_shape=(
            jax.ShapeDtypeStruct((batch, HW), jnp.float32),      # reconstruction, lane-dense
            jax.ShapeDtypeStruct((1, 8), jnp.float32),           # [loss, perplexity, 0...]
        ),
        grid_spec=pltpu.PrefetchScalarGridSpec(
            num_scalar_prefetch=0,
            grid=(1,),                                           # single step: batch folded into M
            in_specs=[
                pl.BlockSpec((batch * T_PAD, HW), full2d),         # encoder taps (+1s row), stacked
                pl.BlockSpec((batch * C, batch * T_PAD), full2d),  # encoder weights, block-diag
                pl.BlockSpec((K_PAD, EMBEDDING_DIM), full2d),      # codebook (zero-padded rows)
                pl.BlockSpec((1, K_PAD), full2d),                  # ||e||^2 (+1e30 pad)
                pl.BlockSpec((batch * TAP_PAD, batch * C), full2d),  # decoder taps, block-diag
                pl.BlockSpec((TAP_PAD, HW), full2d),               # 3x3 'same' border masks
                pl.BlockSpec((1, 1), full2d),                      # decoder bias
            ],
            out_specs=(
                pl.BlockSpec((batch, HW), full2d),
                pl.BlockSpec((1, 8), full2d),
            ),
        ),
        compiler_params=pltpu.CompilerParams(
            dimension_semantics=("arbitrary",),
        ),
    )(xpat_s, packed["w_enc_bd"], packed["emb_pad"], packed["e2_pad"],
      packed["w_dec_bd"], packed["mask"], packed["dec_b"])


# ----------------------------------------------------------------------------
# One-time host-side prepacking of parameters into kernel-ready layouts
# ----------------------------------------------------------------------------
def _decoder_tap_masks(h, w):
    """(TAP_PAD, H*W) border-validity masks for the 3x3 'same' decoder tap shift/sum."""
    masks = np.zeros((TAP_PAD, h * w), np.float32)
    ii, jj = np.meshgrid(np.arange(h), np.arange(w), indexing="ij")
    for di in range(3):
        for dj in range(3):
            valid = ((ii + di - 1 >= 0) & (ii + di - 1 < h) &
                     (jj + dj - 1 >= 0) & (jj + dj - 1 < w))
            masks[di * 3 + dj] = valid.reshape(-1).astype(np.float32)
    return jnp.asarray(masks)


def prepack_params(params, batch, h, w):
    C = EMBEDDING_DIM
    # encoder: (C,1,3,3) conv -> (C, T_PAD) with the bias folded in as an extra tap column.
    w_enc = params["enc_w"].reshape(C, TAPS)
    w_enc_ext = jnp.concatenate(
        [w_enc, params["enc_b"].reshape(C, 1),
         jnp.zeros((C, T_PAD - TAPS - 1), jnp.float32)], axis=1)             # (C, 16)
    w_enc_bd = jnp.kron(jnp.eye(batch, dtype=jnp.float32), w_enc_ext)        # (B*C, B*16)

    # codebook padded to lane-dense K=128; padded rows zero, +1e30 distance so they never win.
    emb = params["emb_w"]
    emb_pad = jnp.pad(emb, ((0, K_PAD - NUM_EMBEDDINGS), (0, 0)))            # (128, D)
    e2 = jnp.sum(emb * emb, axis=1)
    e2_pad = jnp.concatenate(
        [e2, jnp.full((K_PAD - NUM_EMBEDDINGS,), 1e30, jnp.float32)]).reshape(1, K_PAD)

    # decoder: (1,C,3,3) conv -> per-tap rows (16, C), block-diagonal over batch.
    w_dec = jnp.transpose(params["dec_w"][0], (1, 2, 0)).reshape(TAPS, C)
    w_dec_pad = jnp.pad(w_dec, ((0, TAP_PAD - TAPS), (0, 0)))                # (16, C)
    w_dec_bd = jnp.kron(jnp.eye(batch, dtype=jnp.float32), w_dec_pad)        # (B*16, B*C)

    return {
        "w_enc_bd": w_enc_bd,
        "emb_pad": emb_pad,
        "e2_pad": e2_pad,
        "w_dec_bd": w_dec_bd,
        "mask": _decoder_tap_masks(h, w),
        "dec_b": params["dec_b"].reshape(1, 1),
    }


# ----------------------------------------------------------------------------
# Tiny per-call JAX prologue: 3x3 encoder input taps (+ constant-1 bias row)
# ----------------------------------------------------------------------------
def _encoder_taps_block_stacked(x_nchw):
    """(B, 1, H, W) -> (B*T_PAD, H*W): 9 shifted/zero-padded taps + 1s bias row, block-stacked."""
    B, _, H, W = x_nchw.shape
    xp = jnp.pad(x_nchw[:, 0], ((0, 0), (1, 1), (1, 1)))                     # (B, H+2, W+2)
    taps = [xp[:, di:di + H, dj:dj + W].reshape(B, H * W)
            for di in range(3) for dj in range(3)]
    t = jnp.stack(taps, axis=1)                                              # (B, 9, HW)
    ones = jnp.ones((B, 1, H * W), x_nchw.dtype)                             # bias row
    zeros = jnp.zeros((B, T_PAD - TAPS - 1, H * W), x_nchw.dtype)
    return jnp.concatenate([t, ones, zeros], axis=1).reshape(B * T_PAD, H * W)


# ----------------------------------------------------------------------------
# Model forward
# ----------------------------------------------------------------------------
def init_params(key):
    k1, k2, k3 = jax.random.split(key, 3)
    return {
        # encoder stand-in: 1 -> 256 channels, 3x3 'same'
        "enc_w": 0.1 * jax.random.normal(k1, (EMBEDDING_DIM, 1, 3, 3), jnp.float32),
        "enc_b": jnp.zeros((EMBEDDING_DIM,), jnp.float32),
        # codebook: uniform(-1/K, 1/K) like nn.Embedding init in the module
        "emb_w": jax.random.uniform(
            k2, (NUM_EMBEDDINGS, EMBEDDING_DIM), jnp.float32,
            minval=-1.0 / NUM_EMBEDDINGS, maxval=1.0 / NUM_EMBEDDINGS),
        # decoder stand-in: 256 -> 1 channels, 3x3 'same'
        "dec_w": 0.05 * jax.random.normal(k3, (1, EMBEDDING_DIM, 3, 3), jnp.float32),
        "dec_b": jnp.zeros((1,), jnp.float32),
    }


@jax.jit
def model_forward(packed, x):
    B, Cin, H, W = x.shape
    assert Cin == 1, "stand-in encoder expects 1 input channel"
    assert H * W == EMBEDDING_DIM, "kernel assumes H*W == embedding_dim (NCHW .view(-1, D) rows == channel planes)"
    assert packed["w_enc_bd"].shape == (B * EMBEDDING_DIM, B * T_PAD), "prepack batch mismatch"

    xpat_s = _encoder_taps_block_stacked(x)                                  # (B*16, HW)
    recon, scalars = _vqvae_fused_call(xpat_s, packed, B, H, W)
    x_recon = recon.reshape(B, 1, H, W)
    return scalars[0, 0], x_recon, scalars[0, 1]


if __name__ == "__main__":
    key = jax.random.PRNGKey(0)
    pkey, xkey = jax.random.split(key)
    params = init_params(pkey)

    # small NCHW input consistent with Model: batch=2, channels=1, spatial=16x16
    B, H, W = 2, 16, 16
    x = jax.random.normal(xkey, (B, 1, H, W), jnp.float32)

    packed = prepack_params(params, B, H, W)                                 # one-time weight prepack
    loss, x_recon, perplexity = model_forward(packed, x)
    jax.block_until_ready((loss, x_recon, perplexity))

    assert x_recon.shape == (B, 1, H, W)
    assert bool(jnp.isfinite(loss)) and bool(jnp.isfinite(perplexity))
    print("KERNEL_OK")
</pallas_src>

<mosaic_0001>
module attributes {stable_mosaic.version = 11 : i64} {
  func.func @_fused_kernel(%arg0: i32, %arg1: memref<32x256xf32, #tpu.memory_space<vmem>>, %arg2: memref<512x32xf32, #tpu.memory_space<vmem>>, %arg3: memref<128x256xf32, #tpu.memory_space<vmem>>, %arg4: memref<1x128xf32, #tpu.memory_space<vmem>>, %arg5: memref<32x512xf32, #tpu.memory_space<vmem>>, %arg6: memref<16x256xf32, #tpu.memory_space<vmem>>, %arg7: memref<1x1xf32, #tpu.memory_space<vmem>>, %arg8: memref<2x256xf32, #tpu.memory_space<vmem>>, %arg9: memref<1x8xf32, #tpu.memory_space<vmem>>) attributes {dimension_semantics = [#tpu.dimension_semantics<arbitrary>], iteration_bounds = array<i64: 1>, scalar_prefetch = 0 : i64, scratch_operands = 0 : i64, tpu.core_type = #tpu.core_type<tc>, window_params = [{pipeline_mode = #tpu.pipeline_mode<synchronous>, transform_indices = @transform_0, window_bounds = array<i64: 32, 256>}, {pipeline_mode = #tpu.pipeline_mode<synchronous>, transform_indices = @transform_1, window_bounds = array<i64: 512, 32>}, {pipeline_mode = #tpu.pipeline_mode<synchronous>, transform_indices = @transform_2, window_bounds = array<i64: 128, 256>}, {pipeline_mode = #tpu.pipeline_mode<synchronous>, transform_indices = @transform_3, window_bounds = array<i64: 1, 128>}, {pipeline_mode = #tpu.pipeline_mode<synchronous>, transform_indices = @transform_4, window_bounds = array<i64: 32, 512>}, {pipeline_mode = #tpu.pipeline_mode<synchronous>, transform_indices = @transform_5, window_bounds = array<i64: 16, 256>}, {pipeline_mode = #tpu.pipeline_mode<synchronous>, transform_indices = @transform_6, window_bounds = array<i64: 1, 1>}, {pipeline_mode = #tpu.pipeline_mode<synchronous>, transform_indices = @transform_7, window_bounds = array<i64: 2, 256>}, {pipeline_mode = #tpu.pipeline_mode<synchronous>, transform_indices = @transform_8, window_bounds = array<i64: 1, 8>}]} {
    %c0 = arith.constant 0 : index
    %c0_0 = arith.constant 0 : index
    %0 = vector.load %arg2[%c0, %c0_0] : memref<512x32xf32, #tpu.memory_space<vmem>>, vector<512x32xf32>
    %c0_1 = arith.constant 0 : index
    %c0_2 = arith.constant 0 : index
    %1 = vector.load %arg1[%c0_1, %c0_2] : memref<32x256xf32, #tpu.memory_space<vmem>>, vector<32x256xf32>
    %cst = arith.constant dense<0.000000e+00> : vector<512x256xf32>
    %2 = tpu.matmul %0, %1, %cst {dimension_numbers = #tpu.dot_dimension_numbers<[1], [0], [0], [1], [0, 0, 1, 1], [], []>} : vector<512x32xf32>, vector<32x256xf32>, vector<512x256xf32> -> vector<512x256xf32>
    %c0_3 = arith.constant 0 : index
    %c0_4 = arith.constant 0 : index
    %3 = vector.load %arg3[%c0_3, %c0_4] : memref<128x256xf32, #tpu.memory_space<vmem>>, vector<128x256xf32>
    %4 = arith.truncf %2 : vector<512x256xf32> to vector<512x256xbf16>
    %5 = arith.truncf %3 : vector<128x256xf32> to vector<128x256xbf16>
    %cst_5 = arith.constant dense<0.000000e+00> : vector<512x128xf32>
    %6 = tpu.matmul %4, %5, %cst_5 {dimension_numbers = #tpu.dot_dimension_numbers<[1], [1], [0], [0], [0, 0, 1, 0], [], []>} : vector<512x256xbf16>, vector<128x256xbf16>, vector<512x128xf32> -> vector<512x128xf32>
    %c0_6 = arith.constant 0 : index
    %c0_7 = arith.constant 0 : index
    %7 = vector.load %arg4[%c0_6, %c0_7] : memref<1x128xf32, #tpu.memory_space<vmem>>, vector<1x128xf32>
    %cst_8 = arith.constant 2.000000e+00 : f32
    %8 = vector.broadcast %cst_8 : f32 to vector<512x128xf32>
    %9 = arith.mulf %8, %6 : vector<512x128xf32>
    %10 = vector.broadcast %7 : vector<1x128xf32> to vector<512x128xf32>
    %11 = arith.subf %10, %9 : vector<512x128xf32>
    %cst_9 = arith.constant dense<0x7F800000> : vector<512xf32>
    %12 = vector.multi_reduction <minimumf>, %11, %cst_9 [1] : vector<512x128xf32> to vector<512xf32>
    %13 = vector.shape_cast %12 : vector<512xf32> to vector<512x1xf32>
    %14 = tpu.iota {dimensions = array<i32: 1>} : vector<512x128xi32>
    %15 = vector.broadcast %13 : vector<512x1xf32> to vector<512x128xf32>
    %16 = arith.cmpf ole, %11, %15 : vector<512x128xf32>
    %c128_i32 = arith.constant 128 : i32
    %17 = vector.broadcast %c128_i32 : i32 to vector<512x128xi32>
    %18 = arith.select %16, %14, %17 : vector<512x128xi1>, vector<512x128xi32>
    %cst_10 = arith.constant dense<2147483647> : vector<512xi32>
    %19 = vector.multi_reduction <minsi>, %18, %cst_10 [1] : vector<512x128xi32> to vector<512xi32>
    %20 = vector.shape_cast %19 : vector<512xi32> to vector<512x1xi32>
    %21 = vector.broadcast %20 : vector<512x1xi32> to vector<512x128xi32>
    %22 = arith.cmpi eq, %14, %21 : vector<512x128xi32>
    %23 = arith.extui %22 : vector<512x128xi1> to vector<512x128xi32>
    %24 = arith.sitofp %23 : vector<512x128xi32> to vector<512x128xf32>
    %cst_11 = arith.constant dense<0.000000e+00> : vector<512x256xf32>
    %25 = tpu.matmul %24, %3, %cst_11 {dimension_numbers = #tpu.dot_dimension_numbers<[1], [0], [0], [1], [0, 0, 1, 1], [], []>} : vector<512x128xf32>, vector<128x256xf32>, vector<512x256xf32> -> vector<512x256xf32>
    %26 = arith.subf %25, %2 : vector<512x256xf32>
    %27 = arith.mulf %26, %26 : vector<512x256xf32>
    %28 = vector.shape_cast %27 : vector<512x256xf32> to vector<1x512x256xf32>
    %cst_12 = arith.constant dense<0.000000e+00> : vector<1xf32>
    %29 = vector.multi_reduction <add>, %28, %cst_12 [1, 2] : vector<1x512x256xf32> to vector<1xf32>
    %30 = vector.shape_cast %29 : vector<1xf32> to vector<1x1x1xf32>
    %31 = vector.extract %30[0, 0, 0] : f32 from vector<1x1x1xf32>
    %32 = vector.broadcast %31 : f32 to vector<1x1xf32>
    %cst_13 = arith.constant 7.62939453E-6 : f32
    %33 = vector.broadcast %cst_13 : f32 to vector<1x1xf32>
    %34 = arith.mulf %32, %33 : vector<1x1xf32>
    %cst_14 = arith.constant 1.250000e+00 : f32
    %35 = vector.broadcast %cst_14 : f32 to vector<1x1xf32>
    %36 = arith.mulf %35, %34 : vector<1x1xf32>
    %cst_15 = arith.constant dense<0.000000e+00> : vector<128xf32>
    %37 = vector.multi_reduction <add>, %24, %cst_15 [0] : vector<512x128xf32> to vector<128xf32>
    %38 = vector.shape_cast %37 : vector<128xf32> to vector<1x128xf32>
    %cst_16 = arith.constant 0.001953125 : f32
    %39 = vector.broadcast %cst_16 : f32 to vector<1x128xf32>
    %40 = arith.mulf %38, %39 : vector<1x128xf32>
    %cst_17 = arith.constant 1.000000e-10 : f32
    %41 = vector.broadcast %cst_17 : f32 to vector<1x128xf32>
    %42 = arith.addf %40, %41 : vector<1x128xf32>
    %43 = math.log %42 : vector<1x128xf32>
    %44 = arith.mulf %40, %43 : vector<1x128xf32>
    %cst_18 = arith.constant dense<0.000000e+00> : vector<1xf32>
    %45 = vector.multi_reduction <add>, %44, %cst_18 [1] : vector<1x128xf32> to vector<1xf32>
    %46 = vector.shape_cast %45 : vector<1xf32> to vector<1x1xf32>
    %cst_19 = arith.constant 0.000000e+00 : f32
    %47 = vector.broadcast %cst_19 : f32 to vector<1x1xf32>
    %48 = arith.subf %47, %46 : vector<1x1xf32>
    %49 = math.exp %48 : vector<1x1xf32>
    %50 = tpu.iota {dimensions = array<i32: 1>} : vector<1x8xi32>
    %c0_i32 = arith.constant 0 : i32
    %51 = vector.broadcast %c0_i32 : i32 to vector<1x8xi32>
    %52 = arith.cmpi eq, %50, %51 : vector<1x8xi32>
    %c1_i32 = arith.constant 1 : i32
    %53 = vector.broadcast %c1_i32 : i32 to vector<1x8xi32>
    %54 = arith.cmpi eq, %50, %53 : vector<1x8xi32>
    %cst_20 = arith.constant 0.000000e+00 : f32
    %55 = vector.shape_cast %49 : vector<1x1xf32> to vector<1x1xf32>
    %56 = vector.broadcast %55 : vector<1x1xf32> to vector<1x8xf32>
    %57 = vector.broadcast %cst_20 : f32 to vector<1x8xf32>
    %58 = arith.select %54, %56, %57 : vector<1x8xi1>, vector<1x8xf32>
    %59 = vector.shape_cast %36 : vector<1x1xf32> to vector<1x1xf32>
    %60 = vector.broadcast %59 : vector<1x1xf32> to vector<1x8xf32>
    %61 = arith.select %52, %60, %58 : vector<1x8xi1>, vector<1x8xf32>
    %c0_21 = arith.constant 0 : index
    %c0_22 = arith.constant 0 : index
    %62 = vector.load %arg9[%c0_21, %c0_22] : memref<1x8xf32, #tpu.memory_space<vmem>>, vector<1x8xf32>
    tpu.vector_store %arg9[%c0_21, %c0_22], %61 {strides = array<i32>} : memref<1x8xf32, #tpu.memory_space<vmem>>, vector<1x8xf32>,
    %c0_23 = arith.constant 0 : index
    %c0_24 = arith.constant 0 : index
    %63 = vector.load %arg5[%c0_23, %c0_24] : memref<32x512xf32, #tpu.memory_space<vmem>>, vector<32x512xf32>
    %cst_25 = arith.constant dense<0.000000e+00> : vector<32x256xf32>
    %64 = tpu.matmul %63, %25, %cst_25 {dimension_numbers = #tpu.dot_dimension_numbers<[1], [0], [0], [1], [0, 0, 1, 1], [], []>} : vector<32x512xf32>, vector<512x256xf32>, vector<32x256xf32> -> vector<32x256xf32>
    %c0_26 = arith.constant 0 : index
    %c0_27 = arith.constant 0 : index
    %65 = vector.load %arg6[%c0_26, %c0_27] : memref<16x256xf32, #tpu.memory_space<vmem>>, vector<16x256xf32>
    %c0_28 = arith.constant 0 : index
    %c0_29 = arith.constant 0 : index
    %66 = vector.load %arg7[%c0_28, %c0_29] : memref<1x1xf32, #tpu.memory_space<vmem>>, vector<1x1xf32>
    %67 = vector.extract_strided_slice %64 {offsets = [0, 0], sizes = [1, 256], strides = [1, 1]} : vector<32x256xf32> to vector<1x256xf32>
    %c17_i32 = arith.constant 17 : i32
    %68 = tpu.dynamic_rotate %67 by %c17_i32 dim 1 : vector<1x256xf32>, i32 -> vector<1x256xf32>
    %69 = vector.extract_strided_slice %65 {offsets = [0, 0], sizes = [1, 256], strides = [1, 1]} : vector<16x256xf32> to vector<1x256xf32>
    %70 = arith.mulf %69, %68 : vector<1x256xf32>
    %71 = vector.extract_strided_slice %64 {offsets = [1, 0], sizes = [1, 256], strides = [1, 1]} : vector<32x256xf32> to vector<1x256xf32>
    %c16_i32 = arith.constant 16 : i32
    %72 = tpu.dynamic_rotate %71 by %c16_i32 dim 1 : vector<1x256xf32>, i32 -> vector<1x256xf32>
    %73 = vector.extract_strided_slice %65 {offsets = [1, 0], sizes = [1, 256], strides = [1, 1]} : vector<16x256xf32> to vector<1x256xf32>
    %74 = arith.mulf %73, %72 : vector<1x256xf32>
    %75 = arith.addf %70, %74 : vector<1x256xf32>
    %76 = vector.extract_strided_slice %64 {offsets = [2, 0], sizes = [1, 256], strides = [1, 1]} : vector<32x256xf32> to vector<1x256xf32>
    %c15_i32 = arith.constant 15 : i32
    %77 = tpu.dynamic_rotate %76 by %c15_i32 dim 1 : vector<1x256xf32>, i32 -> vector<1x256xf32>
    %78 = vector.extract_strided_slice %65 {offsets = [2, 0], sizes = [1, 256], strides = [1, 1]} : vector<16x256xf32> to vector<1x256xf32>
    %79 = arith.mulf %78, %77 : vector<1x256xf32>
    %80 = arith.addf %75, %79 : vector<1x256xf32>
    %81 = vector.extract_strided_slice %64 {offsets = [3, 0], sizes = [1, 256], strides = [1, 1]} : vector<32x256xf32> to vector<1x256xf32>
    %c1_i32_30 = arith.constant 1 : i32
    %82 = tpu.dynamic_rotate %81 by %c1_i32_30 dim 1 : vector<1x256xf32>, i32 -> vector<1x256xf32>
    %83 = vector.extract_strided_slice %65 {offsets = [3, 0], sizes = [1, 256], strides = [1, 1]} : vector<16x256xf32> to vector<1x256xf32>
    %84 = arith.mulf %83, %82 : vector<1x256xf32>
    %85 = arith.addf %80, %84 : vector<1x256xf32>
    %86 = vector.extract_strided_slice %64 {offsets = [4, 0], sizes = [1, 256], strides = [1, 1]} : vector<32x256xf32> to vector<1x256xf32>
    %87 = vector.extract_strided_slice %65 {offsets = [4, 0], sizes = [1, 256], strides = [1, 1]} : vector<16x256xf32> to vector<1x256xf32>
    %88 = arith.mulf %87, %86 : vector<1x256xf32>
    %89 = arith.addf %85, %88 : vector<1x256xf32>
    %90 = vector.extract_strided_slice %64 {offsets = [5, 0], sizes = [1, 256], strides = [1, 1]} : vector<32x256xf32> to vector<1x256xf32>
    %c255_i32 = arith.constant 255 : i32
    %91 = tpu.dynamic_rotate %90 by %c255_i32 dim 1 : vector<1x256xf32>, i32 -> vector<1x256xf32>
    %92 = vector.extract_strided_slice %65 {offsets = [5, 0], sizes = [1, 256], strides = [1, 1]} : vector<16x256xf32> to vector<1x256xf32>
    %93 = arith.mulf %92, %91 : vector<1x256xf32>
    %94 = arith.addf %89, %93 : vector<1x256xf32>
    %95 = vector.extract_strided_slice %64 {offsets = [6, 0], sizes = [1, 256], strides = [1, 1]} : vector<32x256xf32> to vector<1x256xf32>
    %c241_i32 = arith.constant 241 : i32
    %96 = tpu.dynamic_rotate %95 by %c241_i32 dim 1 : vector<1x256xf32>, i32 -> vector<1x256xf32>
    %97 = vector.extract_strided_slice %65 {offsets = [6, 0], sizes = [1, 256], strides = [1, 1]} : vector<16x256xf32> to vector<1x256xf32>
    %98 = arith.mulf %97, %96 : vector<1x256xf32>
    %99 = arith.addf %94, %98 : vector<1x256xf32>
    %100 = vector.extract_strided_slice %64 {offsets = [7, 0], sizes = [1, 256], strides = [1, 1]} : vector<32x256xf32> to vector<1x256xf32>
    %c240_i32 = arith.constant 240 : i32
    %101 = tpu.dynamic_rotate %100 by %c240_i32 dim 1 : vector<1x256xf32>, i32 -> vector<1x256xf32>
    %102 = vector.extract_strided_slice %65 {offsets = [7, 0], sizes = [1, 256], strides = [1, 1]} : vector<16x256xf32> to vector<1x256xf32>
    %103 = arith.mulf %102, %101 : vector<1x256xf32>
    %104 = arith.addf %99, %103 : vector<1x256xf32>
    %105 = vector.extract_strided_slice %64 {offsets = [8, 0], sizes = [1, 256], strides = [1, 1]} : vector<32x256xf32> to vector<1x256xf32>
    %c239_i32 = arith.constant 239 : i32
    %106 = tpu.dynamic_rotate %105 by %c239_i32 dim 1 : vector<1x256xf32>, i32 -> vector<1x256xf32>
    %107 = vector.extract_strided_slice %65 {offsets = [8, 0], sizes = [1, 256], strides = [1, 1]} : vector<16x256xf32> to vector<1x256xf32>
    %108 = arith.mulf %107, %106 : vector<1x256xf32>
    %109 = arith.addf %104, %108 : vector<1x256xf32>
    %110 = vector.extract_strided_slice %64 {offsets = [16, 0], sizes = [1, 256], strides = [1, 1]} : vector<32x256xf32> to vector<1x256xf32>
    %c17_i32_31 = arith.constant 17 : i32
    %111 = tpu.dynamic_rotate %110 by %c17_i32_31 dim 1 : vector<1x256xf32>, i32 -> vector<1x256xf32>
    %112 = vector.extract_strided_slice %65 {offsets = [0, 0], sizes = [1, 256], strides = [1, 1]} : vector<16x256xf32> to vector<1x256xf32>
    %113 = arith.mulf %112, %111 : vector<1x256xf32>
    %114 = vector.extract_strided_slice %64 {offsets = [17, 0], sizes = [1, 256], strides = [1, 1]} : vector<32x256xf32> to vector<1x256xf32>
    %c16_i32_32 = arith.constant 16 : i32
    %115 = tpu.dynamic_rotate %114 by %c16_i32_32 dim 1 : vector<1x256xf32>, i32 -> vector<1x256xf32>
    %116 = vector.extract_strided_slice %65 {offsets = [1, 0], sizes = [1, 256], strides = [1, 1]} : vector<16x256xf32> to vector<1x256xf32>
    %117 = arith.mulf %116, %115 : vector<1x256xf32>
    %118 = arith.addf %113, %117 : vector<1x256xf32>
    %119 = vector.extract_strided_slice %64 {offsets = [18, 0], sizes = [1, 256], strides = [1, 1]} : vector<32x256xf32> to vector<1x256xf32>
    %c15_i32_33 = arith.constant 15 : i32
    %120 = tpu.dynamic_rotate %119 by %c15_i32_33 dim 1 : vector<1x256xf32>, i32 -> vector<1x256xf32>
    %121 = vector.extract_strided_slice %65 {offsets = [2, 0], sizes = [1, 256], strides = [1, 1]} : vector<16x256xf32> to vector<1x256xf32>
    %122 = arith.mulf %121, %120 : vector<1x256xf32>
    %123 = arith.addf %118, %122 : vector<1x256xf32>
    %124 = vector.extract_strided_slice %64 {offsets = [19, 0], sizes = [1, 256], strides = [1, 1]} : vector<32x256xf32> to vector<1x256xf32>
    %c1_i32_34 = arith.constant 1 : i32
    %125 = tpu.dynamic_rotate %124 by %c1_i32_34 dim 1 : vector<1x256xf32>, i32 -> vector<1x256xf32>
    %126 = vector.extract_strided_slice %65 {offsets = [3, 0], sizes = [1, 256], strides = [1, 1]} : vector<16x256xf32> to vector<1x256xf32>
    %127 = arith.mulf %126, %125 : vector<1x256xf32>
    %128 = arith.addf %123, %127 : vector<1x256xf32>
    %129 = vector.extract_strided_slice %64 {offsets = [20, 0], sizes = [1, 256], strides = [1, 1]} : vector<32x256xf32> to vector<1x256xf32>
    %130 = vector.extract_strided_slice %65 {offsets = [4, 0], sizes = [1, 256], strides = [1, 1]} : vector<16x256xf32> to vector<1x256xf32>
    %131 = arith.mulf %130, %129 : vector<1x256xf32>
    %132 = arith.addf %128, %131 : vector<1x256xf32>
    %133 = vector.extract_strided_slice %64 {offsets = [21, 0], sizes = [1, 256], strides = [1, 1]} : vector<32x256xf32> to vector<1x256xf32>
    %c255_i32_35 = arith.constant 255 : i32
    %134 = tpu.dynamic_rotate %133 by %c255_i32_35 dim 1 : vector<1x256xf32>, i32 -> vector<1x256xf32>
    %135 = vector.extract_strided_slice %65 {offsets = [5, 0], sizes = [1, 256], strides = [1, 1]} : vector<16x256xf32> to vector<1x256xf32>
    %136 = arith.mulf %135, %134 : vector<1x256xf32>
    %137 = arith.addf %132, %136 : vector<1x256xf32>
    %138 = vector.extract_strided_slice %64 {offsets = [22, 0], sizes = [1, 256], strides = [1, 1]} : vector<32x256xf32> to vector<1x256xf32>
    %c241_i32_36 = arith.constant 241 : i32
    %139 = tpu.dynamic_rotate %138 by %c241_i32_36 dim 1 : vector<1x256xf32>, i32 -> vector<1x256xf32>
    %140 = vector.extract_strided_slice %65 {offsets = [6, 0], sizes = [1, 256], strides = [1, 1]} : vector<16x256xf32> to vector<1x256xf32>
    %141 = arith.mulf %140, %139 : vector<1x256xf32>
    %142 = arith.addf %137, %141 : vector<1x256xf32>
    %143 = vector.extract_strided_slice %64 {offsets = [23, 0], sizes = [1, 256], strides = [1, 1]} : vector<32x256xf32> to vector<1x256xf32>
    %c240_i32_37 = arith.constant 240 : i32
    %144 = tpu.dynamic_rotate %143 by %c240_i32_37 dim 1 : vector<1x256xf32>, i32 -> vector<1x256xf32>
    %145 = vector.extract_strided_slice %65 {offsets = [7, 0], sizes = [1, 256], strides = [1, 1]} : vector<16x256xf32> to vector<1x256xf32>
    %146 = arith.mulf %145, %144 : vector<1x256xf32>
    %147 = arith.addf %142, %146 : vector<1x256xf32>
    %148 = vector.extract_strided_slice %64 {offsets = [24, 0], sizes = [1, 256], strides = [1, 1]} : vector<32x256xf32> to vector<1x256xf32>
    %c239_i32_38 = arith.constant 239 : i32
    %149 = tpu.dynamic_rotate %148 by %c239_i32_38 dim 1 : vector<1x256xf32>, i32 -> vector<1x256xf32>
    %150 = vector.extract_strided_slice %65 {offsets = [8, 0], sizes = [1, 256], strides = [1, 1]} : vector<16x256xf32> to vector<1x256xf32>
    %151 = arith.mulf %150, %149 : vector<1x256xf32>
    %152 = arith.addf %147, %151 : vector<1x256xf32>
    %153 = tpu.concatenate %109, %152 in 0 : vector<1x256xf32>, vector<1x256xf32> -> vector<2x256xf32>
    %154 = vector.broadcast %66 : vector<1x1xf32> to vector<2x256xf32>
    %155 = arith.addf %153, %154 : vector<2x256xf32>
    %c0_39 = arith.constant 0 : index
    %c0_40 = arith.constant 0 : index
    %156 = vector.load %arg8[%c0_39, %c0_40] : memref<2x256xf32, #tpu.memory_space<vmem>>, vector<2x256xf32>
    tpu.vector_store %arg8[%c0_39, %c0_40], %155 {strides = array<i32>} : memref<2x256xf32, #tpu.memory_space<vmem>>, vector<2x256xf32>,
    return
  }
  func.func @transform_0(%arg0: i32) -> (i32, i32) {
    %c0_i32 = arith.constant 0 : i32
    %c0_i32_0 = arith.constant 0 : i32
    %c0_i32_1 = arith.constant 0 : i32
    return %c0_i32, %c0_i32_0 : i32, i32
  }
  func.func @transform_1(%arg0: i32) -> (i32, i32) {
    %c0_i32 = arith.constant 0 : i32
    %c0_i32_0 = arith.constant 0 : i32
    %c0_i32_1 = arith.constant 0 : i32
    return %c0_i32, %c0_i32_0 : i32, i32
  }
  func.func @transform_2(%arg0: i32) -> (i32, i32) {
    %c0_i32 = arith.constant 0 : i32
    %c0_i32_0 = arith.constant 0 : i32
    %c0_i32_1 = arith.constant 0 : i32
    return %c0_i32, %c0_i32_0 : i32, i32
  }
  func.func @transform_3(%arg0: i32) -> (i32, i32) {
    %c0_i32 = arith.constant 0 : i32
    %c0_i32_0 = arith.constant 0 : i32
    %c0_i32_1 = arith.constant 0 : i32
    return %c0_i32, %c0_i32_0 : i32, i32
  }
  func.func @transform_4(%arg0: i32) -> (i32, i32) {
    %c0_i32 = arith.constant 0 : i32
    %c0_i32_0 = arith.constant 0 : i32
    %c0_i32_1 = arith.constant 0 : i32
    return %c0_i32, %c0_i32_0 : i32, i32
  }
  func.func @transform_5(%arg0: i32) -> (i32, i32) {
    %c0_i32 = arith.constant 0 : i32
    %c0_i32_0 = arith.constant 0 : i32
    %c0_i32_1 = arith.constant 0 : i32
    return %c0_i32, %c0_i32_0 : i32, i32
  }
  func.func @transform_6(%arg0: i32) -> (i32, i32) {
    %c0_i32 = arith.constant 0 : i32
    %c0_i32_0 = arith.constant 0 : i32
    %c0_i32_1 = arith.constant 0 : i32
    return %c0_i32, %c0_i32_0 : i32, i32
  }
  func.func @transform_7(%arg0: i32) -> (i32, i32) {
    %c0_i32 = arith.constant 0 : i32
    %c0_i32_0 = arith.constant 0 : i32
    %c0_i32_1 = arith.constant 0 : i32
    return %c0_i32, %c0_i32_0 : i32, i32
  }
  func.func @transform_8(%arg0: i32) -> (i32, i32) {
    %c0_i32 = arith.constant 0 : i32
    %c0_i32_0 = arith.constant 0 : i32
    %c0_i32_1 = arith.constant 0 : i32
    return %c0_i32, %c0_i32_0 : i32, i32
  }
}

</mosaic_0001>

<bundles_post_ra>
// kernel: model_forward.1
= control target key start
LH: loop header
LB: loop body
LE: loop exit
PB: predicated region body
PF: predicated region fallthrough
CT: control target
= control target key end

     0   :  { %v7593_v3 = vmov 0.0   ;;  %vm103_vm0 = vcmask 261120   ;;  %s4400_s13 = smov 17   ;;  %s4401_s14 = smov 16   ;;  %s7584_s0 = inlined_call_operand.vmem [shape: f32[32,256], index: 0, kind: input, shape index: {}]   ;;  %s7585_s1 = inlined_call_operand.vmem [shape: f32[512,32], index: 1, kind: input, shape index: {}]   ;;  %s7586_s2 = inlined_call_operand.vmem [shape: f32[128,256], index: 2, kind: input, shape index: {}]   ;;  %s7587_s3 = inlined_call_operand.vmem [shape: f32[1,128], index: 3, kind: input, shape index: {}]   ;;  %s7588_s4 = inlined_call_operand.vmem [shape: f32[32,512], index: 4, kind: input, shape index: {}]   ;;  %s7589_s6 = inlined_call_operand.<no memory space> [shape: f32[1,1], index: 6, kind: input, shape index: {}]   ;;  %s7590_s8 = inlined_call_operand.vmem [shape: f32[1,8], index: 8, kind: output, shape index: {1}]   ;;  %s7591_s5 = inlined_call_operand.vmem [shape: f32[16,256], index: 5, kind: input, shape index: {}]   ;;  %s7592_s7 = inlined_call_operand.vmem [shape: f32[2,256], index: 7, kind: output, shape index: {0}]  }
   0x1   :  { %v102_v0 = vld [vmem:[%s7584_s0 + $0x38] sm:$0xff]  ;;  %v101_v1 = vld [vmem:[%s7584_s0 + $0x30] sm:$0xff]  ;;  %v100_v2 = vld [vmem:[%s7584_s0 + $0x28] sm:$0xff]  ;;  %360 = vmatprep.mubr.f32.mxu0 %v7593_v3  ;;  %612 = vmatprep.mubr.f32.mxu1 %v7593_v3  ;;  %s4403_s15 = smov 1   ;;  %s4404_s16 = smov 127  }
   0x2   :  { %320 = vmatprep.subr.mxu0 %v102_v0  ;;  %v99_v4 = vld [vmem:[%s7584_s0 + $0x20] sm:$0xff]  ;;  %4370 = vmatprep.subr.mxu1 %v102_v0  ;;  %v98_v5 = vld [vmem:[%s7584_s0 + $0x18] sm:$0xff]  ;;  %v97_v6 = vld [vmem:[%s7584_s0 + $0x10] sm:$0xff]  ;;  %s4405_s17 = smov 113   ;;  %s4406_s18 = smov 112  }
   0x3   :  { %321 = vmatpush1.msra.mxu0 %v101_v1  ;;  %4374 = vmatpush1.msra.mxu1 %v101_v1  ;;  %v96_v7 = vld [vmem:[%s7584_s0 + $0x8] sm:$0xff]  ;;  %v95_v8 = vld [vmem:[%s7584_s0] sm:$0xff]  ;;  %v73_v11 = vld [vmem:[%s7585_s1 + $0x150] sm:$0xff]  ;;  %s4407_s19 = smov 111  }
   0x4   :  { %322 = vmatprep.subr.mxu0 %v100_v2  ;;  %4371 = vmatprep.subr.mxu1 %v100_v2  ;;  %v31_v9 = vld [vmem:[%s7585_s1] sm:$0xff]  ;;  %v32_v10 = vld [vmem:[%s7585_s1 + $0x8] sm:$0xff]  ;;  %v776_v13 = vld [vmem:[%s7586_s2 + $0xf8] sm:$0xff] }
   0x5   :  { %323 = vmatpush1.msra.mxu0 %v99_v4  ;;  %4375 = vmatpush1.msra.mxu1 %v99_v4  ;;  %v774_v12 = vld [vmem:[%s7586_s2 + $0xe8] sm:$0xff]  ;;  %v773_v14 = vld [vmem:[%s7586_s2 + $0xe0] sm:$0xff]  ;;  %v33_v15 = vld [vmem:[%s7585_s1 + $0x10] sm:$0xff] }
   0x6   :  { %324 = vmatprep.subr.mxu0 %v98_v5  ;;  %4372 = vmatprep.subr.mxu1 %v98_v5  ;;  %v74_v16 = vld [vmem:[%s7585_s1 + $0x158] sm:$0xff]  ;;  %v856_v17 = vpack.c.bf16 %v776_v13, %v774_v12  ;;  %v775_v18 = vld [vmem:[%s7586_s2 + $0xf0] sm:$0xff]  ;;  %v770_v20 = vld [vmem:[%s7586_s2 + $0xc8] sm:$0xff] }
   0x7   :  { %325 = vmatpush1.msra.mxu0 %v97_v6  ;;  %4376 = vmatpush1.msra.mxu1 %v97_v6  ;;  %v855_v19 = vpack.c.bf16 %v775_v18, %v773_v14  ;;  %v772_v21 = vld [vmem:[%s7586_s2 + $0xd8] sm:$0xff]  ;;  %v75_v24 = vld [vmem:[%s7585_s1 + $0x160] sm:$0xff]  ;;  %v771_v26 = vld [vmem:[%s7586_s2 + $0xd0] sm:$0xff] }
   0x8   :  { %326 = vmatprep.subr.mxu0 %v96_v7  ;;  %4373 = vmatprep.subr.mxu1 %v96_v7  ;;  %v854_v22 = vpack.c.bf16 %v772_v21, %v770_v20  ;;  %v34_v23 = vld [vmem:[%s7585_s1 + $0x18] sm:$0xff]  ;;  %v769_v25 = vld [vmem:[%s7586_s2 + $0xc0] sm:$0xff]  ;;  %v766_v27 = vld [vmem:[%s7586_s2 + $0xa8] sm:$0xff] }
   0x9   :  { %327 = vmatpush1.msra.mxu0 %v95_v8  ;;  %4377 = vmatpush1.msra.mxu1 %v95_v8  ;;  %v768_v28 = vld [vmem:[%s7586_s2 + $0xb8] sm:$0xff]  ;;  %v35_v29 = vld [vmem:[%s7585_s1 + $0x20] sm:$0xff]  ;;  %v76_v30 = vld [vmem:[%s7585_s1 + $0x168] sm:$0xff]  ;;  %v853_v31 = vpack.c.bf16 %v771_v26, %v769_v25 }
   0xa   :  { %4175 = vmatmul.mubr.msk.f32.vlgmr.msra.gmra.mxu0 %vm103_vm0, %v31_v9  ;;  %4217 = vmatmul.mubr.msk.f32.vlgmr.msra.gmra.mxu1 %vm103_vm0, %v73_v11  ;;  %v852_v32 = vpack.c.bf16 %v768_v28, %v766_v27  ;;  %v36_v33 = vld [vmem:[%s7585_s1 + $0x28] sm:$0xff]  ;;  %v77_v34 = vld [vmem:[%s7585_s1 + $0x170] sm:$0xff]  ;;  %v765_v35 = vld [vmem:[%s7586_s2 + $0xa0] sm:$0xff] }
   0xb   :  { %366 = vmatprep.mubr.f32.mxu0 %v7593_v3  ;;  %618 = vmatprep.mubr.f32.mxu1 %v7593_v3  ;;  %v767_v36 = vld [vmem:[%s7586_s2 + $0xb0] sm:$0xff]  ;;  %v762_v37 = vld [vmem:[%s7586_s2 + $0x88] sm:$0xff]  ;;  %v764_v38 = vld [vmem:[%s7586_s2 + $0x98] sm:$0xff] }
   0xc   :  { %2627 = vmatprep.subr.mxu0 %v776_v13  ;;  %857 = vmatprep.subr.bf16.mxu1 %v856_v17  ;;  %v37_v39 = vld [vmem:[%s7585_s1 + $0x30] sm:$0xff]  ;;  %v78_v40 = vld [vmem:[%s7585_s1 + $0x178] sm:$0xff]  ;;  %v851_v41 = vpack.c.bf16 %v767_v36, %v765_v35  ;;  %v850_v42 = vpack.c.bf16 %v764_v38, %v762_v37  ;;  %v79_v44 = vld [vmem:[%s7585_s1 + $0x180] sm:$0xff] }
   0xd   :  { %2628 = vmatpush1.msra.mxu0 %v775_v18  ;;  %858 = vmatpush1.bf16.xpose.msra.mxu1 %v855_v19  ;;  %v38_v43 = vld [vmem:[%s7585_s1 + $0x38] sm:$0xff]  ;;  %v761_v45 = vld [vmem:[%s7586_s2 + $0x80] sm:$0xff]  ;;  %v763_v46 = vld [vmem:[%s7586_s2 + $0x90] sm:$0xff] }
   0xe   :  { %4176 = vmatmul.mubr.msk.f32.gmra.mxu0 %vm103_vm0, %v32_v10  ;;  %4218 = vmatmul.mubr.msk.f32.gmra.mxu1 %vm103_vm0, %v74_v16  ;;  %v758_v47 = vld [vmem:[%s7586_s2 + $0x68] sm:$0xff]  ;;  %v760_v48 = vld [vmem:[%s7586_s2 + $0x78] sm:$0xff]  ;;  %v39_v49 = vld [vmem:[%s7585_s1 + $0x40] sm:$0xff]  ;;  %v849_v51 = vpack.c.bf16 %v763_v46, %v761_v45 }
   0xf   :  { %372 = vmatprep.mubr.f32.mxu0 %v7593_v3  ;;  %624 = vmatprep.mubr.f32.mxu1 %v7593_v3  ;;  %v80_v50 = vld [vmem:[%s7585_s1 + $0x188] sm:$0xff]  ;;  %v848_v52 = vpack.c.bf16 %v760_v48, %v758_v47  ;;  %v81_v54 = vld [vmem:[%s7585_s1 + $0x190] sm:$0xff]  ;;  %v757_v55 = vld [vmem:[%s7586_s2 + $0x60] sm:$0xff] }
  0x10   :  { %859 = vmatprep.subr.bf16.mxu1 %v854_v22  ;;  %2629 = vmatprep.subr.mxu0 %v774_v12  ;;  %v40_v53 = vld [vmem:[%s7585_s1 + $0x48] sm:$0xff]  ;;  %v759_v56 = vld [vmem:[%s7586_s2 + $0x70] sm:$0xff]  ;;  %v756_v58 = vld [vmem:[%s7586_s2 + $0x58] sm:$0xff] }
  0x11   :  { %2630 = vmatpush1.msra.mxu0 %v773_v14  ;;  %v754_v57 = vld [vmem:[%s7586_s2 + $0x48] sm:$0xff]  ;;  %v41_v59 = vld [vmem:[%s7585_s1 + $0x50] sm:$0xff]  ;;  %v82_v60 = vld [vmem:[%s7585_s1 + $0x198] sm:$0xff]  ;;  %v847_v61 = vpack.c.bf16 %v759_v56, %v757_v55 }
  0x12   :  { %4177 = vmatmul.mubr.msk.f32.gmra.mxu0 %vm103_vm0, %v33_v15  ;;  %4219 = vmatmul.mubr.msk.f32.gmra.mxu1 %vm103_vm0, %v75_v24  ;;  %v846_v62 = vpack.c.bf16 %v756_v58, %v754_v57  ;;  %v42_v63 = vld [vmem:[%s7585_s1 + $0x58] sm:$0xff]  ;;  %v83_v0 = vld [vmem:[%s7585_s1 + $0x1a0] sm:$0xff]  ;;  %v755_v2 = vld [vmem:[%s7586_s2 + $0x50] sm:$0xff] }
  0x13   :  { %378 = vmatprep.mubr.f32.mxu0 %v7593_v3  ;;  %630 = vmatprep.mubr.f32.mxu1 %v7593_v3  ;;  %v753_v1 = vld [vmem:[%s7586_s2 + $0x40] sm:$0xff]  ;;  %v750_v4 = vld [vmem:[%s7586_s2 + $0x28] sm:$0xff]  ;;  %v752_v5 = vld [vmem:[%s7586_s2 + $0x38] sm:$0xff] }
  0x14   :  { %2631 = vmatprep.subr.mxu0 %v772_v21  ;;  %v43_v6 = vld [vmem:[%s7585_s1 + $0x60] sm:$0xff]  ;;  %v84_v7 = vld [vmem:[%s7585_s1 + $0x1a8] sm:$0xff]  ;;  %v845_v8 = vpack.c.bf16 %v755_v2, %v753_v1  ;;  %v844_v9 = vpack.c.bf16 %v752_v5, %v750_v4  ;;  %v85_v11 = vld [vmem:[%s7585_s1 + $0x1b0] sm:$0xff] }
  0x15   :  { %860 = vmatpush1.bf16.xpose.msra.mxu1 %v853_v31  ;;  %2632 = vmatpush1.msra.mxu0 %v771_v26  ;;  %v44_v10 = vld [vmem:[%s7585_s1 + $0x68] sm:$0xff]  ;;  %v749_v12 = vld [vmem:[%s7586_s2 + $0x20] sm:$0xff]  ;;  %v751_v13 = vld [vmem:[%s7586_s2 + $0x30] sm:$0xff] }
  0x16   :  { %4178 = vmatmul.mubr.msk.f32.gmra.mxu0 %vm103_vm0, %v34_v23  ;;  %4220 = vmatmul.mubr.msk.f32.gmra.mxu1 %vm103_vm0, %v76_v30  ;;  %v746_v14 = vld [vmem:[%s7586_s2 + $0x8] sm:$0xff]  ;;  %v748_v15 = vld [vmem:[%s7586_s2 + $0x18] sm:$0xff]  ;;  %v45_v16 = vld [vmem:[%s7585_s1 + $0x70] sm:$0xff]  ;;  %v843_v18 = vpack.c.bf16 %v751_v13, %v749_v12 }
  0x17   :  { %384 = vmatprep.mubr.f32.mxu0 %v7593_v3  ;;  %636 = vmatprep.mubr.f32.mxu1 %v7593_v3  ;;  %v86_v17 = vld [vmem:[%s7585_s1 + $0x1b8] sm:$0xff]  ;;  %v842_v19 = vpack.c.bf16 %v748_v15, %v746_v14  ;;  %v87_v21 = vld [vmem:[%s7585_s1 + $0x1c0] sm:$0xff]  ;;  %v747_v23 = vld [vmem:[%s7586_s2 + $0x10] sm:$0xff] }
  0x18   :  { %861 = vmatprep.subr.bf16.mxu1 %v852_v32  ;;  %2633 = vmatprep.subr.mxu0 %v770_v20  ;;  %v46_v20 = vld [vmem:[%s7585_s1 + $0x78] sm:$0xff]  ;;  %v745_v22 = vld [vmem:[%s7586_s2] sm:$0xff] }
  0x19   :  { %2634 = vmatpush1.msra.mxu0 %v769_v25  ;;  %v47_v24 = vld [vmem:[%s7585_s1 + $0x80] sm:$0xff]  ;;  %v88_v25 = vld [vmem:[%s7585_s1 + $0x1c8] sm:$0xff]  ;;  %v841_v26 = vpack.c.bf16 %v747_v23, %v745_v22  ;;  %v90_v30 = vld [vmem:[%s7585_s1 + $0x1d8] sm:$0xff] }
  0x1a   :  { %4179 = vmatmul.mubr.msk.f32.gmra.mxu0 %vm103_vm0, %v35_v29  ;;  %4221 = vmatmul.mubr.msk.f32.gmra.mxu1 %vm103_vm0, %v77_v34  ;;  %v49_v29 = vld [vmem:[%s7585_s1 + $0x90] sm:$0xff]  ;;  %v50_v31 = vld [vmem:[%s7585_s1 + $0x98] sm:$0xff]  ;;  %v91_v32 = vld [vmem:[%s7585_s1 + $0x1e0] sm:$0xff] }
  0x1b   :  { %390 = vmatprep.mubr.f32.mxu0 %v7593_v3  ;;  %642 = vmatprep.mubr.f32.mxu1 %v7593_v3  ;;  %v92_v34 = vld [vmem:[%s7585_s1 + $0x1e8] sm:$0xff] }
  0x1c   :  { %2635 = vmatprep.subr.mxu0 %v768_v28  ;;  %v89_v28 = vld [vmem:[%s7585_s1 + $0x1d0] sm:$0xff] }
  0x1d   :  { %862 = vmatpush1.bf16.xpose.msra.mxu1 %v851_v41  ;;  %2636 = vmatpush1.msra.mxu0 %v767_v36  ;;  %v93_v36 = vld [vmem:[%s7585_s1 + $0x1f0] sm:$0xff]  ;;  %v56_v41 = vld [vmem:[%s7585_s1 + $0xc8] sm:$0xff] }
  0x1e   :  { %4180 = vmatmul.mubr.msk.f32.gmra.mxu0 %vm103_vm0, %v36_v33  ;;  %4222 = vmatmul.mubr.msk.f32.gmra.mxu1 %vm103_vm0, %v78_v40  ;;  %v51_v33 = vld [vmem:[%s7585_s1 + $0xa0] sm:$0xff] }
  0x1f   :  { %396 = vmatprep.mubr.f32.mxu0 %v7593_v3  ;;  %648 = vmatprep.mubr.f32.mxu1 %v7593_v3  ;;  %v55_v40 = vld [vmem:[%s7585_s1 + $0xc0] sm:$0xff] }
  0x20   :  { %863 = vmatprep.subr.bf16.mxu1 %v850_v42  ;;  %2637 = vmatprep.subr.mxu0 %v766_v27  ;;  %v48_v27 = vld [vmem:[%s7585_s1 + $0x88] sm:$0xff]  ;;  %v57_v42 = vld [vmem:[%s7585_s1 + $0xd0] sm:$0xff] }
  0x21   :  { %2638 = vmatpush1.msra.mxu0 %v765_v35  ;;  %v52_v35 = vld [vmem:[%s7585_s1 + $0xa8] sm:$0xff] }
  0x22   :  { %4181 = vmatmul.mubr.msk.f32.gmra.mxu0 %vm103_vm0, %v37_v39  ;;  %4223 = vmatmul.mubr.msk.f32.gmra.mxu1 %vm103_vm0, %v79_v44  ;;  %v54_v39 = vld [vmem:[%s7585_s1 + $0xb8] sm:$0xff]  ;;  %v59_v44 = vld [vmem:[%s7585_s1 + $0xe0] sm:$0xff] }
  0x23   :  { %402 = vmatprep.mubr.f32.mxu0 %v7593_v3  ;;  %654 = vmatprep.mubr.f32.mxu1 %v7593_v3 }
  0x24   :  { %2639 = vmatprep.subr.mxu0 %v764_v38  ;;  %v94_v38 = vld [vmem:[%s7585_s1 + $0x1f8] sm:$0xff] }
  0x25   :  { %864 = vmatpush1.bf16.xpose.msra.mxu1 %v849_v51  ;;  %2640 = vmatpush1.msra.mxu0 %v763_v46  ;;  %v61_v46 = vld [vmem:[%s7585_s1 + $0xf0] sm:$0xff]  ;;  %v66_v51 = vld [vmem:[%s7585_s1 + $0x118] sm:$0xff] }
  0x26   :  { %4182 = vmatmul.mubr.msk.f32.gmra.mxu0 %vm103_vm0, %v38_v43  ;;  %4224 = vmatmul.mubr.msk.f32.gmra.mxu1 %vm103_vm0, %v80_v50  ;;  %v58_v43 = vld [vmem:[%s7585_s1 + $0xd8] sm:$0xff]  ;;  %v65_v50 = vld [vmem:[%s7585_s1 + $0x110] sm:$0xff] }
  0x27   :  { %408 = vmatprep.mubr.f32.mxu0 %v7593_v3  ;;  %660 = vmatprep.mubr.f32.mxu1 %v7593_v3 }
  0x28   :  { %865 = vmatprep.subr.bf16.mxu1 %v848_v52  ;;  %2641 = vmatprep.subr.mxu0 %v762_v37  ;;  %v53_v37 = vld [vmem:[%s7585_s1 + $0xb0] sm:$0xff]  ;;  %v67_v52 = vld [vmem:[%s7585_s1 + $0x120] sm:$0xff] }
  0x29   :  { %2642 = vmatpush1.msra.mxu0 %v761_v45  ;;  %v60_v45 = vld [vmem:[%s7585_s1 + $0xe8] sm:$0xff] }
  0x2a   :  { %4183 = vmatmul.mubr.msk.f32.gmra.mxu0 %vm103_vm0, %v39_v49  ;;  %4225 = vmatmul.mubr.msk.f32.gmra.mxu1 %vm103_vm0, %v81_v54  ;;  %v64_v49 = vld [vmem:[%s7585_s1 + $0x108] sm:$0xff]  ;;  %v69_v54 = vld [vmem:[%s7585_s1 + $0x130] sm:$0xff] }
  0x2b   :  { %414 = vmatprep.mubr.f32.mxu0 %v7593_v3  ;;  %666 = vmatprep.mubr.f32.mxu1 %v7593_v3 }
  0x2c   :  { %2643 = vmatprep.subr.mxu0 %v760_v48  ;;  %v63_v48 = vld [vmem:[%s7585_s1 + $0x100] sm:$0xff] }
  0x2d   :  { %866 = vmatpush1.bf16.xpose.msra.mxu1 %v847_v61  ;;  %2644 = vmatpush1.msra.mxu0 %v759_v56  ;;  %v71_v56 = vld [vmem:[%s7585_s1 + $0x140] sm:$0xff] }
  0x2e   :  { %4184 = vmatmul.mubr.msk.f32.gmra.mxu0 %vm103_vm0, %v40_v53  ;;  %4226 = vmatmul.mubr.msk.f32.gmra.mxu1 %vm103_vm0, %v82_v60  ;;  %v68_v53 = vld [vmem:[%s7585_s1 + $0x128] sm:$0xff] }
  0x2f   :  { %420 = vmatprep.mubr.f32.mxu0 %v7593_v3  ;;  %672 = vmatprep.mubr.f32.mxu1 %v7593_v3 }
  0x30   :  { %867 = vmatprep.subr.bf16.mxu1 %v846_v62  ;;  %2645 = vmatprep.subr.mxu0 %v758_v47  ;;  %v62_v47 = vld [vmem:[%s7585_s1 + $0xf8] sm:$0xff] }
  0x31   :  { %2646 = vmatpush1.msra.mxu0 %v757_v55  ;;  %v70_v55 = vld [vmem:[%s7585_s1 + $0x138] sm:$0xff] }
  0x32   :  { %4185 = vmatmul.mubr.msk.f32.gmra.mxu0 %vm103_vm0, %v41_v59  ;;  %4227 = vmatmul.mubr.msk.f32.gmra.mxu1 %vm103_vm0, %v83_v0 }
  0x33   :  { %426 = vmatprep.mubr.f32.mxu0 %v7593_v3  ;;  %678 = vmatprep.mubr.f32.mxu1 %v7593_v3 }
  0x34   :  { %2647 = vmatprep.subr.mxu0 %v756_v58 }
  0x35   :  { %868 = vmatpush1.bf16.xpose.msra.mxu1 %v845_v8  ;;  %2648 = vmatpush1.msra.mxu0 %v755_v2 }
  0x36   :  { %4186 = vmatmul.mubr.msk.f32.gmra.mxu0 %vm103_vm0, %v42_v63  ;;  %4228 = vmatmul.mubr.msk.f32.gmra.mxu1 %vm103_vm0, %v84_v7 }
  0x37   :  { %432 = vmatprep.mubr.f32.mxu0 %v7593_v3  ;;  %684 = vmatprep.mubr.f32.mxu1 %v7593_v3 }
  0x38   :  { %869 = vmatprep.subr.bf16.mxu1 %v844_v9  ;;  %2649 = vmatprep.subr.mxu0 %v754_v57  ;;  %v72_v57 = vld [vmem:[%s7585_s1 + $0x148] sm:$0xff] }
  0x39   :  { %2650 = vmatpush1.msra.mxu0 %v753_v1 }
  0x3a   :  { %4187 = vmatmul.mubr.msk.f32.gmra.mxu0 %vm103_vm0, %v43_v6  ;;  %4229 = vmatmul.mubr.msk.f32.gmra.mxu1 %vm103_vm0, %v85_v11 }
  0x3b   :  { %438 = vmatprep.mubr.f32.mxu0 %v7593_v3  ;;  %690 = vmatprep.mubr.f32.mxu1 %v7593_v3 }
  0x3c   :  { %2651 = vmatprep.subr.mxu0 %v752_v5 }
  0x3d   :  { %870 = vmatpush1.bf16.xpose.msra.mxu1 %v843_v18  ;;  %2652 = vmatpush1.msra.mxu0 %v751_v13 }
  0x3e   :  { %4188 = vmatmul.mubr.msk.f32.gmra.mxu0 %vm103_vm0, %v44_v10  ;;  %4230 = vmatmul.mubr.msk.f32.gmra.mxu1 %vm103_vm0, %v86_v17 }
  0x3f   :  { %444 = vmatprep.mubr.f32.mxu0 %v7593_v3  ;;  %696 = vmatprep.mubr.f32.mxu1 %v7593_v3 }
  0x40   :  { %871 = vmatprep.subr.bf16.mxu1 %v842_v19  ;;  %2653 = vmatprep.subr.mxu0 %v750_v4 }
  0x41   :  { %2654 = vmatpush1.msra.mxu0 %v749_v12 }
  0x42   :  { %4189 = vmatmul.mubr.msk.f32.gmra.mxu0 %vm103_vm0, %v45_v16  ;;  %4231 = vmatmul.mubr.msk.f32.gmra.mxu1 %vm103_vm0, %v87_v21 }
  0x43   :  { %450 = vmatprep.mubr.f32.mxu0 %v7593_v3  ;;  %702 = vmatprep.mubr.f32.mxu1 %v7593_v3 }
  0x44   :  { %2655 = vmatprep.subr.mxu0 %v748_v15 }
  0x45   :  { %872 = vmatpush1.bf16.xpose.msra.mxu1 %v841_v26  ;;  %2656 = vmatpush1.msra.mxu0 %v747_v23 }
  0x46   :  { %4190 = vmatmul.mubr.msk.f32.gmra.mxu0 %vm103_vm0, %v46_v20  ;;  %4232 = vmatmul.mubr.msk.f32.gmra.mxu1 %vm103_vm0, %v88_v25 }
  0x47   :  { %456 = vmatprep.mubr.f32.mxu0 %v7593_v3  ;;  %708 = vmatprep.mubr.f32.mxu1 %v7593_v3 }
  0x48   :  { %2657 = vmatprep.subr.mxu0 %v746_v14 }
  0x49   :  { %2658 = vmatpush1.msra.mxu0 %v745_v22 }
  0x4a   :  { %4191 = vmatmul.mubr.msk.f32.gmra.mxu0 %vm103_vm0, %v47_v24  ;;  %4233 = vmatmul.mubr.msk.f32.gmra.mxu1 %vm103_vm0, %v89_v28 }
  0x4b   :  { %462 = vmatprep.mubr.f32.mxu0 %v7593_v3  ;;  %714 = vmatprep.mubr.f32.mxu1 %v7593_v3 }
  0x4e   :  { %4192 = vmatmul.mubr.msk.f32.gmra.mxu0 %vm103_vm0, %v48_v27  ;;  %4234 = vmatmul.mubr.msk.f32.gmra.mxu1 %vm103_vm0, %v90_v30 }
  0x4f   :  { %468 = vmatprep.mubr.f32.mxu0 %v7593_v3  ;;  %720 = vmatprep.mubr.f32.mxu1 %v7593_v3 }
  0x52   :  { %4193 = vmatmul.mubr.msk.f32.gmra.mxu0 %vm103_vm0, %v49_v29  ;;  %4235 = vmatmul.mubr.msk.f32.gmra.mxu1 %vm103_vm0, %v91_v32 }
  0x53   :  { %474 = vmatprep.mubr.f32.mxu0 %v7593_v3  ;;  %726 = vmatprep.mubr.f32.mxu1 %v7593_v3 }
  0x56   :  { %4194 = vmatmul.mubr.msk.f32.gmra.mxu0 %vm103_vm0, %v50_v31  ;;  %4236 = vmatmul.mubr.msk.f32.gmra.mxu1 %vm103_vm0, %v92_v34 }
  0x57   :  { %480 = vmatprep.mubr.f32.mxu0 %v7593_v3  ;;  %732 = vmatprep.mubr.f32.mxu1 %v7593_v3 }
  0x5a   :  { %4195 = vmatmul.mubr.msk.f32.gmra.mxu0 %vm103_vm0, %v51_v33  ;;  %4237 = vmatmul.mubr.msk.f32.gmra.mxu1 %vm103_vm0, %v93_v36 }
  0x5b   :  { %486 = vmatprep.mubr.f32.mxu0 %v7593_v3  ;;  %738 = vmatprep.mubr.f32.mxu1 %v7593_v3 }
  0x5e   :  { %4196 = vmatmul.mubr.msk.f32.gmra.mxu0 %vm103_vm0, %v52_v35  ;;  %4238 = vmatmul.mubr.msk.f32.gmra.mxu1 %vm103_vm0, %v94_v38 }
  0x5f   :  { %492 = vmatprep.mubr.f32.mxu0 %v7593_v3 }
  0x62   :  { %4197 = vmatmul.mubr.msk.f32.gmra.mxu0 %vm103_vm0, %v53_v37 }
  0x63   :  { %498 = vmatprep.mubr.f32.mxu0 %v7593_v3 }
  0x66   :  { %4198 = vmatmul.mubr.msk.f32.gmra.mxu0 %vm103_vm0, %v54_v39 }
  0x67   :  { %504 = vmatprep.mubr.f32.mxu0 %v7593_v3 }
  0x6a   :  { %4199 = vmatmul.mubr.msk.f32.gmra.mxu0 %vm103_vm0, %v55_v40 }
  0x6b   :  { %510 = vmatprep.mubr.f32.mxu0 %v7593_v3 }
  0x6e   :  { %4200 = vmatmul.mubr.msk.f32.gmra.mxu0 %vm103_vm0, %v56_v41 }
  0x6f   :  { %516 = vmatprep.mubr.f32.mxu0 %v7593_v3 }
  0x72   :  { %4201 = vmatmul.mubr.msk.f32.gmra.mxu0 %vm103_vm0, %v57_v42 }
  0x73   :  { %522 = vmatprep.mubr.f32.mxu0 %v7593_v3 }
  0x76   :  { %4202 = vmatmul.mubr.msk.f32.gmra.mxu0 %vm103_vm0, %v58_v43 }
  0x77   :  { %528 = vmatprep.mubr.f32.mxu0 %v7593_v3 }
  0x7a   :  { %4203 = vmatmul.mubr.msk.f32.gmra.mxu0 %vm103_vm0, %v59_v44 }
  0x7b   :  { %534 = vmatprep.mubr.f32.mxu0 %v7593_v3 }
  0x7e   :  { %4204 = vmatmul.mubr.msk.f32.gmra.mxu0 %vm103_vm0, %v60_v45 }
  0x7f   :  { %540 = vmatprep.mubr.f32.mxu0 %v7593_v3 }
  0x82   :  { %4205 = vmatmul.mubr.msk.f32.gmra.mxu0 %vm103_vm0, %v61_v46 }
  0x83   :  { %546 = vmatprep.mubr.f32.mxu0 %v7593_v3 }
  0x86   :  { %4206 = vmatmul.mubr.msk.f32.gmra.mxu0 %vm103_vm0, %v62_v47 }
  0x87   :  { %552 = vmatprep.mubr.f32.mxu0 %v7593_v3 }
  0x8a   :  { %4207 = vmatmul.mubr.msk.f32.gmra.mxu0 %vm103_vm0, %v63_v48 }
  0x8b   :  { %558 = vmatprep.mubr.f32.mxu0 %v7593_v3 }
  0x8e   :  { %4208 = vmatmul.mubr.msk.f32.gmra.mxu0 %vm103_vm0, %v64_v49 }
  0x8f   :  { %564 = vmatprep.mubr.f32.mxu0 %v7593_v3 }
  0x92   :  { %4209 = vmatmul.mubr.msk.f32.gmra.mxu0 %vm103_vm0, %v65_v50 }
  0x93   :  { %570 = vmatprep.mubr.f32.mxu0 %v7593_v3 }
  0x96   :  { %4210 = vmatmul.mubr.msk.f32.gmra.mxu0 %vm103_vm0, %v66_v51 }
  0x97   :  { %576 = vmatprep.mubr.f32.mxu0 %v7593_v3 }
  0x9a   :  { %4211 = vmatmul.mubr.msk.f32.gmra.mxu0 %vm103_vm0, %v67_v52 }
  0x9b   :  { %582 = vmatprep.mubr.f32.mxu0 %v7593_v3 }
  0x9e   :  { %4212 = vmatmul.mubr.msk.f32.gmra.mxu0 %vm103_vm0, %v68_v53 }
  0x9f   :  { %588 = vmatprep.mubr.f32.mxu0 %v7593_v3 }
  0xa2   :  { %4213 = vmatmul.mubr.msk.f32.gmra.mxu0 %vm103_vm0, %v69_v54 }
  0xa3   :  { %594 = vmatprep.mubr.f32.mxu0 %v7593_v3 }
  0xa6   :  { %4214 = vmatmul.mubr.msk.f32.gmra.mxu0 %vm103_vm0, %v70_v55 }
  0xa7   :  { %600 = vmatprep.mubr.f32.mxu0 %v7593_v3 }
  0xaa   :  { %4215 = vmatmul.mubr.msk.f32.gmra.mxu0 %vm103_vm0, %v71_v56 }
  0xab   :  { %606 = vmatprep.mubr.f32.mxu0 %v7593_v3 }
  0xae   :  { %4216 = vmatmul.mubr.msk.f32.gmra.mxu0 %vm103_vm0, %v72_v57 }
  0xaf   :  { %2691 = vmatprep.mubr.f32.mxu0 %v7593_v3 }
  0xca   :  { %v4894_v58 = vpop.f32.mrf.mxu0  ;;  %v4936_v16 = vpop.f32.mrf.mxu1 }
  0xcb   :  { %7814 = vst [vmem:[#allocation3_spill] sm:$0xff] %v4894_v58  ;;  %7829 = vst [vmem:[#allocation18_spill] sm:$0xff] %v4936_v16 }
  0xcc   :  { %v4896_v59 = vpop.f32.mrf.mxu0  ;;  %v4946_v21 = vpop.f32.mrf.mxu1 }
  0xcd   :  { %7815 = vst [vmem:[#allocation4_spill] sm:$0xff] %v4896_v59  ;;  %7832 = vst [vmem:[#allocation21_spill] sm:$0xff] %v4946_v21 }
  0xce   :  { %v4898_v60 = vpop.f32.mrf.mxu0  ;;  %v4952_v24 = vpop.f32.mrf.mxu1 }
  0xcf   :  { %7816 = vst [vmem:[#allocation5_spill] sm:$0xff] %v4898_v60  ;;  %v777_v63 = vpack.c.bf16 %v4898_v60, %v4894_v58  ;;  %7835 = vst [vmem:[#allocation24_spill] sm:$0xff] %v4952_v24 }
  0xd0   :  { %v4900_v61 = vpop.f32.mrf.mxu0  ;;  %v4962_v29 = vpop.f32.mrf.mxu1 }
  0xd1   :  { %7817 = vst [vmem:[#allocation6_spill] sm:$0xff] %v4900_v61  ;;  %v778_v62 = vpack.c.bf16 %v4900_v61, %v4896_v59  ;;  %7838 = vst [vmem:[#allocation27_spill] sm:$0xff] %v4962_v29 }
  0xd2   :  { %v4906_v0 = vpop.f32.mrf.mxu0  ;;  %v4968_v32 = vpop.f32.mrf.mxu1 }
  0xd3   :  { %7818 = vst [vmem:[#allocation7_spill] sm:$0xff] %v4906_v0  ;;  %889 = vmatprep.mubr.bf16.mxu1 %v778_v62  ;;  %7841 = vst [vmem:[#allocation30_spill] sm:$0xff] %v4968_v32 }
  0xd4   :  { %v4908_v1 = vpop.f32.mrf.mxu0  ;;  %890 = vmatmul.mubr.bf16.vlgmr.msra.gmra.mxu1 %v777_v63  ;;  %v4978_v37 = vpop.f32.mrf.mxu1 }
  0xd5   :  { %7819 = vst [vmem:[#allocation8_spill] sm:$0xff] %v4908_v1  ;;  %7844 = vst [vmem:[#allocation33_spill] sm:$0xff] %v4978_v37 }
  0xd6   :  { %v4910_v2 = vpop.f32.mrf.mxu0  ;;  %v4984_v40 = vpop.f32.mrf.mxu1 }
  0xd7   :  { %7820 = vst [vmem:[#allocation9_spill] sm:$0xff] %v4910_v2  ;;  %v779_v6 = vpack.c.bf16 %v4910_v2, %v4906_v0  ;;  %7847 = vst [vmem:[#allocation36_spill] sm:$0xff] %v4984_v40 }
  0xd8   :  { %v4912_v4 = vpop.f32.mrf.mxu0  ;;  %v4994_v45 = vpop.f32.mrf.mxu1 }
  0xd9   :  { %7821 = vst [vmem:[#allocation10_spill] sm:$0xff] %v4912_v4  ;;  %v780_v5 = vpack.c.bf16 %v4912_v4, %v4908_v1  ;;  %7850 = vst [vmem:[#allocation39_spill] sm:$0xff] %v4994_v45 }
  0xda   :  { %v4918_v7 = vpop.f32.mrf.mxu0  ;;  %v5000_v48 = vpop.f32.mrf.mxu1 }
  0xdb   :  { %7822 = vst [vmem:[#allocation11_spill] sm:$0xff] %v4918_v7  ;;  %897 = vmatprep.mubr.bf16.mxu1 %v780_v5  ;;  %7853 = vst [vmem:[#allocation42_spill] sm:$0xff] %v5000_v48 }
  0xdc   :  { %v4920_v8 = vpop.f32.mrf.mxu0  ;;  %898 = vmatmul.mubr.bf16.gmra.mxu1 %v779_v6  ;;  %v5010_v53 = vpop.f32.mrf.mxu1 }
  0xdd   :  { %7823 = vst [vmem:[#allocation12_spill] sm:$0xff] %v4920_v8  ;;  %7856 = vst [vmem:[#allocation45_spill] sm:$0xff] %v5010_v53 }
  0xde   :  { %v4922_v9 = vpop.f32.mrf.mxu0  ;;  %v5016_v56 = vpop.f32.mrf.mxu1 }
  0xdf   :  { %7824 = vst [vmem:[#allocation13_spill] sm:$0xff] %v4922_v9  ;;  %v781_v12 = vpack.c.bf16 %v4922_v9, %v4918_v7  ;;  %7859 = vst [vmem:[#allocation48_spill] sm:$0xff] %v5016_v56 }
  0xe0   :  { %v4924_v10 = vpop.f32.mrf.mxu0  ;;  %v5026_v6 = vpop.f32.mrf.mxu1 }
  0xe1   :  { %7825 = vst [vmem:[#allocation14_spill] sm:$0xff] %v4924_v10  ;;  %v782_v11 = vpack.c.bf16 %v4924_v10, %v4920_v8  ;;  %7862 = vst [vmem:[#allocation51_spill] sm:$0xff] %v5026_v6 }
  0xe2   :  { %v4930_v13 = vpop.f32.mrf.mxu0 }
  0xe3   :  { %7826 = vst [vmem:[#allocation15_spill] sm:$0xff] %v4930_v13  ;;  %905 = vmatprep.mubr.bf16.mxu1 %v782_v11 }
  0xe4   :  { %v4932_v14 = vpop.f32.mrf.mxu0  ;;  %906 = vmatmul.mubr.bf16.gmra.mxu1 %v781_v12 }
  0xe5   :  { %7827 = vst [vmem:[#allocation16_spill] sm:$0xff] %v4932_v14 }
  0xe6   :  { %v4934_v15 = vpop.f32.mrf.mxu0 }
  0xe7   :  { %7828 = vst [vmem:[#allocation17_spill] sm:$0xff] %v4934_v15  ;;  %v783_v19 = vpack.c.bf16 %v4934_v15, %v4930_v13 }
  0xe8   :  { %v4938_v17 = vpop.f32.mrf.mxu0 }
  0xe9   :  { %7830 = vst [vmem:[#allocation19_spill] sm:$0xff] %v4938_v17  ;;  %v784_v18 = vpack.c.bf16 %v4938_v17, %v4932_v14 }
  0xea   :  { %v4944_v20 = vpop.f32.mrf.mxu0 }
  0xeb   :  { %7831 = vst [vmem:[#allocation20_spill] sm:$0xff] %v4944_v20  ;;  %913 = vmatprep.mubr.bf16.mxu1 %v784_v18  ;;  %v5032_v18 = vpop.f32.mrf.mxu1 }
  0xec   :  { %v4948_v22 = vpop.f32.mrf.mxu0  ;;  %914 = vmatmul.mubr.bf16.gmra.mxu1 %v783_v19  ;;  %7865 = vst [vmem:[#allocation54_spill] sm:$0xff] %v5032_v18 }
  0xed   :  { %7833 = vst [vmem:[#allocation22_spill] sm:$0xff] %v4948_v22 }
  0xee   :  { %v4950_v23 = vpop.f32.mrf.mxu0 }
  0xef   :  { %7834 = vst [vmem:[#allocation23_spill] sm:$0xff] %v4950_v23  ;;  %v785_v27 = vpack.c.bf16 %v4950_v23, %v4944_v20 }
  0xf0   :  { %v4954_v25 = vpop.f32.mrf.mxu0 }
  0xf1   :  { %7836 = vst [vmem:[#allocation25_spill] sm:$0xff] %v4954_v25  ;;  %v786_v26 = vpack.c.bf16 %v4954_v25, %v4948_v22 }
  0xf2   :  { %v4960_v28 = vpop.f32.mrf.mxu0 }
  0xf3   :  { %7837 = vst [vmem:[#allocation26_spill] sm:$0xff] %v4960_v28  ;;  %921 = vmatprep.mubr.bf16.mxu1 %v786_v26 }
  0xf4   :  { %v4964_v30 = vpop.f32.mrf.mxu0  ;;  %922 = vmatmul.mubr.bf16.gmra.mxu1 %v785_v27 }
  0xf5   :  { %7839 = vst [vmem:[#allocation28_spill] sm:$0xff] %v4964_v30 }
  0xf6   :  { %v4966_v31 = vpop.f32.mrf.mxu0 }
  0xf7   :  { %7840 = vst [vmem:[#allocation29_spill] sm:$0xff] %v4966_v31  ;;  %v787_v35 = vpack.c.bf16 %v4966_v31, %v4960_v28 }
  0xf8   :  { %v4970_v33 = vpop.f32.mrf.mxu0 }
  0xf9   :  { %7842 = vst [vmem:[#allocation31_spill] sm:$0xff] %v4970_v33  ;;  %v788_v34 = vpack.c.bf16 %v4970_v33, %v4964_v30 }
  0xfa   :  { %v4976_v36 = vpop.f32.mrf.mxu0 }
  0xfb   :  { %7843 = vst [vmem:[#allocation32_spill] sm:$0xff] %v4976_v36  ;;  %929 = vmatprep.mubr.bf16.mxu1 %v788_v34 }
  0xfc   :  { %v4980_v38 = vpop.f32.mrf.mxu0  ;;  %930 = vmatmul.mubr.bf16.gmra.mxu1 %v787_v35  ;;  %v5042_v35 = vpop.f32.mrf.mxu1 }
  0xfd   :  { %7845 = vst [vmem:[#allocation34_spill] sm:$0xff] %v4980_v38  ;;  %7868 = vst [vmem:[#allocation57_spill] sm:$0xff] %v5042_v35 }
  0xfe   :  { %v4982_v39 = vpop.f32.mrf.mxu0 }
  0xff   :  { %7846 = vst [vmem:[#allocation35_spill] sm:$0xff] %v4982_v39  ;;  %v789_v43 = vpack.c.bf16 %v4982_v39, %v4976_v36 }
 0x100   :  { %v4986_v41 = vpop.f32.mrf.mxu0 }
 0x101   :  { %7848 = vst [vmem:[#allocation37_spill] sm:$0xff] %v4986_v41  ;;  %v790_v42 = vpack.c.bf16 %v4986_v41, %v4980_v38 }
 0x102   :  { %v4992_v44 = vpop.f32.mrf.mxu0 }
 0x103   :  { %7849 = vst [vmem:[#allocation38_spill] sm:$0xff] %v4992_v44  ;;  %937 = vmatprep.mubr.bf16.mxu1 %v790_v42 }
 0x104   :  { %v4996_v46 = vpop.f32.mrf.mxu0  ;;  %938 = vmatmul.mubr.bf16.gmra.mxu1 %v789_v43 }
 0x105   :  { %7851 = vst [vmem:[#allocation40_spill] sm:$0xff] %v4996_v46 }
 0x106   :  { %v4998_v47 = vpop.f32.mrf.mxu0 }
 0x107   :  { %7852 = vst [vmem:[#allocation41_spill] sm:$0xff] %v4998_v47  ;;  %v791_v51 = vpack.c.bf16 %v4998_v47, %v4992_v44 }
 0x108   :  { %v5002_v49 = vpop.f32.mrf.mxu0 }
 0x109   :  { %7854 = vst [vmem:[#allocation43_spill] sm:$0xff] %v5002_v49  ;;  %v792_v50 = vpack.c.bf16 %v5002_v49, %v4996_v46 }
 0x10a   :  { %v5008_v52 = vpop.f32.mrf.mxu0 }
 0x10b   :  { %7855 = vst [vmem:[#allocation44_spill] sm:$0xff] %v5008_v52  ;;  %945 = vmatprep.mubr.bf16.mxu1 %v792_v50  ;;  %v5048_v50 = vpop.f32.mrf.mxu1 }
 0x10c   :  { %v5012_v54 = vpop.f32.mrf.mxu0  ;;  %946 = vmatmul.mubr.bf16.gmra.mxu1 %v791_v51  ;;  %7871 = vst [vmem:[#allocation60_spill] sm:$0xff] %v5048_v50 }
 0x10d   :  { %7857 = vst [vmem:[#allocation46_spill] sm:$0xff] %v5012_v54 }
 0x10e   :  { %v5014_v55 = vpop.f32.mrf.mxu0 }
 0x10f   :  { %7858 = vst [vmem:[#allocation47_spill] sm:$0xff] %v5014_v55  ;;  %v793_v63 = vpack.c.bf16 %v5014_v55, %v5008_v52 }
 0x110   :  { %v5018_v57 = vpop.f32.mrf.mxu0 }
 0x111   :  { %7860 = vst [vmem:[#allocation49_spill] sm:$0xff] %v5018_v57  ;;  %v794_v62 = vpack.c.bf16 %v5018_v57, %v5012_v54 }
 0x112   :  { %v5024_v5 = vpop.f32.mrf.mxu0 }
 0x113   :  { %7861 = vst [vmem:[#allocation50_spill] sm:$0xff] %v5024_v5  ;;  %953 = vmatprep.mubr.bf16.mxu1 %v794_v62 }
 0x114   :  { %v5028_v11 = vpop.f32.mrf.mxu0  ;;  %954 = vmatmul.mubr.bf16.gmra.mxu1 %v793_v63 }
 0x115   :  { %7863 = vst [vmem:[#allocation52_spill] sm:$0xff] %v5028_v11 }
 0x116   :  { %v5030_v12 = vpop.f32.mrf.mxu0 }
 0x117   :  { %7864 = vst [vmem:[#allocation53_spill] sm:$0xff] %v5030_v12  ;;  %v795_v27 = vpack.c.bf16 %v5030_v12, %v5024_v5 }
 0x118   :  { %v5034_v19 = vpop.f32.mrf.mxu0 }
 0x119   :  { %7866 = vst [vmem:[#allocation55_spill] sm:$0xff] %v5034_v19  ;;  %v796_v26 = vpack.c.bf16 %v5034_v19, %v5028_v11  ;;  %v5058_v19 = vpop.f32.mrf.mxu1 }
 0x11a   :  { %v5040_v34 = vpop.f32.mrf.mxu0  ;;  %7874 = vst [vmem:[#allocation63_spill] sm:$0xff] %v5058_v19 }
 0x11b   :  { %7867 = vst [vmem:[#allocation56_spill] sm:$0xff] %v5040_v34  ;;  %961 = vmatprep.mubr.bf16.mxu1 %v796_v26  ;;  %v5064_v12 = vpop.f32.mrf.mxu1 }
 0x11c   :  { %v5044_v42 = vpop.f32.mrf.mxu0  ;;  %962 = vmatmul.mubr.bf16.gmra.mxu1 %v795_v27  ;;  %7877 = vst [vmem:[#allocation66_spill] sm:$0xff] %v5064_v12 }
 0x11d   :  { %7869 = vst [vmem:[#allocation58_spill] sm:$0xff] %v5044_v42 }
 0x11e   :  { %v5046_v43 = vpop.f32.mrf.mxu0 }
 0x11f   :  { %7870 = vst [vmem:[#allocation59_spill] sm:$0xff] %v5046_v43  ;;  %v797_v63 = vpack.c.bf16 %v5046_v43, %v5040_v34  ;;  %v5074_v34 = vpop.f32.mrf.mxu1 }
 0x120   :  { %v5050_v51 = vpop.f32.mrf.mxu0  ;;  %7880 = vst [vmem:[#allocation69_spill] sm:$0xff] %v5074_v34 }
 0x121   :  { %7872 = vst [vmem:[#allocation61_spill] sm:$0xff] %v5050_v51  ;;  %v798_v62 = vpack.c.bf16 %v5050_v51, %v5044_v42  ;;  %v5080_v5 = vpop.f32.mrf.mxu1 }
 0x122   :  { %v5056_v3 = vpop.f32.mrf.mxu0  ;;  %7883 = vst [vmem:[#allocation72_spill] sm:$0xff] %v5080_v5 }
 0x123   :  { %7873 = vst [vmem:[#allocation62_spill] sm:$0xff] %v5056_v3  ;;  %969 = vmatprep.mubr.bf16.mxu1 %v798_v62 }
 0x124   :  { %v5060_v26 = vpop.f32.mrf.mxu0  ;;  %970 = vmatmul.mubr.bf16.gmra.mxu1 %v797_v63 }
 0x125   :  { %7875 = vst [vmem:[#allocation64_spill] sm:$0xff] %v5060_v26 }
 0x126   :  { %v5062_v27 = vpop.f32.mrf.mxu0 }
 0x127   :  { %7876 = vst [vmem:[#allocation65_spill] sm:$0xff] %v5062_v27  ;;  %v799_v43 = vpack.c.bf16 %v5062_v27, %v5056_v3  ;;  %v5090_v3 = vpop.f32.mrf.mxu1 }
 0x128   :  { %v5066_v11 = vpop.f32.mrf.mxu0  ;;  %7886 = vst [vmem:[#allocation75_spill] sm:$0xff] %v5090_v3 }
 0x129   :  { %7878 = vst [vmem:[#allocation67_spill] sm:$0xff] %v5066_v11  ;;  %v800_v51 = vpack.c.bf16 %v5066_v11, %v5060_v26  ;;  %v5096_v55 = vpop.f32.mrf.mxu1 }
 0x12a   :  { %v5072_v42 = vpop.f32.mrf.mxu0  ;;  %7889 = vst [vmem:[#allocation78_spill] sm:$0xff] %v5096_v55 }
 0x12b   :  { %7879 = vst [vmem:[#allocation68_spill] sm:$0xff] %v5072_v42  ;;  %977 = vmatprep.mubr.bf16.mxu1 %v800_v51 }
 0x12c   :  { %v5076_v62 = vpop.f32.mrf.mxu0  ;;  %978 = vmatmul.mubr.bf16.gmra.mxu1 %v799_v43 }
 0x12d   :  { %7881 = vst [vmem:[#allocation70_spill] sm:$0xff] %v5076_v62 }
 0x12e   :  { %v5078_v63 = vpop.f32.mrf.mxu0 }
 0x12f   :  { %7882 = vst [vmem:[#allocation71_spill] sm:$0xff] %v5078_v63  ;;  %v801_v27 = vpack.c.bf16 %v5078_v63, %v5072_v42  ;;  %v5106_v42 = vpop.f32.mrf.mxu1 }
 0x130   :  { %v5082_v57 = vpop.f32.mrf.mxu0  ;;  %7892 = vst [vmem:[#allocation81_spill] sm:$0xff] %v5106_v42 }
 0x131   :  { %7884 = vst [vmem:[#allocation73_spill] sm:$0xff] %v5082_v57  ;;  %v802_v11 = vpack.c.bf16 %v5082_v57, %v5076_v62  ;;  %v5112_v52 = vpop.f32.mrf.mxu1 }
 0x132   :  { %v5088_v26 = vpop.f32.mrf.mxu0  ;;  %7895 = vst [vmem:[#allocation84_spill] sm:$0xff] %v5112_v52 }
 0x133   :  { %7885 = vst [vmem:[#allocation74_spill] sm:$0xff] %v5088_v26  ;;  %985 = vmatprep.mubr.bf16.mxu1 %v802_v11 }
 0x134   :  { %v5092_v51 = vpop.f32.mrf.mxu0  ;;  %986 = vmatmul.mubr.bf16.gmra.mxu1 %v801_v27 }
 0x135   :  { %7887 = vst [vmem:[#allocation76_spill] sm:$0xff] %v5092_v51 }
 0x136   :  { %v5094_v43 = vpop.f32.mrf.mxu0 }
 0x137   :  { %7888 = vst [vmem:[#allocation77_spill] sm:$0xff] %v5094_v43  ;;  %v803_v63 = vpack.c.bf16 %v5094_v43, %v5088_v26  ;;  %v5122_v26 = vpop.f32.mrf.mxu1 }
 0x138   :  { %v5098_v54 = vpop.f32.mrf.mxu0  ;;  %7898 = vst [vmem:[#allocation87_spill] sm:$0xff] %v5122_v26 }
 0x139   :  { %7890 = vst [vmem:[#allocation79_spill] sm:$0xff] %v5098_v54  ;;  %v804_v57 = vpack.c.bf16 %v5098_v54, %v5092_v51  ;;  %v5128_v47 = vpop.f32.mrf.mxu1 }
 0x13a   :  { %v5104_v62 = vpop.f32.mrf.mxu0  ;;  %7901 = vst [vmem:[#allocation90_spill] sm:$0xff] %v5128_v47 }
 0x13b   :  { %7891 = vst [vmem:[#allocation80_spill] sm:$0xff] %v5104_v62  ;;  %993 = vmatprep.mubr.bf16.mxu1 %v804_v57 }
 0x13c   :  { %v5108_v11 = vpop.f32.mrf.mxu0  ;;  %994 = vmatmul.mubr.bf16.gmra.mxu1 %v803_v63 }
 0x13d   :  { %7893 = vst [vmem:[#allocation82_spill] sm:$0xff] %v5108_v11 }
 0x13e   :  { %v5110_v27 = vpop.f32.mrf.mxu0 }
 0x13f   :  { %7894 = vst [vmem:[#allocation83_spill] sm:$0xff] %v5110_v27  ;;  %v805_v43 = vpack.c.bf16 %v5110_v27, %v5104_v62  ;;  %v5138_v62 = vpop.f32.mrf.mxu1 }
 0x140   :  { %v5114_v49 = vpop.f32.mrf.mxu0  ;;  %7904 = vst [vmem:[#allocation93_spill] sm:$0xff] %v5138_v62 }
 0x141   :  { %7896 = vst [vmem:[#allocation85_spill] sm:$0xff] %v5114_v49  ;;  %v806_v54 = vpack.c.bf16 %v5114_v49, %v5108_v11  ;;  %v5144_v44 = vpop.f32.mrf.mxu1 }
 0x142   :  { %v5120_v51 = vpop.f32.mrf.mxu0  ;;  %7907 = vst [vmem:[#allocation96_spill] sm:$0xff] %v5144_v44 }
 0x143   :  { %7897 = vst [vmem:[#allocation86_spill] sm:$0xff] %v5120_v51  ;;  %1001 = vmatprep.mubr.bf16.mxu1 %v806_v54 }
 0x144   :  { %v5124_v57 = vpop.f32.mrf.mxu0  ;;  %1002 = vmatmul.mubr.bf16.gmra.mxu1 %v805_v43 }
 0x145   :  { %7899 = vst [vmem:[#allocation88_spill] sm:$0xff] %v5124_v57 }
 0x146   :  { %v5126_v63 = vpop.f32.mrf.mxu0 }
 0x147   :  { %7900 = vst [vmem:[#allocation89_spill] sm:$0xff] %v5126_v63  ;;  %v807_v27 = vpack.c.bf16 %v5126_v63, %v5120_v51  ;;  %v5154_v51 = vpop.f32.mrf.mxu1 }
 0x148   :  { %v5130_v46 = vpop.f32.mrf.mxu0  ;;  %7910 = vst [vmem:[#allocation99_spill] sm:$0xff] %v5154_v51 }
 0x149   :  { %7902 = vst [vmem:[#allocation91_spill] sm:$0xff] %v5130_v46  ;;  %v808_v49 = vpack.c.bf16 %v5130_v46, %v5124_v57  ;;  %v5160_v39 = vpop.f32.mrf.mxu1 }
 0x14a   :  { %v5136_v11 = vpop.f32.mrf.mxu0  ;;  %7913 = vst [vmem:[#allocation102_spill] sm:$0xff] %v5160_v39 }
 0x14b   :  { %7903 = vst [vmem:[#allocation92_spill] sm:$0xff] %v5136_v11  ;;  %1009 = vmatprep.mubr.bf16.mxu1 %v808_v49 }
 0x14c   :  { %v5140_v54 = vpop.f32.mrf.mxu0  ;;  %1010 = vmatmul.mubr.bf16.gmra.mxu1 %v807_v27 }
 0x14d   :  { %7905 = vst [vmem:[#allocation94_spill] sm:$0xff] %v5140_v54 }
 0x14e   :  { %v5142_v43 = vpop.f32.mrf.mxu0 }
 0x14f   :  { %7906 = vst [vmem:[#allocation95_spill] sm:$0xff] %v5142_v43  ;;  %v809_v63 = vpack.c.bf16 %v5142_v43, %v5136_v11  ;;  %v5170_v11 = vpop.f32.mrf.mxu1 }
 0x150   :  { %v5146_v41 = vpop.f32.mrf.mxu0  ;;  %7916 = vst [vmem:[#allocation105_spill] sm:$0xff] %v5170_v11 }
 0x151   :  { %7908 = vst [vmem:[#allocation97_spill] sm:$0xff] %v5146_v41  ;;  %v810_v46 = vpack.c.bf16 %v5146_v41, %v5140_v54  ;;  %v5176_v36 = vpop.f32.mrf.mxu1 }
 0x152   :  { %v5152_v57 = vpop.f32.mrf.mxu0  ;;  %7919 = vst [vmem:[#allocation108_spill] sm:$0xff] %v5176_v36 }
 0x153   :  { %7909 = vst [vmem:[#allocation98_spill] sm:$0xff] %v5152_v57  ;;  %1017 = vmatprep.mubr.bf16.mxu1 %v810_v46 }
 0x154   :  { %v5156_v49 = vpop.f32.mrf.mxu0  ;;  %1018 = vmatmul.mubr.bf16.gmra.mxu1 %v809_v63 }
 0x155   :  { %7911 = vst [vmem:[#allocation100_spill] sm:$0xff] %v5156_v49 }
 0x156   :  { %v5158_v27 = vpop.f32.mrf.mxu0 }
 0x157   :  { %7912 = vst [vmem:[#allocation101_spill] sm:$0xff] %v5158_v27  ;;  %v811_v43 = vpack.c.bf16 %v5158_v27, %v5152_v57  ;;  %v5186_v57 = vpop.f32.mrf.mxu1 }
 0x158   :  { %v5162_v38 = vpop.f32.mrf.mxu0  ;;  %7922 = vst [vmem:[#allocation111_spill] sm:$0xff] %v5186_v57 }
 0x159   :  { %7914 = vst [vmem:[#allocation103_spill] sm:$0xff] %v5162_v38  ;;  %v812_v41 = vpack.c.bf16 %v5162_v38, %v5156_v49  ;;  %v5192_v31 = vpop.f32.mrf.mxu1 }
 0x15a   :  { %v5168_v54 = vpop.f32.mrf.mxu0  ;;  %7925 = vst [vmem:[#allocation114_spill] sm:$0xff] %v5192_v31 }
 0x15b   :  { %7915 = vst [vmem:[#allocation104_spill] sm:$0xff] %v5168_v54  ;;  %1025 = vmatprep.mubr.bf16.mxu1 %v812_v41 }
 0x15c   :  { %v5172_v46 = vpop.f32.mrf.mxu0  ;;  %1026 = vmatmul.mubr.bf16.gmra.mxu1 %v811_v43 }
 0x15d   :  { %7917 = vst [vmem:[#allocation106_spill] sm:$0xff] %v5172_v46 }
 0x15e   :  { %v5174_v63 = vpop.f32.mrf.mxu0 }
 0x15f   :  { %7918 = vst [vmem:[#allocation107_spill] sm:$0xff] %v5174_v63  ;;  %v813_v27 = vpack.c.bf16 %v5174_v63, %v5168_v54  ;;  %v5202_v54 = vpop.f32.mrf.mxu1 }
 0x160   :  { %v5178_v33 = vpop.f32.mrf.mxu0  ;;  %7928 = vst [vmem:[#allocation117_spill] sm:$0xff] %v5202_v54 }
 0x161   :  { %7920 = vst [vmem:[#allocation109_spill] sm:$0xff] %v5178_v33  ;;  %v814_v38 = vpack.c.bf16 %v5178_v33, %v5172_v46  ;;  %v5208_v28 = vpop.f32.mrf.mxu1 }
 0x162   :  { %v5184_v49 = vpop.f32.mrf.mxu0  ;;  %7931 = vst [vmem:[#allocation120_spill] sm:$0xff] %v5208_v28 }
 0x163   :  { %7921 = vst [vmem:[#allocation110_spill] sm:$0xff] %v5184_v49  ;;  %1033 = vmatprep.mubr.bf16.mxu1 %v814_v38 }
 0x164   :  { %v5188_v41 = vpop.f32.mrf.mxu0  ;;  %1034 = vmatmul.mubr.bf16.gmra.mxu1 %v813_v27 }
 0x165   :  { %7923 = vst [vmem:[#allocation112_spill] sm:$0xff] %v5188_v41 }
 0x166   :  { %v5190_v43 = vpop.f32.mrf.mxu0 }
 0x167   :  { %7924 = vst [vmem:[#allocation113_spill] sm:$0xff] %v5190_v43  ;;  %v815_v63 = vpack.c.bf16 %v5190_v43, %v5184_v49  ;;  %v5216_v43 = vpop.f32.mrf.mxu1 }
 0x168   :  { %v5194_v30 = vpop.f32.mrf.mxu0  ;;  %7933 = vst [vmem:[#allocation122_spill] sm:$0xff] %v5216_v43 }
 0x169   :  { %7926 = vst [vmem:[#allocation115_spill] sm:$0xff] %v5194_v30  ;;  %v816_v33 = vpack.c.bf16 %v5194_v30, %v5188_v41  ;;  %v819_v41 = vpack.c.bf16 %v4952_v24, %v4936_v16  ;;  %v823_v24 = vpack.c.bf16 %v5016_v56, %v5000_v48  ;;  %v5255_v56 = vld [vmem:[%s7587_s3] ss:$0 sm:$0xff]  ;;  %v1409_v16 = vlaneseq }
 0x16a   :  { %v5200_v46 = vpop.f32.mrf.mxu0 }
 0x16b   :  { %7927 = vst [vmem:[#allocation116_spill] sm:$0xff] %v5200_v46  ;;  %1041 = vmatprep.mubr.bf16.mxu1 %v816_v33  ;;  %v820_v33 = vpack.c.bf16 %v4962_v29, %v4946_v21  ;;  %v821_v29 = vpack.c.bf16 %v4984_v40, %v4968_v32  ;;  %v825_v40 = vpack.c.bf16 %v5048_v50, %v5032_v18 }
 0x16c   :  { %v5204_v38 = vpop.f32.mrf.mxu0  ;;  %1042 = vmatmul.mubr.bf16.gmra.mxu1 %v815_v63  ;;  %v5220_v63 = vpop.f32.mrf.mxu1 }
 0x16d   :  { %7929 = vst [vmem:[#allocation118_spill] sm:$0xff] %v5204_v38  ;;  %7934 = vst [vmem:[#allocation123_spill] sm:$0xff] %v5220_v63 }
 0x16e   :  { %v5206_v27 = vpop.f32.mrf.mxu0  ;;  %v5224_v49 = vpop.f32.mrf.mxu1 }
 0x16f   :  { %7930 = vst [vmem:[#allocation119_spill] sm:$0xff] %v5206_v27  ;;  %v817_v25 = vpack.c.bf16 %v5206_v27, %v5200_v46  ;;  %7935 = vst [vmem:[#allocation124_spill] sm:$0xff] %v5224_v49  ;;  %v822_v27 = vpack.c.bf16 %v4994_v45, %v4978_v37 }
 0x170   :  { %v5212_v23 = vpop.f32.mrf.mxu0 }
 0x171   :  { %7932 = vst [vmem:[#allocation121_spill] sm:$0xff] %v5212_v23  ;;  %v818_v30 = vpack.c.bf16 %v5212_v23, %v5204_v38  ;;  %v5228_v23 = vpop.f32.mrf.mxu1 }
 0x172   :  { %7936 = vst [vmem:[#allocation125_spill] sm:$0xff] %v5228_v23 }
 0x173   :  { %1049 = vmatprep.mubr.bf16.mxu1 %v818_v30  ;;  %v5232_v30 = vpop.f32.mrf.mxu1 }
 0x174   :  { %1050 = vmatmul.mubr.bf16.gmra.mxu1 %v817_v25  ;;  %7937 = vst [vmem:[#allocation126_spill] sm:$0xff] %v5232_v30  ;;  %v824_v25 = vpack.c.bf16 %v5026_v6, %v5010_v53 }
 0x175   :  { %1057 = vmatprep.mubr.bf16.mxu1 %v820_v33  ;;  %v5236_v33 = vpop.f32.mrf.mxu1 }
 0x176   :  { %7938 = vst [vmem:[#allocation127_spill] sm:$0xff] %v5236_v33 }
 0x177   :  { %v5240_v45 = vpop.f32.mrf.mxu1 }
 0x178   :  { %7939 = vst [vmem:[#allocation128_spill] sm:$0xff] %v5240_v45 }
 0x17c   :  { %1058 = vmatmul.mubr.bf16.gmra.mxu1 %v819_v41  ;;  %v826_v41 = vpack.c.bf16 %v5058_v19, %v5042_v35 }
 0x17d   :  { %1065 = vmatprep.mubr.bf16.mxu1 %v822_v27  ;;  %v5244_v27 = vpop.f32.mrf.mxu1 }
 0x17e   :  { %7940 = vst [vmem:[#allocation129_spill] sm:$0xff] %v5244_v27 }
 0x17f   :  { %v5248_v6 = vpop.f32.mrf.mxu1 }
 0x180   :  { %7941 = vst [vmem:[#allocation130_spill] sm:$0xff] %v5248_v6 }
 0x184   :  { %1066 = vmatmul.mubr.bf16.gmra.mxu1 %v821_v29  ;;  %v828_v29 = vpack.c.bf16 %v5090_v3, %v5074_v34  ;;  %v827_v3 = vpack.c.bf16 %v5080_v5, %v5064_v12 }
 0x185   :  { %1073 = vmatprep.mubr.bf16.mxu1 %v824_v25 }
 0x18c   :  { %1074 = vmatmul.mubr.bf16.gmra.mxu1 %v823_v24 }
 0x18d   :  { %1081 = vmatprep.mubr.bf16.mxu1 %v826_v41 }
 0x194   :  { %v891_v25 = vpop.f32.mrf.mxu1  ;;  %1082 = vmatmul.mubr.bf16.gmra.mxu1 %v825_v40  ;;  %v830_v40 = vpack.c.bf16 %v5122_v26, %v5106_v42 }
 0x195   :  { %v1147_v19 = vmul.f32 2.0, %v891_v25  ;;  %1089 = vmatprep.mubr.bf16.mxu1 %v828_v29 }
 0x196   :  { %v893_v24 = vpop.f32.mrf.mxu1 }
 0x197   :  { %v5258_v41 = vsub.f32 %v5255_v56, %v1147_v19 }
 0x198   :  { %v894_v35 = vpop.f32.mrf.mxu1 }
 0x199   :  { %v1148_v50 = vmul.f32 2.0, %v894_v35  ;;  %1281 = vmin.xlane.f32.xlu0 %v5258_v41 }
 0x19a   :  { %v896_v34 = vpop.f32.mrf.mxu1 }
 0x19b   :  { %v5266_v18 = vsub.f32 %v5255_v56, %v1148_v50  ;;  %v829_v34 = vpack.c.bf16 %v5112_v52, %v5096_v55  ;;  %v832_v50 = vpack.c.bf16 %v5154_v51, %v5138_v62 }
 0x19c   :  { %v899_v25 = vpop.f32.mrf.mxu1  ;;  %1090 = vmatmul.mubr.bf16.gmra.mxu1 %v827_v3 }
 0x19d   :  { %v1149_v29 = vmul.f32 2.0, %v899_v25  ;;  %1283 = vmin.xlane.f32.xlu0 %v5266_v18  ;;  %1097 = vmatprep.mubr.bf16.mxu1 %v830_v40 }
 0x19e   :  { %v901_v19 = vpop.f32.mrf.mxu1 }
 0x19f   :  { %v5270_v35 = vsub.f32 %v5255_v56, %v1149_v29 }
 0x1a0   :  { %v902_v24 = vpop.f32.mrf.mxu1 }
 0x1a1   :  { %v1150_v53 = vmul.f32 2.0, %v902_v24  ;;  %1285 = vmin.xlane.f32.xlu1 %v5270_v35 }
 0x1a2   :  { %v904_v26 = vpop.f32.mrf.mxu1 }
 0x1a3   :  { %v5278_v3 = vsub.f32 %v5255_v56, %v1150_v53  ;;  %v831_v26 = vpack.c.bf16 %v5144_v44, %v5128_v47  ;;  %v834_v53 = vpack.c.bf16 %v5186_v57, %v5170_v11 }
 0x1a4   :  { %v907_v25 = vpop.f32.mrf.mxu1  ;;  %1098 = vmatmul.mubr.bf16.gmra.mxu1 %v829_v34 }
 0x1a5   :  { %v1151_v40 = vmul.f32 2.0, %v907_v25  ;;  %1287 = vmin.xlane.f32.xlu1 %v5278_v3  ;;  %1105 = vmatprep.mubr.bf16.mxu1 %v832_v50 }
 0x1a6   :  { %v909_v29 = vpop.f32.mrf.mxu1 }
 0x1a7   :  { %v5282_v19 = vsub.f32 %v5255_v56, %v1151_v40 }
 0x1a8   :  { %v910_v24 = vpop.f32.mrf.mxu1 }
 0x1a9   :  { %v1152_v42 = vmul.f32 2.0, %v910_v24  ;;  %1289 = vmin.xlane.f32.xlu0 %v5282_v19 }
 0x1aa   :  { %v912_v51 = vpop.f32.mrf.mxu1 }
 0x1ab   :  { %v5290_v34 = vsub.f32 %v5255_v56, %v1152_v42  ;;  %v833_v51 = vpack.c.bf16 %v5176_v36, %v5160_v39  ;;  %v836_v42 = vpack.c.bf16 %v5216_v43, %v5202_v54 }
 0x1ac   :  { %v915_v25 = vpop.f32.mrf.mxu1  ;;  %1106 = vmatmul.mubr.bf16.gmra.mxu1 %v831_v26 }
 0x1ad   :  { %v1153_v50 = vmul.f32 2.0, %v915_v25  ;;  %1291 = vmin.xlane.f32.xlu1 %v5290_v34  ;;  %1113 = vmatprep.mubr.bf16.mxu1 %v834_v53 }
 0x1ae   :  { %v917_v40 = vpop.f32.mrf.mxu1 }
 0x1af   :  { %v5294_v29 = vsub.f32 %v5255_v56, %v1153_v50 }
 0x1b0   :  { %v918_v24 = vpop.f32.mrf.mxu1 }
 0x1b1   :  { %v1154_v62 = vmul.f32 2.0, %v918_v24  ;;  %1293 = vmin.xlane.f32.xlu0 %v5294_v29 }
 0x1b2   :  { %v920_v57 = vpop.f32.mrf.mxu1 }
 0x1b3   :  { %v5302_v26 = vsub.f32 %v5255_v56, %v1154_v62  ;;  %v835_v57 = vpack.c.bf16 %v5208_v28, %v5192_v31  ;;  %v838_v62 = vpack.c.bf16 %v5232_v30, %v5224_v49 }
 0x1b4   :  { %v923_v25 = vpop.f32.mrf.mxu1  ;;  %1114 = vmatmul.mubr.bf16.gmra.mxu1 %v833_v51 }
 0x1b5   :  { %v1155_v53 = vmul.f32 2.0, %v923_v25  ;;  %1295 = vmin.xlane.f32.xlu1 %v5302_v26  ;;  %1121 = vmatprep.mubr.bf16.mxu1 %v836_v42 }
 0x1b6   :  { %v925_v50 = vpop.f32.mrf.mxu1 }
 0x1b7   :  { %v5306_v40 = vsub.f32 %v5255_v56, %v1155_v53 }
 0x1b8   :  { %v926_v24 = vpop.f32.mrf.mxu1 }
 0x1b9   :  { %v1156_v11 = vmul.f32 2.0, %v926_v24  ;;  %1297 = vmin.xlane.f32.xlu0 %v5306_v40 }
 0x1ba   :  { %v928_v43 = vpop.f32.mrf.mxu1 }
 0x1bb   :  { %v5314_v51 = vsub.f32 %v5255_v56, %v1156_v11  ;;  %v837_v43 = vpack.c.bf16 %v5228_v23, %v5220_v63  ;;  %v840_v11 = vpack.c.bf16 %v5248_v6, %v5240_v45 }
 0x1bc   :  { %v931_v25 = vpop.f32.mrf.mxu1  ;;  %1122 = vmatmul.mubr.bf16.gmra.mxu1 %v835_v57 }
 0x1bd   :  { %v1157_v42 = vmul.f32 2.0, %v931_v25  ;;  %1299 = vmin.xlane.f32.xlu1 %v5314_v51  ;;  %1129 = vmatprep.mubr.bf16.mxu1 %v838_v62 }
 0x1be   :  { %v933_v53 = vpop.f32.mrf.mxu1 }
 0x1bf   :  { %v5318_v50 = vsub.f32 %v5255_v56, %v1157_v42 }
 0x1c0   :  { %v934_v24 = vpop.f32.mrf.mxu1 }
 0x1c1   :  { %v1158_v54 = vmul.f32 2.0, %v934_v24  ;;  %1301 = vmin.xlane.f32.xlu0 %v5318_v50 }
 0x1c2   :  { %v936_v30 = vpop.f32.mrf.mxu1 }
 0x1c3   :  { %v5326_v57 = vsub.f32 %v5255_v56, %v1158_v54  ;;  %v839_v30 = vpack.c.bf16 %v5244_v27, %v5236_v33 }
 0x1c4   :  { %v939_v25 = vpop.f32.mrf.mxu1  ;;  %1130 = vmatmul.mubr.bf16.gmra.mxu1 %v837_v43 }
 0x1c5   :  { %v1159_v62 = vmul.f32 2.0, %v939_v25  ;;  %1303 = vmin.xlane.f32.xlu1 %v5326_v57  ;;  %1137 = vmatprep.mubr.bf16.mxu1 %v840_v11 }
 0x1c6   :  { %v941_v42 = vpop.f32.mrf.mxu1 }
 0x1c7   :  { %v5330_v53 = vsub.f32 %v5255_v56, %v1159_v62 }
 0x1c8   :  { %v942_v24 = vpop.f32.mrf.mxu1 }
 0x1c9   :  { %v1160_v49 = vmul.f32 2.0, %v942_v24  ;;  %1305 = vmin.xlane.f32.xlu0 %v5330_v53 }
 0x1ca   :  { %v944_v6 = vpop.f32.mrf.mxu1 }
 0x1cb   :  { %v5336_v54 = vsub.f32 %v5255_v56, %v1160_v49 }
 0x1cc   :  { %v947_v43 = vpop.f32.mrf.mxu1  ;;  %1138 = vmatmul.mubr.bf16.gmra.mxu1 %v839_v30 }
 0x1cd   :  { %v1161_v25 = vmul.f32 2.0, %v947_v43  ;;  %1307 = vmin.xlane.f32.xlu1 %v5336_v54 }
 0x1ce   :  { %v949_v11 = vpop.f32.mrf.mxu1 }
 0x1cf   :  { %v5340_v62 = vsub.f32 %v5255_v56, %v1161_v25 }
 0x1d0   :  { %v950_v42 = vpop.f32.mrf.mxu1 }
 0x1d1   :  { %v1162_v24 = vmul.f32 2.0, %v950_v42  ;;  %1309 = vmin.xlane.f32.xlu0 %v5340_v62 }
 0x1d2   :  { %v952_v45 = vpop.f32.mrf.mxu1 }
 0x1d3   :  { %v5344_v27 = vsub.f32 %v5255_v56, %v1162_v24 }
 0x1d4   :  { %v955_v6 = vpop.f32.mrf.mxu1 }
 0x1d5   :  { %v1163_v49 = vmul.f32 2.0, %v955_v6  ;;  %1311 = vmin.xlane.f32.xlu1 %v5344_v27 }
 0x1d6   :  { %v957_v30 = vpop.f32.mrf.mxu1 }
 0x1d7   :  { %v5348_v43 = vsub.f32 %v5255_v56, %v1163_v49 }
 0x1d8   :  { %v958_v11 = vpop.f32.mrf.mxu1 }
 0x1d9   :  { %v1164_v33 = vmul.f32 2.0, %v958_v11  ;;  %1313 = vmin.xlane.f32.xlu0 %v5348_v43 }
 0x1da   :  { %v960_v25 = vpop.f32.mrf.mxu1 }
 0x1db   :  { %v5352_v42 = vsub.f32 %v5255_v56, %v1164_v33 }
 0x1dc   :  { %v963_v45 = vpop.f32.mrf.mxu1 }
 0x1dd   :  { %v1165_v23 = vmul.f32 2.0, %v963_v45  ;;  %1315 = vmin.xlane.f32.xlu1 %v5352_v42 }
 0x1de   :  { %v965_v24 = vpop.f32.mrf.mxu1 }
 0x1df   :  { %v5356_v6 = vsub.f32 %v5255_v56, %v1165_v23 }
 0x1e0   :  { %v966_v30 = vpop.f32.mrf.mxu1 }
 0x1e1   :  { %v1166_v63 = vmul.f32 2.0, %v966_v30  ;;  %1317 = vmin.xlane.f32.xlu0 %v5356_v6 }
 0x1e2   :  { %v968_v49 = vpop.f32.mrf.mxu1 }
 0x1e3   :  { %v5360_v11 = vsub.f32 %v5255_v56, %v1166_v63 }
 0x1e4   :  { %v971_v25 = vpop.f32.mrf.mxu1 }
 0x1e5   :  { %v1167_v28 = vmul.f32 2.0, %v971_v25  ;;  %1319 = vmin.xlane.f32.xlu1 %v5360_v11 }
 0x1e6   :  { %v973_v33 = vpop.f32.mrf.mxu1 }
 0x1e7   :  { %v5364_v45 = vsub.f32 %v5255_v56, %v1167_v28 }
 0x1e8   :  { %v974_v24 = vpop.f32.mrf.mxu1 }
 0x1e9   :  { %v1168_v31 = vmul.f32 2.0, %v974_v24  ;;  %1321 = vmin.xlane.f32.xlu1 %v5364_v45 }
 0x1ea   :  { %v976_v23 = vpop.f32.mrf.mxu1 }
 0x1eb   :  { %v5368_v30 = vsub.f32 %v5255_v56, %v1168_v31 }
 0x1ec   :  { %v979_v49 = vpop.f32.mrf.mxu1 }
 0x1ed   :  { %v1169_v36 = vmul.f32 2.0, %v979_v49  ;;  %1323 = vmin.xlane.f32.xlu1 %v5368_v30 }
 0x1ee   :  { %v981_v63 = vpop.f32.mrf.mxu1 }
 0x1ef   :  { %v5372_v25 = vsub.f32 %v5255_v56, %v1169_v36 }
 0x1f0   :  { %v982_v33 = vpop.f32.mrf.mxu1 }
 0x1f1   :  { %v1170_v39 = vmul.f32 2.0, %v982_v33  ;;  %1325 = vmin.xlane.f32.xlu1 %v5372_v25 }
 0x1f2   :  { %v984_v28 = vpop.f32.mrf.mxu1 }
 0x1f3   :  { %v5376_v24 = vsub.f32 %v5255_v56, %v1170_v39 }
 0x1f4   :  { %v987_v23 = vpop.f32.mrf.mxu1 }
 0x1f5   :  { %v1171_v44 = vmul.f32 2.0, %v987_v23  ;;  %1327 = vmin.xlane.f32.xlu1 %v5376_v24 }
 0x1f6   :  { %v989_v31 = vpop.f32.mrf.mxu1 }
 0x1f7   :  { %v5380_v49 = vsub.f32 %v5255_v56, %v1171_v44 }
 0x1f8   :  { %v990_v63 = vpop.f32.mrf.mxu1 }
 0x1f9   :  { %v1172_v47 = vmul.f32 2.0, %v990_v63  ;;  %1329 = vmin.xlane.f32.xlu1 %v5380_v49 }
 0x1fa   :  { %v992_v36 = vpop.f32.mrf.mxu1 }
 0x1fb   :  { %v5384_v33 = vsub.f32 %v5255_v56, %v1172_v47 }
 0x1fc   :  { %v995_v28 = vpop.f32.mrf.mxu1 }
 0x1fd   :  { %v1173_v52 = vmul.f32 2.0, %v995_v28  ;;  %1331 = vmin.xlane.f32.xlu1 %v5384_v33 }
 0x1fe   :  { %v997_v39 = vpop.f32.mrf.mxu1 }
 0x1ff   :  { %v5388_v23 = vsub.f32 %v5255_v56, %v1173_v52 }
 0x200   :  { %v998_v31 = vpop.f32.mrf.mxu1 }
 0x201   :  { %v1174_v55 = vmul.f32 2.0, %v998_v31  ;;  %1333 = vmin.xlane.f32.xlu1 %v5388_v23 }
 0x202   :  { %v1000_v44 = vpop.f32.mrf.mxu1 }
 0x203   :  { %v5392_v63 = vsub.f32 %v5255_v56, %v1174_v55 }
 0x204   :  { %v1003_v36 = vpop.f32.mrf.mxu1 }
 0x205   :  { %v1175_v5 = vmul.f32 2.0, %v1003_v36  ;;  %1335 = vmin.xlane.f32.xlu1 %v5392_v63 }
 0x206   :  { %v1005_v47 = vpop.f32.mrf.mxu1 }
 0x207   :  { %v5396_v28 = vsub.f32 %v5255_v56, %v1175_v5 }
 0x208   :  { %v1006_v39 = vpop.f32.mrf.mxu1 }
 0x209   :  { %v1176_v12 = vmul.f32 2.0, %v1006_v39  ;;  %1337 = vmin.xlane.f32.xlu1 %v5396_v28 }
 0x20a   :  { %v1008_v52 = vpop.f32.mrf.mxu1 }
 0x20b   :  { %v5400_v31 = vsub.f32 %v5255_v56, %v1176_v12 }
 0x20c   :  { %v1011_v44 = vpop.f32.mrf.mxu1 }
 0x20d   :  { %v1177_v48 = vmul.f32 2.0, %v1011_v44  ;;  %1339 = vmin.xlane.f32.xlu1 %v5400_v31 }
 0x20e   :  { %v1013_v55 = vpop.f32.mrf.mxu1 }
 0x20f   :  { %v5404_v36 = vsub.f32 %v5255_v56, %v1177_v48 }
 0x210   :  { %v1014_v47 = vpop.f32.mrf.mxu1 }
 0x211   :  { %v1178_v37 = vmul.f32 2.0, %v1014_v47  ;;  %1341 = vmin.xlane.f32.xlu1 %v5404_v36 }
 0x212   :  { %v1016_v5 = vpop.f32.mrf.mxu1 }
 0x213   :  { %v5408_v39 = vsub.f32 %v5255_v56, %v1178_v37 }
 0x214   :  { %v1019_v52 = vpop.f32.mrf.mxu1 }
 0x215   :  { %v1179_v32 = vmul.f32 2.0, %v1019_v52  ;;  %1343 = vmin.xlane.f32.xlu1 %v5408_v39 }
 0x216   :  { %v1021_v12 = vpop.f32.mrf.mxu1 }
 0x217   :  { %v5412_v44 = vsub.f32 %v5255_v56, %v1179_v32  ;;  %v5422_v32 = vand.u32 127, %v1409_v16 }
 0x218   :  { %v1022_v55 = vpop.f32.mrf.mxu1 }
 0x219   :  { %v1180_v21 = vmul.f32 2.0, %v1022_v55  ;;  %1345 = vmin.xlane.f32.xlu1 %v5412_v44 }
 0x21a   :  { %v1024_v48 = vpop.f32.mrf.mxu1 }
 0x21b   :  { %v5416_v47 = vsub.f32 %v5255_v56, %v1180_v21 }
 0x21c   :  { %v1027_v5 = vpop.f32.mrf.mxu1 }
 0x21d   :  { %v1181_v37 = vmul.f32 2.0, %v1027_v5  ;;  %1347 = vmin.xlane.f32.xlu1 %v5416_v47 }
 0x21e   :  { %v1029_v52 = vpop.f32.mrf.mxu1 }
 0x21f   :  { %v5420_v38 = vsub.f32 %v5255_v56, %v1181_v37 }
 0x220   :  { %v1030_v12 = vpop.f32.mrf.mxu1 }
 0x221   :  { %v1182_v46 = vmul.f32 2.0, %v1030_v12  ;;  %1349 = vmin.xlane.f32.xlu1 %v5420_v38 }
 0x222   :  { %v1282_v55 = vpop.xlane.xlu0 %1281  ;;  %v1032_v48 = vpop.f32.mrf.mxu1 }
 0x223   :  { %vm1411_vm1 = vcmp.le.f32.partialorder %v5258_v41, %v1282_v55  ;;  %v5427_v21 = vsub.f32 %v5255_v56, %v1182_v46 }
 0x224   :  { %v5430_v5 = vsel %vm1411_vm1, %v5422_v32, 128  ;;  %v1035_v52 = vpop.f32.mrf.mxu1 }
 0x225   :  { %v1183_v22 = vmul.f32 2.0, %v1035_v52  ;;  %1351 = vmin.xlane.f32.xlu1 %v5427_v21  ;;  %v1540_v16 = vshra.s32 %v5430_v5, 16 }
 0x226   :  { %v1284_v37 = vpop.xlane.xlu0 %1283  ;;  %v1037_v12 = vpop.f32.mrf.mxu1 }
 0x227   :  { %vm1412_vm2 = vcmp.le.f32.partialorder %v5266_v18, %v1284_v37  ;;  %v5435_v20 = vcvt.s32.f32 %v1540_v16  ;;  %v5438_v41 = vsub.f32 %v5255_v56, %v1183_v22 }
 0x228   :  { %v5441_v46 = vsel %vm1412_vm2, %v5422_v32, 128  ;;  %v1038_v55 = vpop.f32.mrf.mxu1 }
 0x229   :  { %v1184_v48 = vmul.f32 2.0, %v1038_v55  ;;  %1543 = vmin.xlane.f32.xlu0 %v5435_v20  ;;  %1353 = vmin.xlane.f32.xlu1 %v5438_v41  ;;  %v1554_v52 = vshra.s32 %v5441_v46, 16 }
 0x22a   :  { %v1286_v17 = vpop.xlane.xlu1 %1285  ;;  %v1040_v12 = vpop.f32.mrf.mxu1 }
 0x22b   :  { %vm1413_vm3 = vcmp.le.f32.partialorder %v5270_v35, %v1286_v17  ;;  %v5447_v18 = vcvt.s32.f32 %v1554_v52  ;;  %v5450_v22 = vsub.f32 %v5255_v56, %v1184_v48 }
 0x22c   :  { %v5453_v16 = vsel %vm1413_vm3, %v5422_v32, 128  ;;  %v1043_v37 = vpop.f32.mrf.mxu1 }
 0x22d   :  { %7942 = vst [vmem:[#allocation131_spill] sm:$0xff] %v5450_v22  ;;  %1557 = vmin.xlane.f32.xlu0 %v5447_v18  ;;  %1355 = vmin.xlane.f32.xlu1 %v5450_v22  ;;  %v1568_v55 = vshra.s32 %v5453_v16, 16  ;;  %v1185_v12 = vmul.f32 2.0, %v1043_v37 }
 0x22e   :  { %v1288_v15 = vpop.xlane.xlu1 %1287  ;;  %v1045_v14 = vpop.f32.mrf.mxu1 }
 0x22f   :  { %vm1414_vm4 = vcmp.le.f32.partialorder %v5278_v3, %v1288_v15  ;;  %v5459_v17 = vcvt.s32.f32 %v1568_v55  ;;  %v5467_v9 = vsub.f32 %v5255_v56, %v1185_v12 }
 0x230   :  { %v5462_v35 = vsel %vm1414_vm4, %v5422_v32, 128  ;;  %v1046_v48 = vpop.f32.mrf.mxu1 }
 0x231   :  { %v1186_v52 = vmul.f32 2.0, %v1046_v48  ;;  %1571 = vmin.xlane.f32.xlu0 %v5459_v17  ;;  %7943 = vst [vmem:[#allocation132_spill] sm:$0xff] %v5467_v9  ;;  %v1582_v15 = vshra.s32 %v5462_v35, 16 }
 0x232   :  { %v1290_v13 = vpop.xlane.xlu0 %1289  ;;  %v1048_v10 = vpop.f32.mrf.mxu1 }
 0x233   :  { %vm1415_vm5 = vcmp.le.f32.partialorder %v5282_v19, %v1290_v13  ;;  %v5470_v14 = vsub.f32 %v5255_v56, %v1186_v52  ;;  %v5478_v48 = vcvt.s32.f32 %v1582_v15 }
 0x234   :  { %v5474_v3 = vsel %vm1415_vm5, %v5422_v32, 128  ;;  %v1051_v37 = vpop.f32.mrf.mxu1 }
 0x235   :  { %7944 = vst [vmem:[#allocation133_spill] sm:$0xff] %v5470_v14  ;;  %1357 = vmin.xlane.f32.xlu0 %v5467_v9  ;;  %1359 = vmin.xlane.f32.xlu1 %v5470_v14  ;;  %v1596_v13 = vshra.s32 %v5474_v3, 16  ;;  %v1187_v7 = vmul.f32 2.0, %v1051_v37 }
 0x236   :  { %v1292_v55 = vpop.xlane.xlu1 %1291  ;;  %v1053_v10 = vpop.f32.mrf.mxu1 }
 0x237   :  { %vm1416_vm6 = vcmp.le.f32.partialorder %v5290_v34, %v1292_v55  ;;  %v5483_v4 = vcvt.s32.f32 %v1596_v13  ;;  %v5495_v55 = vsub.f32 %v5255_v56, %v1187_v7 }
 0x238   :  { %v1054_v19 = vpop.f32.mrf.mxu1  ;;  %v5489_v10 = vsel %vm1416_vm6, %v5422_v32, 128 }
 0x239   :  { %v1188_v12 = vmul.f32 2.0, %v1054_v19  ;;  %1585 = vmin.xlane.f32.xlu0 %v5478_v48  ;;  %7946 = vst [vmem:[#allocation135_spill] sm:$0xff] %v5495_v55 }
 0x23a   :  { %v1294_v52 = vpop.xlane.xlu0 %1293  ;;  %v1056_v8 = vpop.f32.mrf.mxu1 }
 0x23b   :  { %v5486_v2 = vsub.f32 %v5255_v56, %v1188_v12  ;;  %vm1417_vm7 = vcmp.le.f32.partialorder %v5294_v29, %v1294_v52  ;;  %v1610_v8 = vshra.s32 %v5489_v10, 16 }
 0x23c   :  { %v1059_v15 = vpop.f32.mrf.mxu1  ;;  %v5499_v37 = vsel %vm1417_vm7, %v5422_v32, 128 }
 0x23d   :  { %7945 = vst [vmem:[#allocation134_spill] sm:$0xff] %v5486_v2  ;;  %1599 = vmin.xlane.f32.xlu0 %v5483_v4  ;;  %1363 = vmin.xlane.f32.xlu1 %v5486_v2  ;;  %v5502_v29 = vcvt.s32.f32 %v1610_v8  ;;  %v1189_v61 = vmul.f32 2.0, %v1059_v15 }
 0x23e   :  { %v1061_v34 = vpop.f32.mrf.mxu1  ;;  %v1296_v12 = vpop.xlane.xlu1 %1295 }
 0x23f   :  { %v1624_v34 = vshra.s32 %v5499_v37, 16  ;;  %vm1418_vm8 = vcmp.le.f32.partialorder %v5302_v26, %v1296_v12  ;;  %v5519_v26 = vsub.f32 %v5255_v56, %v1189_v61 }
 0x240   :  { %v1062_v13 = vpop.f32.mrf.mxu1 }
 0x241   :  { %v1190_v19 = vmul.f32 2.0, %v1062_v13  ;;  %1361 = vmin.xlane.f32.xlu0 %v5495_v55  ;;  %v5511_v60 = vcvt.s32.f32 %v1624_v34  ;;  %7948 = vst [vmem:[#allocation137_spill] sm:$0xff] %v5519_v26 }
 0x242   :  { %v1064_v1 = vpop.f32.mrf.mxu1  ;;  %v1298_v0 = vpop.xlane.xlu0 %1297 }
 0x243   :  { %v5505_v52 = vsub.f32 %v5255_v56, %v1190_v19  ;;  %v5514_v1 = vsel %vm1418_vm8, %v5422_v32, 128  ;;  %vm1419_vm9 = vcmp.le.f32.partialorder %v5306_v40, %v1298_v0 }
 0x244   :  { %v1067_v7 = vpop.f32.mrf.mxu1  ;;  %v1638_v15 = vshra.s32 %v5514_v1, 16  ;;  %v5526_v34 = vsel %vm1419_vm9, %v5422_v32, 128 }
 0x245   :  { %7947 = vst [vmem:[#allocation136_spill] sm:$0xff] %v5505_v52  ;;  %1613 = vmin.xlane.f32.xlu0 %v5502_v29  ;;  %1367 = vmin.xlane.f32.xlu1 %v5505_v52  ;;  %v1191_v2 = vmul.f32 2.0, %v1067_v7 }
 0x246   :  { %v1069_v13 = vpop.f32.mrf.mxu1  ;;  %v1300_v0 = vpop.xlane.xlu1 %1299 }
 0x247   :  { %vm1420_vm10 = vcmp.le.f32.partialorder %v5314_v51, %v1300_v0  ;;  %v5547_v0 = vsub.f32 %v5255_v56, %v1191_v2 }
 0x248   :  { %v1070_v8 = vpop.f32.mrf.mxu1 }
 0x249   :  { %v1192_v19 = vmul.f32 2.0, %v1070_v8  ;;  %1627 = vmin.xlane.f32.xlu0 %v5511_v60  ;;  %v5530_v8 = vcvt.s32.f32 %v1638_v15  ;;  %7952 = vst [vmem:[#allocation141_spill] sm:$0xff] %v5547_v0 }
 0x24a   :  { %v1072_v59 = vpop.f32.mrf.mxu1  ;;  %v1302_v58 = vpop.xlane.xlu0 %1301 }
 0x24b   :  { %v5522_v12 = vsub.f32 %v5255_v56, %v1192_v19  ;;  %v1652_v59 = vshra.s32 %v5526_v34, 16  ;;  %vm1421_vm11 = vcmp.le.f32.partialorder %v5318_v50, %v1302_v58 }
 0x24c   :  { %v1075_v13 = vpop.f32.mrf.mxu1  ;;  %v5551_v7 = vsel %vm1421_vm11, %v5422_v32, 128 }
 0x24d   :  { %7949 = vst [vmem:[#allocation138_spill] sm:$0xff] %v5522_v12  ;;  %1365 = vmin.xlane.f32.xlu0 %v5519_v26  ;;  %1371 = vmin.xlane.f32.xlu1 %v5522_v12  ;;  %v5535_v55 = vcvt.s32.f32 %v1652_v59  ;;  %7953 = vst [vmem:[#allocation142_spill] sm:$0xff] %v5551_v7  ;;  %v1193_v14 = vmul.f32 2.0, %v1075_v13 }
 0x24e   :  { %v1077_v40 = vpop.f32.mrf.mxu1 }
 0x24f   :  { %v5541_v40 = vsel %vm1420_vm10, %v5422_v32, 128  ;;  %v5573_v9 = vsub.f32 %v5255_v56, %v1193_v14 }
 0x250   :  { %v1078_v61 = vpop.f32.mrf.mxu1  ;;  %7951 = vst [vmem:[#allocation140_spill] sm:$0xff] %v5541_v40 }
 0x251   :  { %v1194_v19 = vmul.f32 2.0, %v1078_v61  ;;  %1641 = vmin.xlane.f32.xlu0 %v5530_v8  ;;  %7958 = vst [vmem:[#allocation147_spill] sm:$0xff] %v5573_v9 }
 0x252   :  { %v1080_v52 = vpop.f32.mrf.mxu1 }
 0x253   :  { %v5538_v26 = vsub.f32 %v5255_v56, %v1194_v19  ;;  %v1666_v52 = vshra.s32 %v5541_v40, 16  ;;  %v1304_v19 = vpop.xlane.xlu1 %1303 }
 0x254   :  { %v1083_v15 = vpop.f32.mrf.mxu1  ;;  %vm1422_vm12 = vcmp.le.f32.partialorder %v5326_v57, %v1304_v19 }
 0x255   :  { %7950 = vst [vmem:[#allocation139_spill] sm:$0xff] %v5538_v26  ;;  %1655 = vmin.xlane.f32.xlu0 %v5535_v55  ;;  %1375 = vmin.xlane.f32.xlu1 %v5538_v26  ;;  %v5554_v58 = vcvt.s32.f32 %v1666_v52  ;;  %v1306_v26 = vpop.xlane.xlu0 %1305 }
 0x256   :  { %v1085_v51 = vpop.f32.mrf.mxu1  ;;  %vm1423_vm13 = vcmp.le.f32.partialorder %v5330_v53, %v1306_v26 }
 0x257   :  { %7954 = vst [vmem:[#allocation143_spill] sm:$0xff] %v5554_v58  ;;  %v1680_v51 = vshra.s32 %v5551_v7, 16  ;;  %v5577_v13 = vsel %vm1423_vm13, %v5422_v32, 128  ;;  %v1195_v7 = vmul.f32 2.0, %v1083_v15 }
 0x258   :  { %v1086_v59 = vpop.f32.mrf.mxu1 }
 0x259   :  { %v1196_v61 = vmul.f32 2.0, %v1086_v59  ;;  %1369 = vmin.xlane.f32.xlu0 %v5547_v0  ;;  %v5563_v0 = vcvt.s32.f32 %v1680_v51 }
 0x25a   :  { %v1088_v12 = vpop.f32.mrf.mxu1  ;;  %v1310_v57 = vpop.xlane.xlu0 %1309 }
 0x25b   :  { %v5557_v50 = vsub.f32 %v5255_v56, %v1196_v61  ;;  %7956 = vst [vmem:[#allocation145_spill] sm:$0xff] %v5563_v0  ;;  %v5566_v12 = vsel %vm1422_vm12, %v5422_v32, 128  ;;  %v1308_v61 = vpop.xlane.xlu1 %1307  ;;  %vm1425_vm0 = vcmp.le.f32.partialorder %v5340_v62, %v1310_v57 }
 0x25c   :  { %v1091_v2 = vpop.f32.mrf.mxu1  ;;  %7957 = vst [vmem:[#allocation146_spill] sm:$0xff] %v5566_v12  ;;  %vm1424_vm14 = vcmp.le.f32.partialorder %v5336_v54, %v1308_v61  ;;  %v5610_v61 = vsel %vm1425_vm0, %v5422_v32, 128 }
 0x25d   :  { %7955 = vst [vmem:[#allocation144_spill] sm:$0xff] %v5557_v50  ;;  %1669 = vmin.xlane.f32.xlu0 %v5554_v58  ;;  %1379 = vmin.xlane.f32.xlu1 %v5557_v50 }
 0x25e   :  { %v1093_v59 = vpop.f32.mrf.mxu1 }
 0x25f   :  { %v1694_v59 = vshra.s32 %v5566_v12, 16  ;;  %v1312_v50 = vpop.xlane.xlu1 %1311 }
 0x260   :  { %v5568_v52 = vpop.f32.mrf.mxu1  ;;  %vm1426_vm2 = vcmp.le.f32.partialorder %v5344_v27, %v1312_v50 }
 0x261   :  { %1683 = vmin.xlane.f32.xlu0 %v5563_v0  ;;  %v5582_v26 = vcvt.s32.f32 %v1694_v59  ;;  %v1708_v0 = vshra.s32 %v5577_v13, 16 }
 0x262   :  { %v1096_v19 = vpop.f32.mrf.mxu1  ;;  %v1314_v22 = vpop.xlane.xlu0 %1313 }
 0x263   :  { %7959 = vst [vmem:[#allocation148_spill] sm:$0xff] %v5582_v26  ;;  %v5590_v40 = vcvt.s32.f32 %v1708_v0  ;;  %vm1427_vm3 = vcmp.le.f32.partialorder %v5348_v43, %v1314_v22 }
 0x264   :  { %v5579_v51 = vpop.f32.mrf.mxu1 }
 0x265   :  { %1373 = vmin.xlane.f32.xlu0 %v5573_v9  ;;  %7960 = vst [vmem:[#allocation149_spill] sm:$0xff] %v5590_v40 }
 0x266   :  { %v1101_v53 = vpop.f32.mrf.mxu1  ;;  %v1316_v14 = vpop.xlane.xlu1 %1315 }
 0x267   :  { %v5593_v53 = vsel %vm1424_vm14, %v5422_v32, 128  ;;  %vm1428_vm5 = vcmp.le.f32.partialorder %v5352_v42, %v1316_v14 }
 0x268   :  { %v5585_v19 = vpop.f32.mrf.mxu1  ;;  %7961 = vst [vmem:[#allocation150_spill] sm:$0xff] %v5593_v53 }
 0x269   :  { %1697 = vmin.xlane.f32.xlu0 %v5582_v26 }
 0x26a   :  { %v1318_v12 = vpop.xlane.xlu0 %1317  ;;  %v1104_v58 = vpop.f32.mrf.mxu1 }
 0x26b   :  { %vm1429_vm15 = vcmp.le.f32.partialorder %v5356_v6, %v1318_v12  ;;  %v5604_v6 = vsub.f32 %v5255_v56, %v1195_v7  ;;  %v1722_v12 = vshra.s32 %v5593_v53, 16  ;;  %v1736_v7 = vshra.s32 %v5610_v61, 16 }
 0x26c   :  { %v5596_v59 = vsel %vm1429_vm15, %v5422_v32, 128  ;;  %v5598_v9 = vpop.f32.mrf.mxu1 }
 0x26d   :  { %7962 = vst [vmem:[#allocation151_spill] sm:$0xff] %v5596_v59  ;;  %1711 = vmin.xlane.f32.xlu0 %v5590_v40  ;;  %v1792_v54 = vshra.s32 %v5596_v59, 16  ;;  %7963 = vst [vmem:[#allocation152_spill] sm:$0xff] %v5604_v6  ;;  %v5628_v40 = vcvt.s32.f32 %v1736_v7 }
 0x26e   :  { %v1320_v58 = vpop.xlane.xlu1 %1319  ;;  %v1109_v15 = vpop.f32.mrf.mxu1 }
 0x26f   :  { %v5606_v0 = vcvt.s32.f32 %v1792_v54  ;;  %v5617_v15 = vcvt.s32.f32 %v1722_v12  ;;  %v5633_v12 = vsel %vm1426_vm2, %v5422_v32, 128  ;;  %vm1430_vm6 = vcmp.le.f32.partialorder %v5360_v11, %v1320_v58 }
 0x270   :  { %v5612_v26 = vpop.f32.mrf.mxu1  ;;  %7967 = vst [vmem:[#allocation156_spill] sm:$0xff] %v5633_v12 }
 0x271   :  { %7964 = vst [vmem:[#allocation153_spill] sm:$0xff] %v5606_v0  ;;  %1377 = vmin.xlane.f32.xlu0 %v5604_v6  ;;  %1795 = vmin.xlane.f32.xlu1 %v5606_v0 }
 0x272   :  { %v1322_v62 = vpop.xlane.xlu1 %1321  ;;  %v1112_v57 = vpop.f32.mrf.mxu1 }
 0x273   :  { %vm1431_vm1 = vcmp.le.f32.partialorder %v5364_v45, %v1322_v62  ;;  %v1197_v57 = vmul.f32 2.0, %v1091_v2 }
 0x274   :  { %v5621_v54 = vsel %vm1431_vm1, %v5422_v32, 128  ;;  %v5623_v59 = vpop.f32.mrf.mxu1 }
 0x275   :  { %7965 = vst [vmem:[#allocation154_spill] sm:$0xff] %v5621_v54  ;;  %1725 = vmin.xlane.f32.xlu0 %v5617_v15  ;;  %v1820_v6 = vshra.s32 %v5621_v54, 16  ;;  %v5642_v2 = vsub.f32 %v5255_v56, %v1197_v57  ;;  %v5662_v54 = vsel %vm1428_vm5, %v5422_v32, 128 }
 0x276   :  { %v1324_v0 = vpop.xlane.xlu1 %1323  ;;  %v1117_v53 = vpop.f32.mrf.mxu1  ;;  %7971 = vst [vmem:[#allocation160_spill] sm:$0xff] %v5662_v54 }
 0x277   :  { %v5630_v45 = vcvt.s32.f32 %v1820_v6  ;;  %7968 = vst [vmem:[#allocation157_spill] sm:$0xff] %v5642_v2  ;;  %v1750_v53 = vshra.s32 %v5633_v12, 16  ;;  %v5646_v6 = vsel %vm1427_vm3, %v5422_v32, 128  ;;  %vm1432_vm8 = vcmp.le.f32.partialorder %v5368_v30, %v1324_v0 }
 0x278   :  { %v5635_v62 = vpop.f32.mrf.mxu1 }
 0x279   :  { %7966 = vst [vmem:[#allocation155_spill] sm:$0xff] %v5630_v45  ;;  %1739 = vmin.xlane.f32.xlu0 %v5628_v40  ;;  %1823 = vmin.xlane.f32.xlu1 %v5630_v45  ;;  %v1764_v45 = vshra.s32 %v5646_v6, 16 }
 0x27a   :  { %v1326_v27 = vpop.xlane.xlu1 %1325  ;;  %v1120_v50 = vpop.f32.mrf.mxu1 }
 0x27b   :  { %vm1433_vm4 = vcmp.le.f32.partialorder %v5372_v25, %v1326_v27  ;;  %v5658_v50 = vcvt.s32.f32 %v1750_v53  ;;  %v1778_v53 = vshra.s32 %v5662_v54, 16 }
 0x27c   :  { %v5649_v7 = vsel %vm1433_vm4, %v5422_v32, 128  ;;  %v5651_v43 = vpop.f32.mrf.mxu1 }
 0x27d   :  { %7969 = vst [vmem:[#allocation158_spill] sm:$0xff] %v5649_v7  ;;  %1381 = vmin.xlane.f32.xlu0 %v5642_v2  ;;  %v1848_v22 = vshra.s32 %v5649_v7, 16 }
 0x27e   :  { %v1328_v25 = vpop.xlane.xlu1 %1327  ;;  %v1125_v27 = vpop.f32.mrf.mxu1 }
 0x27f   :  { %v5656_v57 = vcvt.s32.f32 %v1848_v22  ;;  %v5670_v22 = vcvt.s32.f32 %v1764_v45  ;;  %v5674_v27 = vsel %vm1430_vm6, %v5422_v32, 128  ;;  %vm1434_vm9 = vcmp.le.f32.partialorder %v5376_v24, %v1328_v25 }
 0x280   :  { %v5664_v12 = vpop.f32.mrf.mxu1 }
 0x281   :  { %7970 = vst [vmem:[#allocation159_spill] sm:$0xff] %v5656_v57  ;;  %1851 = vmin.xlane.f32.xlu1 %v5656_v57  ;;  %1753 = vmin.xlane.f32.xlu0 %v5658_v50  ;;  %v5690_v57 = vsel %vm1432_vm8, %v5422_v32, 128 }
 0x282   :  { %v1330_v42 = vpop.xlane.xlu1 %1329  ;;  %v1128_v14 = vpop.f32.mrf.mxu1  ;;  %7974 = vst [vmem:[#allocation163_spill] sm:$0xff] %v5690_v57 }
 0x283   :  { %vm1435_vm7 = vcmp.le.f32.partialorder %v5380_v49, %v1330_v42  ;;  %v5686_v42 = vcvt.s32.f32 %v1778_v53  ;;  %v1806_v14 = vshra.s32 %v5674_v27, 16  ;;  %v1834_v53 = vshra.s32 %v5690_v57, 16 }
 0x284   :  { %v5677_v2 = vsel %vm1435_vm7, %v5422_v32, 128  ;;  %v5679_v7 = vpop.f32.mrf.mxu1 }
 0x285   :  { %7972 = vst [vmem:[#allocation161_spill] sm:$0xff] %v5677_v2  ;;  %1767 = vmin.xlane.f32.xlu0 %v5670_v22  ;;  %v1876_v11 = vshra.s32 %v5677_v2, 16 }
 0x286   :  { %v1332_v58 = vpop.xlane.xlu1 %1331  ;;  %v1133_v49 = vpop.f32.mrf.mxu1 }
 0x287   :  { %v5684_v45 = vcvt.s32.f32 %v1876_v11  ;;  %v5698_v11 = vcvt.s32.f32 %v1806_v14  ;;  %v5702_v49 = vsel %vm1434_vm9, %v5422_v32, 128  ;;  %vm1436_vm11 = vcmp.le.f32.partialorder %v5384_v33, %v1332_v58 }
 0x288   :  { %v5692_v54 = vpop.f32.mrf.mxu1 }
 0x289   :  { %7973 = vst [vmem:[#allocation162_spill] sm:$0xff] %v5684_v45  ;;  %7975 = vst [vmem:[#allocation164_spill] sm:$0xff] %v5692_v54  ;;  %1879 = vmin.xlane.f32.xlu1 %v5684_v45  ;;  %1781 = vmin.xlane.f32.xlu0 %v5686_v42  ;;  %v5718_v45 = vsel %vm1436_vm11, %v5422_v32, 128 }
 0x28a   :  { %v1334_v30 = vpop.xlane.xlu1 %1333  ;;  %v1136_v0 = vpop.f32.mrf.mxu1 }
 0x28b   :  { %vm1437_vm10 = vcmp.le.f32.partialorder %v5388_v23, %v1334_v30  ;;  %v5714_v30 = vcvt.s32.f32 %v1834_v53  ;;  %v1862_v0 = vshra.s32 %v5702_v49, 16  ;;  %v1890_v53 = vshra.s32 %v5718_v45, 16 }
 0x28c   :  { %v5705_v2 = vsel %vm1437_vm10, %v5422_v32, 128  ;;  %v5707_v54 = vpop.f32.mrf.mxu1 }
 0x28d   :  { %7976 = vst [vmem:[#allocation165_spill] sm:$0xff] %v5705_v2  ;;  %1809 = vmin.xlane.f32.xlu0 %v5698_v11  ;;  %v1904_v24 = vshra.s32 %v5705_v2, 16 }
 0x28e   :  { %v1336_v25 = vpop.xlane.xlu1 %1335  ;;  %v1141_v23 = vpop.f32.mrf.mxu1 }
 0x28f   :  { %v5712_v14 = vcvt.s32.f32 %v1904_v24  ;;  %vm1438_vm12 = vcmp.le.f32.partialorder %v5392_v63, %v1336_v25  ;;  %v5726_v24 = vcvt.s32.f32 %v1862_v0 }
 0x290   :  { %v5720_v57 = vpop.f32.mrf.mxu1  ;;  %v5730_v23 = vsel %vm1438_vm12, %v5422_v32, 128 }
 0x291   :  { %7977 = vst [vmem:[#allocation166_spill] sm:$0xff] %v5712_v14  ;;  %1907 = vmin.xlane.f32.xlu1 %v5712_v14  ;;  %1837 = vmin.xlane.f32.xlu0 %v5714_v30  ;;  %7978 = vst [vmem:[#allocation167_spill] sm:$0xff] %v5730_v23  ;;  %v1918_v0 = vshra.s32 %v5730_v23, 16 }
 0x292   :  { %v1338_v33 = vpop.xlane.xlu1 %1337  ;;  %v1144_v58 = vpop.f32.mrf.mxu1 }
 0x293   :  { %vm1439_vm13 = vcmp.le.f32.partialorder %v5396_v28, %v1338_v33  ;;  %v5740_v28 = vcvt.s32.f32 %v1890_v53 }
 0x294   :  { %v5733_v2 = vsel %vm1439_vm13, %v5422_v32, 128 }
 0x295   :  { %7979 = vst [vmem:[#allocation168_spill] sm:$0xff] %v5733_v2  ;;  %1865 = vmin.xlane.f32.xlu0 %v5726_v24  ;;  %v1932_v63 = vshra.s32 %v5733_v2, 16  ;;  %v5749_v2 = vcvt.s32.f32 %v1918_v0 }
 0x296   :  { %v1340_v25 = vpop.xlane.xlu1 %1339 }
 0x297   :  { %vm1440_vm14 = vcmp.le.f32.partialorder %v5400_v31, %v1340_v25  ;;  %v5738_v58 = vcvt.s32.f32 %v1932_v63  ;;  %v1198_v25 = vmul.f32 2.0, %v5568_v52 }
 0x298   :  { %v5744_v33 = vsel %vm1440_vm14, %v5422_v32, 128 }
 0x299   :  { %7980 = vst [vmem:[#allocation169_spill] sm:$0xff] %v5738_v58  ;;  %1935 = vmin.xlane.f32.xlu1 %v5738_v58  ;;  %1893 = vmin.xlane.f32.xlu0 %v5740_v28  ;;  %v1946_v31 = vshra.s32 %v5744_v33, 16 }
 0x29a   :  { %v1342_v14 = vpop.xlane.xlu1 %1341 }
 0x29b   :  { %vm1441_vm15 = vcmp.le.f32.partialorder %v5404_v36, %v1342_v14  ;;  %v5760_v58 = vcvt.s32.f32 %v1946_v31  ;;  %v5765_v36 = vsub.f32 %v5255_v56, %v1198_v25 }
 0x29c   :  { %v5753_v63 = vsel %vm1441_vm15, %v5422_v32, 128 }
 0x29d   :  { %7981 = vst [vmem:[#allocation170_spill] sm:$0xff] %v5753_v63  ;;  %1921 = vmin.xlane.f32.xlu0 %v5749_v2  ;;  %v1960_v53 = vshra.s32 %v5753_v63, 16  ;;  %v1539_v63 = vand.u32 65535, %v5430_v5 }
 0x29e   :  { %v1344_v14 = vpop.xlane.xlu1 %1343 }
 0x29f   :  { %v5758_v23 = vcvt.s32.f32 %v1960_v53  ;;  %vm1442_vm0 = vcmp.le.f32.partialorder %v5408_v39, %v1344_v14  ;;  %v1541_v53 = vcvt.s32.f32 %v1539_v63 }
 0x2a0   :  { %v5771_v52 = vsel %vm1442_vm0, %v5422_v32, 128 }
 0x2a1   :  { %7982 = vst [vmem:[#allocation171_spill] sm:$0xff] %v5758_v23  ;;  %1963 = vmin.xlane.f32.xlu1 %v5758_v23  ;;  %1949 = vmin.xlane.f32.xlu0 %v5760_v58  ;;  %v1553_v23 = vand.u32 65535, %v5441_v46  ;;  %v1974_v56 = vshra.s32 %v5771_v52, 16 }
 0x2a2   :  { %v1346_v0 = vpop.xlane.xlu1 %1345 }
 0x2a3   :  { %vm1443_vm1 = vcmp.le.f32.partialorder %v5412_v44, %v1346_v0  ;;  %v1555_v14 = vcvt.s32.f32 %v1553_v23  ;;  %v1567_v44 = vand.u32 65535, %v5453_v16  ;;  %v5786_v0 = vcvt.s32.f32 %v1974_v56 }
 0x2a4   :  { %v5781_v39 = vsel %vm1443_vm1, %v5422_v32, 128 }
 0x2a5   :  { %1383 = vmin.xlane.f32.xlu1 %v5765_v36  ;;  %v1988_v46 = vshra.s32 %v5781_v39, 16 }
 0x2a7   :  { %v5797_v16 = vcvt.s32.f32 %v1988_v46 }
 0x2a9   :  { %7983 = vst [vmem:[#allocation172_spill] sm:$0xff] %v5797_v16 }
 0x2b2   :  { %v5774_v31 = vpop.xlane.xlu0 %1543 }
 0x2b3   :  { %vm1545_vm2 = vcmp.eq.f32.partialorder %v5435_v20, %v5774_v31 }
 0x2b4   :  { %v1546_v25 = vsel %vm1545_vm2, %v1541_v53, inf  ;;  %v1569_v53 = vcvt.s32.f32 %v1567_v44  ;;  %v5806_v44 = vld [vmem:[%s7587_s3] ss:$0 sm:$0xff] }
 0x2b5   :  { %1547 = vmin.xlane.f32.xlu0 %v1546_v25  ;;  %v1199_v25 = vmul.f32 2.0, %v5579_v51 }
 0x2b6   :  { %v5783_v5 = vpop.xlane.xlu0 %1557 }
 0x2b7   :  { %vm1559_vm3 = vcmp.eq.f32.partialorder %v5447_v18, %v5783_v5  ;;  %v1348_v18 = vpop.xlane.xlu1 %1347  ;;  %v5809_v51 = vsub.f32 %v5806_v44, %v1199_v25 }
 0x2b8   :  { %v1560_v20 = vsel %vm1559_vm3, %v1555_v14, inf  ;;  %v1581_v14 = vand.u32 65535, %v5462_v35  ;;  %vm1444_vm5 = vcmp.le.f32.partialorder %v5416_v47, %v1348_v18 }
 0x2b9   :  { %1977 = vmin.xlane.f32.xlu0 %v5786_v0  ;;  %1561 = vmin.xlane.f32.xlu1 %v1560_v20  ;;  %v1595_v20 = vand.u32 65535, %v5474_v3  ;;  %v5820_v35 = vsel %vm1444_vm5, %v5422_v32, 128 }
 0x2ba   :  { %v5792_v63 = vpop.xlane.xlu0 %1571  ;;  %v1583_v46 = vcvt.s32.f32 %v1581_v14  ;;  %v2002_v3 = vshra.s32 %v5820_v35, 16  ;;  %v1609_v14 = vand.u32 65535, %v5489_v10 }
 0x2bb   :  { %vm1573_vm4 = vcmp.eq.f32.partialorder %v5459_v17, %v5792_v63  ;;  %v1350_v25 = vpop.xlane.xlu1 %1349  ;;  %v1597_v47 = vcvt.s32.f32 %v1595_v20 }
 0x2bc   :  { %v1574_v23 = vsel %vm1573_vm4, %v1569_v53, inf  ;;  %v1200_v53 = vmul.f32 2.0, %v5585_v19  ;;  %vm1445_vm8 = vcmp.le.f32.partialorder %v5420_v38, %v1350_v25 }
 0x2bd   :  { %1575 = vmin.xlane.f32.xlu0 %v1574_v23  ;;  %1991 = vmin.xlane.f32.xlu1 %v5797_v16  ;;  %v5838_v20 = vsel %vm1445_vm8, %v5422_v32, 128 }
 0x2be   :  { %v5800_v56 = vpop.xlane.xlu0 %1357  ;;  %v5827_v18 = vsub.f32 %v5806_v44, %v1200_v53  ;;  %v1611_v53 = vcvt.s32.f32 %v1609_v14  ;;  %v2016_v38 = vshra.s32 %v5838_v20, 16 }
 0x2c1   :  { %1385 = vmin.xlane.f32.xlu0 %v5809_v51 }
 0x2c2   :  { %v5813_v17 = vpop.xlane.xlu0 %1585 }
 0x2c3   :  { %vm1587_vm6 = vcmp.eq.f32.partialorder %v5478_v48, %v5813_v17 }
 0x2c4   :  { %v1588_v23 = vsel %vm1587_vm6, %v1583_v46, inf  ;;  %v5835_v46 = vcvt.s32.f32 %v2002_v3  ;;  %v1201_v3 = vmul.f32 2.0, %v5598_v9 }
 0x2c5   :  { %1589 = vmin.xlane.f32.xlu1 %v1588_v23  ;;  %v1623_v23 = vand.u32 65535, %v5499_v37  ;;  %v1352_v37 = vpop.xlane.xlu1 %1351 }
 0x2c6   :  { %v5822_v16 = vpop.xlane.xlu0 %1599  ;;  %vm1446_vm11 = vcmp.le.f32.partialorder %v5427_v21, %v1352_v37 }
 0x2c7   :  { %vm1601_vm7 = vcmp.eq.f32.partialorder %v5483_v4, %v5822_v16 }
 0x2c8   :  { %v1602_v19 = vsel %vm1601_vm7, %v1597_v47, inf  ;;  %v1625_v47 = vcvt.s32.f32 %v1623_v23 }
 0x2c9   :  { %1603 = vmin.xlane.f32.xlu0 %v1602_v19  ;;  %1387 = vmin.xlane.f32.xlu1 %v5827_v18  ;;  %v5852_v19 = vcvt.s32.f32 %v2016_v38  ;;  %v1202_v38 = vmul.f32 2.0, %v5612_v26 }
 0x2ca   :  { %v5832_v48 = vpop.xlane.xlu0 %1361 }
 0x2cb   :  { %v5875_v37 = vsub.f32 %v5806_v44, %v1202_v38  ;;  %v7991_v38 = vld [vmem:[#allocation142_spill] sm:$0xff] }
 0x2cd   :  { %2005 = vmin.xlane.f32.xlu0 %v5835_v46  ;;  %7987 = vst [vmem:[#allocation176_spill] sm:$0xff] %v5875_v37 }
 0x2ce   :  { %v5841_v4 = vpop.xlane.xlu0 %1613 }
 0x2cf   :  { %vm1615_vm9 = vcmp.eq.f32.partialorder %v5502_v29, %v5841_v4 }
 0x2d0   :  { %v1616_v25 = vsel %vm1615_vm9, %v1611_v53, inf  ;;  %v1637_v53 = vand.u32 65535, %v5514_v1 }
 0x2d1   :  { %1617 = vmin.xlane.f32.xlu1 %v1616_v25  ;;  %v5859_v25 = vsub.f32 %v5806_v44, %v1201_v3  ;;  %v1354_v3 = vpop.xlane.xlu1 %1353 }
 0x2d2   :  { %v5847_v10 = vpop.xlane.xlu0 %1627  ;;  %v1639_v23 = vcvt.s32.f32 %v1637_v53  ;;  %vm1447_vm14 = vcmp.le.f32.partialorder %v5438_v41, %v1354_v3  ;;  %v7992_v3 = vld [vmem:[#allocation143_spill] sm:$0xff] }
 0x2d3   :  { %vm1629_vm10 = vcmp.eq.f32.partialorder %v5511_v60, %v5847_v10  ;;  %7984 = vst [vmem:[#allocation173_spill] sm:$0xff] %v5859_v25  ;;  %v1651_v60 = vand.u32 65535, %v5526_v34 }
 0x2d4   :  { %v1630_v14 = vsel %vm1629_vm10, %v1625_v47, inf  ;;  %v5870_v47 = vsel %vm1446_vm11, %v5422_v32, 128 }
 0x2d5   :  { %1631 = vmin.xlane.f32.xlu0 %v1630_v14  ;;  %2019 = vmin.xlane.f32.xlu1 %v5852_v19  ;;  %7985 = vst [vmem:[#allocation174_spill] sm:$0xff] %v5870_v47  ;;  %v1653_v21 = vcvt.s32.f32 %v1651_v60  ;;  %v2030_v34 = vshra.s32 %v5870_v47, 16  ;;  %v5888_v60 = vsel %vm1447_vm14, %v5422_v32, 128  ;;  %v1679_v47 = vand.u32 65535, %v7991_v38 }
 0x2d6   :  { %v5855_v29 = vpop.xlane.xlu0 %1365  ;;  %7990 = vst [vmem:[#allocation177_spill] sm:$0xff] %v5888_v60  ;;  %v2044_v41 = vshra.s32 %v5888_v60, 16 }
 0x2d9   :  { %1389 = vmin.xlane.f32.xlu0 %v5859_v25  ;;  %v1356_v25 = vpop.xlane.xlu1 %1355 }
 0x2da   :  { %v5864_v9 = vpop.xlane.xlu0 %1641 }
 0x2db   :  { %vm1643_vm12 = vcmp.eq.f32.partialorder %v5530_v8, %v5864_v9  ;;  %v7988_v8 = vld [vmem:[#allocation140_spill] sm:$0xff] }
 0x2dc   :  { %v1644_v1 = vsel %vm1643_vm12, %v1639_v23, inf  ;;  %v1665_v53 = vand.u32 65535, %v7988_v8 }
 0x2dd   :  { %1645 = vmin.xlane.f32.xlu1 %v1644_v1  ;;  %v5885_v1 = vcvt.s32.f32 %v2030_v34  ;;  %v1681_v34 = vcvt.s32.f32 %v1679_v47  ;;  %v7996_v47 = vld [vmem:[#allocation131_spill] sm:$0xff] }
 0x2de   :  { %v5872_v14 = vpop.xlane.xlu0 %1655  ;;  %vm1448_vm1 = vcmp.le.f32.partialorder %v7996_v47, %v1356_v25 }
 0x2df   :  { %7986 = vst [vmem:[#allocation175_spill] sm:$0xff] %v5872_v14  ;;  %vm1657_vm13 = vcmp.eq.f32.partialorder %v5535_v55, %v5872_v14  ;;  %7989 = vst [vmem:[#allocation140_spill] sm:$0xff] %v5885_v1  ;;  %v7993_v14 = vld [vmem:[#allocation145_spill] sm:$0xff] }
 0x2e0   :  { %v1658_v26 = vsel %vm1657_vm13, %v1653_v21, inf  ;;  %v1667_v21 = vcvt.s32.f32 %v1665_v53  ;;  %v7994_v53 = vld [vmem:[#allocation146_spill] sm:$0xff] }
 0x2e1   :  { %1659 = vmin.xlane.f32.xlu0 %v1658_v26  ;;  %1391 = vmin.xlane.f32.xlu1 %v5875_v37  ;;  %v1203_v37 = vmul.f32 2.0, %v5623_v59  ;;  %v1693_v60 = vand.u32 65535, %v7994_v53  ;;  %v1707_v59 = vand.u32 65535, %v5577_v13 }
 0x2e2   :  { %v5883_v23 = vpop.xlane.xlu0 %1369 }
 0x2e3   :  { %v1709_v25 = vcvt.s32.f32 %v1707_v59 }
 0x2e5   :  { %2033 = vmin.xlane.f32.xlu0 %v5885_v1  ;;  %v5902_v1 = vcvt.s32.f32 %v2044_v41  ;;  %v1695_v41 = vcvt.s32.f32 %v1693_v60  ;;  %v8001_v60 = vld [vmem:[#allocation149_spill] sm:$0xff] }
 0x2e6   :  { %v5892_v55 = vpop.xlane.xlu0 %1669 }
 0x2e7   :  { %vm1671_vm15 = vcmp.eq.f32.partialorder %v7992_v3, %v5892_v55 }
 0x2e8   :  { %v1672_v26 = vsel %vm1671_vm15, %v1667_v21, inf  ;;  %v5909_v21 = vsub.f32 %v5806_v44, %v1203_v37 }
 0x2e9   :  { %1673 = vmin.xlane.f32.xlu1 %v1672_v26  ;;  %v1204_v26 = vmul.f32 2.0, %v5635_v62 }
 0x2ea   :  { %v5897_v8 = vpop.xlane.xlu0 %1683  ;;  %7995 = vst [vmem:[#allocation142_spill] sm:$0xff] %v5909_v21 }
 0x2eb   :  { %vm1685_vm0 = vcmp.eq.f32.partialorder %v7993_v14, %v5897_v8  ;;  %v5925_v47 = vsub.f32 %v5806_v44, %v1204_v26 }
 0x2ec   :  { %v1686_v38 = vsel %vm1685_vm0, %v1681_v34, inf  ;;  %v7998_v34 = vld [vmem:[#allocation148_spill] sm:$0xff] }
 0x2ed   :  { %1687 = vmin.xlane.f32.xlu0 %v1686_v38  ;;  %2047 = vmin.xlane.f32.xlu1 %v5902_v1  ;;  %v5920_v38 = vsel %vm1448_vm1, %v5422_v32, 128  ;;  %8000 = vst [vmem:[#allocation146_spill] sm:$0xff] %v5925_v47 }
 0x2ee   :  { %v5906_v3 = vpop.xlane.xlu0 %1373  ;;  %7999 = vst [vmem:[#allocation145_spill] sm:$0xff] %v5920_v38  ;;  %v2058_v13 = vshra.s32 %v5920_v38, 16 }
 0x2f0   :  { %v5936_v59 = vcvt.s32.f32 %v2058_v13 }
 0x2f1   :  { %1393 = vmin.xlane.f32.xlu0 %v5909_v21  ;;  %v8002_v21 = vld [vmem:[#allocation132_spill] sm:$0xff] }
 0x2f2   :  { %v5914_v14 = vpop.xlane.xlu0 %1697  ;;  %vm1449_vm4 = vcmp.le.f32.partialorder %v8002_v21, %v5800_v56  ;;  %8004 = vst [vmem:[#allocation131_spill] sm:$0xff] %v5936_v59 }
 0x2f3   :  { %7997 = vst [vmem:[#allocation143_spill] sm:$0xff] %v5914_v14  ;;  %vm1699_vm2 = vcmp.eq.f32.partialorder %v7998_v34, %v5914_v14  ;;  %v5939_v26 = vsel %vm1449_vm4, %v5422_v32, 128 }
 0x2f4   :  { %v1700_v53 = vsel %vm1699_vm2, %v1695_v41, inf  ;;  %v8003_v41 = vld [vmem:[#allocation150_spill] sm:$0xff]  ;;  %8005 = vst [vmem:[#allocation148_spill] sm:$0xff] %v5939_v26 }
 0x2f5   :  { %1701 = vmin.xlane.f32.xlu1 %v1700_v53  ;;  %v1721_v34 = vand.u32 65535, %v8003_v41  ;;  %v1360_v53 = vpop.xlane.xlu1 %1359 }
 0x2f6   :  { %v5922_v37 = vpop.xlane.xlu0 %1711 }
 0x2f7   :  { %vm1713_vm3 = vcmp.eq.f32.partialorder %v8001_v60, %v5922_v37  ;;  %v1723_v21 = vcvt.s32.f32 %v1721_v34 }
 0x2f8   :  { %v1714_v62 = vsel %vm1713_vm3, %v1709_v25, inf  ;;  %v1735_v25 = vand.u32 65535, %v5610_v61 }
 0x2f9   :  { %1715 = vmin.xlane.f32.xlu0 %v1714_v62  ;;  %1395 = vmin.xlane.f32.xlu1 %v5925_v47  ;;  %v5943_v60 = vpop.xlane.xlu1 %1363  ;;  %v2072_v62 = vshra.s32 %v5939_v26, 16  ;;  %v8008_v26 = vld [vmem:[#allocation156_spill] sm:$0xff] }
 0x2fa   :  { %v5934_v14 = vpop.xlane.xlu0 %1377  ;;  %v1737_v38 = vcvt.s32.f32 %v1735_v25  ;;  %v8010_v25 = vld [vmem:[#allocation133_spill] sm:$0xff] }
 0x2fb   :  { %v5957_v61 = vcvt.s32.f32 %v2072_v62  ;;  %vm1450_vm7 = vcmp.le.f32.partialorder %v8010_v25, %v1360_v53  ;;  %v8013_v53 = vld [vmem:[#allocation135_spill] sm:$0xff]  ;;  %v8014_v25 = vld [vmem:[#allocation160_spill] sm:$0xff] }
 0x2fc   :  { %vm1451_vm9 = vcmp.le.f32.partialorder %v8013_v53, %v5832_v48 }
 0x2fd   :  { %2061 = vmin.xlane.f32.xlu0 %v5936_v59  ;;  %v5950_v13 = vpop.xlane.xlu1 %1367  ;;  %v1205_v59 = vmul.f32 2.0, %v5651_v43  ;;  %8007 = vst [vmem:[#allocation132_spill] sm:$0xff] %v5957_v61 }
 0x2fe   :  { %v5945_v56 = vpop.xlane.xlu0 %1725 }
 0x2ff   :  { %8006 = vst [vmem:[#allocation149_spill] sm:$0xff] %v5945_v56  ;;  %vm1727_vm5 = vcmp.eq.f32.partialorder %v5617_v15, %v5945_v56  ;;  %v1749_v15 = vand.u32 65535, %v8008_v26  ;;  %v5966_v56 = vsub.f32 %v5806_v44, %v1205_v59  ;;  %v1206_v26 = vmul.f32 2.0, %v5664_v12 }
 0x300   :  { %v1728_v41 = vsel %vm1727_vm5, %v1723_v21, inf }
 0x301   :  { %1729 = vmin.xlane.f32.xlu1 %v1728_v41  ;;  %v5961_v21 = vpop.xlane.xlu1 %1371  ;;  %8009 = vst [vmem:[#allocation150_spill] sm:$0xff] %v5966_v56  ;;  %v1751_v62 = vcvt.s32.f32 %v1749_v15  ;;  %v5989_v12 = vsub.f32 %v5806_v44, %v1206_v26 }
 0x302   :  { %v5952_v47 = vpop.xlane.xlu0 %1739 }
 0x303   :  { %vm1741_vm6 = vcmp.eq.f32.partialorder %v5628_v40, %v5952_v47  ;;  %v1763_v40 = vand.u32 65535, %v5646_v6  ;;  %v1777_v6 = vand.u32 65535, %v8014_v25  ;;  %8016 = vst [vmem:[#allocation160_spill] sm:$0xff] %v5989_v12 }
 0x304   :  { %v1742_v34 = vsel %vm1741_vm6, %v1737_v38, inf }
 0x305   :  { %1743 = vmin.xlane.f32.xlu0 %v1742_v34  ;;  %2075 = vmin.xlane.f32.xlu1 %v5957_v61  ;;  %v5971_v43 = vpop.xlane.xlu1 %1375  ;;  %v5979_v34 = vsel %vm1450_vm7, %v5422_v32, 128  ;;  %v1765_v15 = vcvt.s32.f32 %v1763_v40  ;;  %v1779_v26 = vcvt.s32.f32 %v1777_v6  ;;  %v1207_v6 = vmul.f32 2.0, %v5679_v7  ;;  %v8022_v7 = vld [vmem:[#allocation164_spill] sm:$0xff] }
 0x306   :  { %v5963_v41 = vpop.xlane.xlu0 %1381  ;;  %8012 = vst [vmem:[#allocation133_spill] sm:$0xff] %v5979_v34 }
 0x309   :  { %1397 = vmin.xlane.f32.xlu0 %v5966_v56  ;;  %v5984_v56 = vpop.xlane.xlu1 %1379 }
 0x30a   :  { %v5973_v38 = vpop.xlane.xlu0 %1753 }
 0x30b   :  { %8011 = vst [vmem:[#allocation156_spill] sm:$0xff] %v5973_v38  ;;  %vm1755_vm8 = vcmp.eq.f32.partialorder %v5658_v50, %v5973_v38  ;;  %v2086_v50 = vshra.s32 %v5979_v34, 16 }
 0x30c   :  { %v1756_v59 = vsel %vm1755_vm8, %v1751_v62, inf  ;;  %v5995_v62 = vsel %vm1451_vm9, %v5422_v32, 128 }
 0x30d   :  { %1757 = vmin.xlane.f32.xlu1 %v1756_v59  ;;  %8017 = vst [vmem:[#allocation178_spill] sm:$0xff] %v5995_v62  ;;  %v8018_v59 = vld [vmem:[#allocation151_spill] sm:$0xff]  ;;  %v5999_v25 = vpop.xlane.xlu1 %1795  ;;  %v2100_v38 = vshra.s32 %v5995_v62, 16  ;;  %v6004_v34 = vcvt.s32.f32 %v2086_v50 }
 0x30e   :  { %v5986_v61 = vpop.xlane.xlu0 %1767  ;;  %v1791_v53 = vand.u32 65535, %v8018_v59 }
 0x30f   :  { %8015 = vst [vmem:[#allocation135_spill] sm:$0xff] %v5986_v61  ;;  %vm1769_vm10 = vcmp.eq.f32.partialorder %v5670_v22, %v5986_v61  ;;  %v6015_v62 = vcvt.s32.f32 %v2100_v38  ;;  %v8020_v61 = vld [vmem:[#allocation134_spill] sm:$0xff]  ;;  %v1208_v38 = vmul.f32 2.0, %v8022_v7 }
 0x310   :  { %v1770_v48 = vsel %vm1769_vm10, %v1765_v15, inf  ;;  %v8019_v15 = vld [vmem:[#allocation153_spill] sm:$0xff]  ;;  %vm1452_vm13 = vcmp.le.f32.partialorder %v8020_v61, %v5943_v60 }
 0x311   :  { %1771 = vmin.xlane.f32.xlu0 %v1770_v48  ;;  %1399 = vmin.xlane.f32.xlu1 %v5989_v12  ;;  %vm1797_vm12 = vcmp.eq.f32.partialorder %v8019_v15, %v5999_v25  ;;  %v1805_v48 = vand.u32 65535, %v5674_v27  ;;  %v1793_v12 = vcvt.s32.f32 %v1791_v53  ;;  %v6023_v27 = vpop.xlane.xlu1 %1823  ;;  %v6026_v53 = vsub.f32 %v5806_v44, %v1207_v6  ;;  %v8024_v61 = vld [vmem:[#allocation137_spill] sm:$0xff]  ;;  %v8026_v15 = vld [vmem:[#allocation163_spill] sm:$0xff] }
 0x312   :  { %v6001_v40 = vpop.xlane.xlu0 %1781  ;;  %vm1453_vm15 = vcmp.le.f32.partialorder %v8024_v61, %v5855_v29 }
 0x313   :  { %vm1783_vm11 = vcmp.eq.f32.partialorder %v5686_v42, %v6001_v40  ;;  %v1798_v50 = vsel %vm1797_vm12, %v1793_v12, inf  ;;  %v8021_v42 = vld [vmem:[#allocation154_spill] sm:$0xff]  ;;  %v6030_v12 = vsel %vm1452_vm13, %v5422_v32, 128 }
 0x314   :  { %v1784_v22 = vsel %vm1783_vm11, %v1779_v26, inf  ;;  %v1819_v26 = vand.u32 65535, %v8021_v42  ;;  %8023 = vst [vmem:[#allocation151_spill] sm:$0xff] %v6030_v12  ;;  %v6041_v42 = vsub.f32 %v5806_v44, %v1208_v38  ;;  %v2114_v7 = vshra.s32 %v6030_v12, 16 }
 0x315   :  { %2089 = vmin.xlane.f32.xlu0 %v6004_v34  ;;  %1785 = vmin.xlane.f32.xlu1 %v1784_v22  ;;  %v1807_v22 = vcvt.s32.f32 %v1805_v48  ;;  %v1833_v48 = vand.u32 65535, %v8026_v15 }
 0x316   :  { %v6012_v59 = vpop.xlane.xlu0 %1809  ;;  %v1821_v6 = vcvt.s32.f32 %v1819_v26  ;;  %8028 = vst [vmem:[#allocation134_spill] sm:$0xff] %v6041_v42  ;;  %v6054_v15 = vcvt.s32.f32 %v2114_v7  ;;  %v8031_v7 = vld [vmem:[#allocation136_spill] sm:$0xff] }
 0x317   :  { %vm1811_vm14 = vcmp.eq.f32.partialorder %v5698_v11, %v6012_v59  ;;  %v8025_v11 = vld [vmem:[#allocation155_spill] sm:$0xff]  ;;  %v1835_v26 = vcvt.s32.f32 %v1833_v48  ;;  %vm1454_vm3 = vcmp.le.f32.partialorder %v8031_v7, %v5950_v13 }
 0x318   :  { %v1812_v60 = vsel %vm1811_vm14, %v1807_v22, inf  ;;  %vm1825_vm0 = vcmp.eq.f32.partialorder %v8025_v11, %v6023_v27  ;;  %v6045_v22 = vsel %vm1453_vm15, %v5422_v32, 128  ;;  %v6051_v11 = vpop.xlane.xlu1 %1851 }
 0x319   :  { %1799 = vmin.xlane.f32.xlu0 %v1798_v50  ;;  %2103 = vmin.xlane.f32.xlu1 %v6015_v62  ;;  %v1826_v29 = vsel %vm1825_vm0, %v1821_v6, inf  ;;  %v2128_v38 = vshra.s32 %v6045_v22, 16  ;;  %v8030_v6 = vld [vmem:[#allocation159_spill] sm:$0xff] }
 0x31a   :  { %v6038_v50 = vpop.xlane.xlu0 %1837  ;;  %vm1853_vm2 = vcmp.eq.f32.partialorder %v8030_v6, %v6051_v11 }
 0x31b   :  { %8027 = vst [vmem:[#allocation153_spill] sm:$0xff] %v6038_v50  ;;  %vm1839_vm1 = vcmp.eq.f32.partialorder %v5714_v30, %v6038_v50  ;;  %v6063_v50 = vcvt.s32.f32 %v2128_v38  ;;  %v6078_v38 = vsel %vm1454_vm3, %v5422_v32, 128 }
 0x31c   :  { %v1840_v12 = vsel %vm1839_vm1, %v1835_v26, inf  ;;  %8033 = vst [vmem:[#allocation154_spill] sm:$0xff] %v6078_v38  ;;  %v2142_v7 = vshra.s32 %v6078_v38, 16 }
 0x31d   :  { %1813 = vmin.xlane.f32.xlu1 %v1812_v60  ;;  %1401 = vmin.xlane.f32.xlu0 %v6026_v53  ;;  %v8029_v60 = vld [vmem:[#allocation158_spill] sm:$0xff] }
 0x31e   :  { %v1847_v61 = vand.u32 65535, %v8029_v60  ;;  %v1209_v60 = vmul.f32 2.0, %v5707_v54  ;;  %v1210_v54 = vmul.f32 2.0, %v5720_v57 }
 0x320   :  { %v1849_v30 = vcvt.s32.f32 %v1847_v61  ;;  %v6074_v61 = vsub.f32 %v5806_v44, %v1209_v60  ;;  %v6089_v57 = vsub.f32 %v5806_v44, %v1210_v54 }
 0x321   :  { %1827 = vmin.xlane.f32.xlu0 %v1826_v29  ;;  %1403 = vmin.xlane.f32.xlu1 %v6041_v42  ;;  %v1861_v29 = vand.u32 65535, %v5702_v49  ;;  %v6060_v42 = vpop.xlane.xlu0 %1865  ;;  %v6071_v49 = vpop.xlane.xlu1 %1879 }
 0x322   :  { %v1854_v48 = vsel %vm1853_vm2, %v1849_v30, inf  ;;  %vm1867_vm4 = vcmp.eq.f32.partialorder %v5726_v24, %v6060_v42  ;;  %v8034_v30 = vld [vmem:[#allocation141_spill] sm:$0xff]  ;;  %v8035_v24 = vld [vmem:[#allocation162_spill] sm:$0xff] }
 0x323   :  { %v1863_v6 = vcvt.s32.f32 %v1861_v29  ;;  %vm1455_vm5 = vcmp.le.f32.partialorder %v8034_v30, %v5883_v23  ;;  %vm1881_vm6 = vcmp.eq.f32.partialorder %v8035_v24, %v6071_v49  ;;  %v1889_v29 = vand.u32 65535, %v5718_v45  ;;  %v8039_v45 = vld [vmem:[#allocation165_spill] sm:$0xff] }
 0x324   :  { %v1903_v44 = vand.u32 65535, %v8039_v45  ;;  %v6104_v30 = vcvt.s32.f32 %v2142_v7 }
 0x325   :  { %2117 = vmin.xlane.f32.xlu0 %v6054_v15  ;;  %1841 = vmin.xlane.f32.xlu1 %v1840_v12  ;;  %v8032_v12 = vld [vmem:[#allocation161_spill] sm:$0xff]  ;;  %v1868_v13 = vsel %vm1867_vm4, %v1863_v6, inf  ;;  %v6095_v23 = vpop.xlane.xlu1 %1907 }
 0x326   :  { %v1875_v26 = vand.u32 65535, %v8032_v12  ;;  %v6093_v12 = vsel %vm1455_vm5, %v5422_v32, 128  ;;  %8040 = vst [vmem:[#allocation155_spill] sm:$0xff] %v6104_v30 }
 0x327   :  { %8037 = vst [vmem:[#allocation137_spill] sm:$0xff] %v6093_v12  ;;  %v2156_v54 = vshra.s32 %v6093_v12, 16 }
 0x328   :  { %v1877_v60 = vcvt.s32.f32 %v1875_v26  ;;  %v1891_v26 = vcvt.s32.f32 %v1889_v29  ;;  %v8045_v29 = vld [vmem:[#allocation167_spill] sm:$0xff] }
 0x329   :  { %1855 = vmin.xlane.f32.xlu0 %v1854_v48  ;;  %2131 = vmin.xlane.f32.xlu1 %v6063_v50  ;;  %v6086_v48 = vpop.xlane.xlu0 %1893  ;;  %v1917_v7 = vand.u32 65535, %v8045_v29  ;;  %v6120_v12 = vcvt.s32.f32 %v2156_v54  ;;  %v1550_v29 = vcvt.f32.s32 %v5774_v31  ;;  %v1564_v31 = vcvt.f32.s32 %v5783_v5 }
 0x32a   :  { %8036 = vst [vmem:[#allocation164_spill] sm:$0xff] %v6086_v48  ;;  %v1882_v6 = vsel %vm1881_vm6, %v1877_v60, inf  ;;  %vm1895_vm8 = vcmp.eq.f32.partialorder %v5740_v28, %v6086_v48  ;;  %v6109_v60 = vpop.xlane.xlu1 %1935  ;;  %v8044_v28 = vld [vmem:[#allocation166_spill] sm:$0xff]  ;;  %v8047_v48 = vld [vmem:[#allocation139_spill] sm:$0xff] }
 0x32b   :  { %vm1909_vm10 = vcmp.eq.f32.partialorder %v8044_v28, %v6095_v23  ;;  %8046 = vst [vmem:[#allocation159_spill] sm:$0xff] %v6120_v12  ;;  %vm1458_vm11 = vcmp.le.f32.partialorder %v8047_v48, %v5971_v43  ;;  %v1919_v54 = vcvt.s32.f32 %v1917_v7 }
 0x32c   :  { %v6137_v43 = vsel %vm1458_vm11, %v5422_v32, 128 }
 0x32d   :  { %1869 = vmin.xlane.f32.xlu1 %v1868_v13  ;;  %1405 = vmin.xlane.f32.xlu0 %v6074_v61  ;;  %v8038_v13 = vld [vmem:[#allocation138_spill] sm:$0xff]  ;;  %v6111_v38 = vpop.xlane.xlu0 %1921  ;;  %v2198_v7 = vshra.s32 %v6137_v43, 16 }
 0x32e   :  { %vm1456_vm7 = vcmp.le.f32.partialorder %v8038_v13, %v5961_v21  ;;  %8042 = vst [vmem:[#allocation158_spill] sm:$0xff] %v6111_v38  ;;  %v1896_v21 = vsel %vm1895_vm8, %v1891_v26, inf  ;;  %v1905_v13 = vcvt.s32.f32 %v1903_v44  ;;  %vm1923_vm12 = vcmp.eq.f32.partialorder %v5749_v2, %v6111_v38  ;;  %v8049_v44 = vld [vmem:[#allocation168_spill] sm:$0xff]  ;;  %v8051_v2 = vld [vmem:[#allocation169_spill] sm:$0xff] }
 0x32f   :  { %v6107_v24 = vsel %vm1456_vm7, %v5422_v32, 128  ;;  %vm1937_vm14 = vcmp.eq.f32.partialorder %v8051_v2, %v6109_v60  ;;  %v1551_v38 = vshll.u32 %v1550_v29, 16 }
 0x330   :  { %8041 = vst [vmem:[#allocation163_spill] sm:$0xff] %v6107_v24  ;;  %v2170_v45 = vshra.s32 %v6107_v24, 16 }
 0x331   :  { %1883 = vmin.xlane.f32.xlu0 %v1882_v6  ;;  %1407 = vmin.xlane.f32.xlu1 %v6089_v57  ;;  %v8043_v6 = vld [vmem:[#allocation147_spill] sm:$0xff]  ;;  %v6133_v28 = vpop.xlane.xlu0 %1949 }
 0x332   :  { %vm1457_vm9 = vcmp.le.f32.partialorder %v8043_v6, %v5906_v3  ;;  %v6127_v3 = vpop.xlane.xlu1 %1963  ;;  %v1910_v6 = vsel %vm1909_vm10, %v1905_v13, inf  ;;  %v6140_v24 = vcvt.s32.f32 %v2170_v45  ;;  %v1924_v13 = vsel %vm1923_vm12, %v1919_v54, inf }
 0x333   :  { %v6125_v26 = vsel %vm1457_vm9, %v5422_v32, 128  ;;  %vm1951_vm0 = vcmp.eq.f32.partialorder %v5760_v58, %v6133_v28  ;;  %v8056_v58 = vld [vmem:[#allocation157_spill] sm:$0xff] }
 0x334   :  { %8048 = vst [vmem:[#allocation136_spill] sm:$0xff] %v6125_v26  ;;  %v2184_v48 = vshra.s32 %v6125_v26, 16  ;;  %vm1461_vm2 = vcmp.le.f32.partialorder %v8056_v58, %v5963_v41  ;;  %v8058_v41 = vmov 0.0  }
 0x335   :  { %2145 = vmin.xlane.f32.xlu0 %v6104_v30  ;;  %1897 = vmin.xlane.f32.xlu1 %v1896_v21  ;;  %v1931_v21 = vand.u32 65535, %v8049_v44 }
 0x336   :  { %v1384_v44 = vpop.xlane.xlu1 %1383  ;;  %v6150_v30 = vcvt.s32.f32 %v2184_v48  ;;  %v1578_v48 = vcvt.f32.s32 %v5792_v63 }
 0x337   :  { %v1933_v45 = vcvt.s32.f32 %v1931_v21  ;;  %v8055_v21 = vld [vmem:[#allocation170_spill] sm:$0xff]  ;;  %vm1462_vm5 = vcmp.le.f32.partialorder %v5765_v36, %v1384_v44  ;;  %v1606_v36 = vcvt.f32.s32 %v5822_v16  ;;  %v2001_v16 = vand.u32 65535, %v5820_v35 }
 0x338   :  { %8052 = vst [vmem:[#allocation161_spill] sm:$0xff] %v6150_v30  ;;  %v1959_v29 = vand.u32 65535, %v8055_v21  ;;  %v1579_v21 = vshll.u32 %v1578_v48, 16 }
 0x339   :  { %1911 = vmin.xlane.f32.xlu0 %v1910_v6  ;;  %2159 = vmin.xlane.f32.xlu1 %v6120_v12  ;;  %v1945_v6 = vand.u32 65535, %v5744_v33  ;;  %v8050_v12 = vld [vmem:[#allocation152_spill] sm:$0xff] }
 0x33a   :  { %vm1459_vm13 = vcmp.le.f32.partialorder %v8050_v12, %v5934_v14  ;;  %v8053_v33 = vld [vmem:[#allocation144_spill] sm:$0xff]  ;;  %v1938_v12 = vsel %vm1937_vm14, %v1933_v45, inf  ;;  %v1961_v58 = vcvt.s32.f32 %v1959_v29 }
 0x33b   :  { %vm1460_vm15 = vcmp.le.f32.partialorder %v8053_v33, %v5984_v56  ;;  %v6155_v14 = vsel %vm1459_vm13, %v5422_v32, 128  ;;  %v1947_v5 = vcvt.s32.f32 %v1945_v6  ;;  %v6164_v33 = vcvt.s32.f32 %v2198_v7  ;;  %v8057_v7 = vld [vmem:[#allocation171_spill] sm:$0xff] }
 0x33c   :  { %8054 = vst [vmem:[#allocation141_spill] sm:$0xff] %v6155_v14  ;;  %v6167_v45 = vsel %vm1460_vm15, %v5422_v32, 128  ;;  %vm1965_vm3 = vcmp.eq.f32.partialorder %v8057_v7, %v6127_v3 }
 0x33d   :  { %1925 = vmin.xlane.f32.xlu0 %v1924_v13  ;;  %2173 = vmin.xlane.f32.xlu1 %v6140_v24  ;;  %v1952_v63 = vsel %vm1951_vm0, %v1947_v5, inf }
 0x33e   :  { %v1548_v26 = vpop.xlane.xlu0 %1547 }
 0x33f   :  { %v1549_v54 = vcvt.f32.s32 %v1548_v26  ;;  %v1565_v26 = vshll.u32 %v1564_v31, 16 }
 0x341   :  { %v1552_v13 = vadd.s32 %v1551_v38, %v1549_v54  ;;  %1939 = vmin.xlane.f32.xlu0 %v1938_v12  ;;  %2187 = vmin.xlane.f32.xlu1 %v6150_v30  ;;  %v2212_v38 = vshra.s32 %v6155_v14, 16  ;;  %v7797_v54 = vmov 1.0   ;;  %v1973_v12 = vand.u32 65535, %v5771_v52 }
 0x342   :  { %v6162_v2 = vpop.xlane.xlu0 %1977  ;;  %v1562_v56 = vpop.xlane.xlu1 %1561  ;;  %v6183_v30 = vsel %vm1461_vm2, %v5422_v32, 128 }
 0x343   :  { %vm2435_vm1 = vcmp.eq.s32.totalorder %v5422_v32, %v1552_v13  ;;  %v1563_v6 = vcvt.f32.s32 %v1562_v56  ;;  %v2226_v56 = vshra.s32 %v6167_v45, 16  ;;  %vm1979_vm6 = vcmp.eq.f32.partialorder %v5786_v0, %v6162_v2 }
 0x344   :  { %4304 = vmatmul.mubr.msk.f32.vlgmr.msra.gmra.mxu0 %vm2435_vm1, %v7797_v54  ;;  %v4240_v52 = vsel %vm2435_vm1, 1.0, %v8058_v41  ;;  %v1975_v7 = vcvt.s32.f32 %v1973_v12  ;;  %v8059_v12 = vld [vmem:[#allocation172_spill] sm:$0xff] }
 0x345   :  { %v1566_v31 = vadd.s32 %v1565_v26, %v1563_v6  ;;  %1953 = vmin.xlane.f32.xlu0 %v1952_v63  ;;  %2201 = vmin.xlane.f32.xlu1 %v6164_v33  ;;  %v6186_v26 = vcvt.s32.f32 %v2212_v38  ;;  %v1966_v6 = vsel %vm1965_vm3, %v1961_v58, inf  ;;  %v1592_v38 = vcvt.f32.s32 %v5813_v17 }
 0x346   :  { %v1576_v14 = vpop.xlane.xlu0 %1575  ;;  %2697 = vmatprep.mubr.f32.mxu0 %v8058_v41  ;;  %v2240_v58 = vshra.s32 %v6183_v30, 16  ;;  %v6209_v0 = vcvt.s32.f32 %v2226_v56  ;;  %v1980_v17 = vsel %vm1979_vm6, %v1975_v7, inf  ;;  %v1607_v7 = vshll.u32 %v1606_v36, 16 }
 0x347   :  { %v1577_v5 = vcvt.f32.s32 %v1576_v14  ;;  %vm2436_vm4 = vcmp.eq.s32.totalorder %v5422_v32, %v1566_v31  ;;  %v1987_v14 = vand.u32 65535, %v5781_v39  ;;  %v6199_v31 = vpop.xlane.xlu1 %1991 }
 0x348   :  { %v4241_v48 = vsel %vm2436_vm4, 1.0, %v8058_v41  ;;  %4305 = vmatmul.mubr.msk.f32.gmra.mxu0 %vm2436_vm4, %v7797_v54  ;;  %vm1993_vm9 = vcmp.eq.f32.partialorder %v8059_v12, %v6199_v31 }
 0x349   :  { %v1580_v29 = vadd.s32 %v1579_v21, %v1577_v5  ;;  %v3471_v63 = vadd.f32 %v4241_v48, %v4240_v52  ;;  %1967 = vmin.xlane.f32.xlu0 %v1966_v6  ;;  %2215 = vmin.xlane.f32.xlu1 %v6186_v26  ;;  %v6206_v21 = vsel %vm1462_vm5, %v5422_v32, 128  ;;  %v1989_v52 = vcvt.s32.f32 %v1987_v14 }
 0x34a   :  { %v1386_v13 = vpop.xlane.xlu0 %1385  ;;  %2703 = vmatprep.mubr.f32.mxu0 %v8058_v41  ;;  %v2254_v44 = vshra.s32 %v6206_v21, 16  ;;  %v1593_v48 = vshll.u32 %v1592_v38, 16 }
 0x34b   :  { %vm2437_vm7 = vcmp.eq.s32.totalorder %v5422_v32, %v1580_v29  ;;  %vm1463_vm8 = vcmp.le.f32.partialorder %v5809_v51, %v1386_v13  ;;  %v6220_v29 = vcvt.s32.f32 %v2240_v58 }
 0x34c   :  { %v4242_v39 = vsel %vm2437_vm7, 1.0, %v8058_v41  ;;  %4306 = vmatmul.mubr.msk.f32.gmra.mxu0 %vm2437_vm7, %v7797_v54  ;;  %v6223_v51 = vsel %vm1463_vm8, %v5422_v32, 128  ;;  %v6227_v14 = vcvt.s32.f32 %v2254_v44  ;;  %v1620_v44 = vcvt.f32.s32 %v5841_v4 }
 0x34d   :  { %v3472_v5 = vadd.f32 %v4242_v39, %v3471_v63  ;;  %1981 = vmin.xlane.f32.xlu0 %v1980_v17  ;;  %2229 = vmin.xlane.f32.xlu1 %v6209_v0  ;;  %v1994_v63 = vsel %vm1993_vm9, %v1989_v52, inf  ;;  %v2268_v38 = vshra.s32 %v6223_v51, 16  ;;  %v2015_v4 = vand.u32 65535, %v5838_v20 }
 0x34e   :  { %v1590_v56 = vpop.xlane.xlu1 %1589  ;;  %2709 = vmatprep.mubr.f32.mxu0 %v8058_v41 }
 0x34f   :  { %v1591_v6 = vcvt.f32.s32 %v1590_v56 }
 0x351   :  { %v1594_v13 = vadd.s32 %v1593_v48, %v1591_v6  ;;  %1995 = vmin.xlane.f32.xlu0 %v1994_v63  ;;  %2243 = vmin.xlane.f32.xlu1 %v6220_v29  ;;  %v6246_v6 = vcvt.s32.f32 %v2268_v38 }
 0x352   :  { %v1604_v39 = vpop.xlane.xlu0 %1603  ;;  %v1388_v17 = vpop.xlane.xlu1 %1387 }
 0x353   :  { %v1605_v12 = vcvt.f32.s32 %v1604_v39  ;;  %vm1464_vm10 = vcmp.le.f32.partialorder %v5827_v18, %v1388_v17  ;;  %vm2438_vm11 = vcmp.eq.s32.totalorder %v5422_v32, %v1594_v13  ;;  %v2003_v18 = vcvt.s32.f32 %v2001_v16 }
 0x354   :  { %v6233_v58 = vsel %vm1464_vm10, %v5422_v32, 128  ;;  %v4243_v56 = vsel %vm2438_vm11, 1.0, %v8058_v41  ;;  %4307 = vmatmul.mubr.msk.f32.gmra.mxu0 %vm2438_vm11, %v7797_v54  ;;  %v1634_v39 = vcvt.f32.s32 %v5847_v10 }
 0x355   :  { %v1608_v35 = vadd.s32 %v1607_v7, %v1605_v12  ;;  %v3473_v36 = vadd.f32 %v4243_v56, %v3472_v5  ;;  %2257 = vmin.xlane.f32.xlu1 %v6227_v14  ;;  %2715 = vmatprep.mubr.f32.mxu0 %v8058_v41  ;;  %v2282_v48 = vshra.s32 %v6233_v58, 16  ;;  %v1621_v7 = vshll.u32 %v1620_v44, 16 }
 0x356   :  { %v6240_v52 = vpop.xlane.xlu0 %2005 }
 0x357   :  { %vm2439_vm12 = vcmp.eq.s32.totalorder %v5422_v32, %v1608_v35  ;;  %vm2007_vm13 = vcmp.eq.f32.partialorder %v5835_v46, %v6240_v52  ;;  %v6254_v17 = vcvt.s32.f32 %v2282_v48  ;;  %v2017_v35 = vcvt.s32.f32 %v2015_v4  ;;  %v8060_v4 = vld [vmem:[#allocation173_spill] sm:$0xff] }
 0x358   :  { %v4244_v5 = vsel %vm2439_vm12, 1.0, %v8058_v41  ;;  %4308 = vmatmul.mubr.msk.f32.gmra.mxu0 %vm2439_vm12, %v7797_v54  ;;  %v2008_v63 = vsel %vm2007_vm13, %v2003_v18, inf }
 0x359   :  { %v3474_v13 = vadd.f32 %v4244_v5, %v3473_v36  ;;  %2009 = vmin.xlane.f32.xlu0 %v2008_v63  ;;  %2271 = vmin.xlane.f32.xlu1 %v6246_v6  ;;  %v1635_v36 = vshll.u32 %v1634_v39, 16  ;;  %v1648_v63 = vcvt.f32.s32 %v5864_v9 }
 0x35a   :  { %v1618_v16 = vpop.xlane.xlu1 %1617  ;;  %2721 = vmatprep.mubr.f32.mxu0 %v8058_v41 }
 0x35b   :  { %v1619_v46 = vcvt.f32.s32 %v1618_v16 }
 0x35d   :  { %v1622_v38 = vadd.s32 %v1621_v7, %v1619_v46  ;;  %2285 = vmin.xlane.f32.xlu1 %v6254_v17  ;;  %v1649_v46 = vshll.u32 %v1648_v63, 16 }
 0x35e   :  { %v1632_v12 = vpop.xlane.xlu0 %1631  ;;  %v6257_v56 = vpop.xlane.xlu1 %2019 }
 0x35f   :  { %v1633_v18 = vcvt.f32.s32 %v1632_v12  ;;  %vm2440_vm14 = vcmp.eq.s32.totalorder %v5422_v32, %v1622_v38  ;;  %vm2021_vm15 = vcmp.eq.f32.partialorder %v5852_v19, %v6257_v56  ;;  %v8061_v38 = vld [vmem:[#allocation175_spill] sm:$0xff] }
 0x360   :  { %v4245_v20 = vsel %vm2440_vm14, 1.0, %v8058_v41  ;;  %4309 = vmatmul.mubr.msk.f32.gmra.mxu0 %vm2440_vm14, %v7797_v54  ;;  %v2022_v10 = vsel %vm2021_vm15, %v2017_v35, inf  ;;  %v1662_v9 = vcvt.f32.s32 %v8061_v38 }
 0x361   :  { %v1636_v44 = vadd.s32 %v1635_v36, %v1633_v18  ;;  %v3475_v48 = vadd.f32 %v4245_v20, %v3474_v13  ;;  %2023 = vmin.xlane.f32.xlu0 %v2022_v10  ;;  %2727 = vmatprep.mubr.f32.mxu0 %v8058_v41  ;;  %v8062_v18 = vld [vmem:[#allocation174_spill] sm:$0xff] }
 0x362   :  { %v1390_v5 = vpop.xlane.xlu0 %1389  ;;  %v2029_v20 = vand.u32 65535, %v8062_v18 }
 0x363   :  { %vm1465_vm0 = vcmp.le.f32.partialorder %v8060_v4, %v1390_v5  ;;  %vm2441_vm1 = vcmp.eq.s32.totalorder %v5422_v32, %v1636_v44  ;;  %v1663_v5 = vshll.u32 %v1662_v9, 16 }
 0x364   :  { %v6269_v16 = vsel %vm1465_vm0, %v5422_v32, 128  ;;  %v4246_v19 = vsel %vm2441_vm1, 1.0, %v8058_v41  ;;  %4310 = vmatmul.mubr.msk.f32.gmra.mxu0 %vm2441_vm1, %v7797_v54  ;;  %v8063_v54 = vld [vmem:[#allocation176_spill] sm:$0xff]  ;;  %v2031_v9 = vcvt.s32.f32 %v2029_v20 }
 0x365   :  { %v2296_v7 = vshra.s32 %v6269_v16, 16  ;;  %v3476_v13 = vadd.f32 %v4246_v19, %v3475_v48  ;;  %2733 = vmatprep.mubr.f32.mxu0 %v8058_v41  ;;  %v8065_v19 = vmov 1.0  }
 0x366   :  { %v1646_v39 = vpop.xlane.xlu1 %1645 }
 0x367   :  { %v1647_v12 = vcvt.f32.s32 %v1646_v39  ;;  %v6276_v35 = vcvt.s32.f32 %v2296_v7 }
 0x369   :  { %v1650_v36 = vadd.s32 %v1649_v46, %v1647_v12  ;;  %2299 = vmin.xlane.f32.xlu1 %v6276_v35  ;;  %v8067_v12 = vld [vmem:[#allocation140_spill] sm:$0xff] }
 0x36a   :  { %v1660_v10 = vpop.xlane.xlu0 %1659  ;;  %v1392_v44 = vpop.xlane.xlu1 %1391 }
 0x36b   :  { %v1661_v4 = vcvt.f32.s32 %v1660_v10  ;;  %vm1466_vm2 = vcmp.le.f32.partialorder %v8063_v54, %v1392_v44  ;;  %vm2442_vm3 = vcmp.eq.s32.totalorder %v5422_v32, %v1650_v36  ;;  %v1676_v54 = vcvt.f32.s32 %v5892_v55  ;;  %v8068_v44 = vld [vmem:[#allocation177_spill] sm:$0xff] }
 0x36c   :  { %v6283_v48 = vsel %vm1466_vm2, %v5422_v32, 128  ;;  %v4247_v63 = vsel %vm2442_vm3, 1.0, %v8058_v41  ;;  %4311 = vmatmul.mubr.msk.f32.gmra.mxu0 %vm2442_vm3, %v8065_v19  ;;  %v2043_v20 = vand.u32 65535, %v8068_v44  ;;  %v8069_v44 = vld [vmem:[#allocation143_spill] sm:$0xff] }
 0x36d   :  { %8064 = vst [vmem:[#allocation162_spill] sm:$0xff] %v6283_v48  ;;  %v1664_v7 = vadd.s32 %v1663_v5, %v1661_v4  ;;  %v2310_v39 = vshra.s32 %v6283_v48, 16  ;;  %v3477_v46 = vadd.f32 %v4247_v63, %v3476_v13  ;;  %2739 = vmatprep.mubr.f32.mxu0 %v8058_v41  ;;  %v1677_v55 = vshll.u32 %v1676_v54, 16 }
 0x36e   :  { %v6289_v38 = vpop.xlane.xlu0 %2033  ;;  %v1690_v4 = vcvt.f32.s32 %v5897_v8 }
 0x36f   :  { %8066 = vst [vmem:[#allocation138_spill] sm:$0xff] %v6289_v38  ;;  %vm2443_vm4 = vcmp.eq.s32.totalorder %v5422_v32, %v1664_v7  ;;  %vm2035_vm5 = vcmp.eq.f32.partialorder %v8067_v12, %v6289_v38  ;;  %v6295_v36 = vcvt.s32.f32 %v2310_v39  ;;  %v2045_v38 = vcvt.s32.f32 %v2043_v20 }
 0x370   :  { %v4248_v18 = vsel %vm2443_vm4, 1.0, %v8058_v41  ;;  %4312 = vmatmul.mubr.msk.f32.gmra.mxu0 %vm2443_vm4, %v8065_v19  ;;  %v2036_v10 = vsel %vm2035_vm5, %v2031_v9, inf  ;;  %v1691_v48 = vshll.u32 %v1690_v4, 16  ;;  %v1704_v20 = vcvt.f32.s32 %v8069_v44 }
 0x371   :  { %v3478_v13 = vadd.f32 %v4248_v18, %v3477_v46  ;;  %2037 = vmin.xlane.f32.xlu0 %v2036_v10  ;;  %2313 = vmin.xlane.f32.xlu1 %v6295_v36 }
 0x372   :  { %v1674_v5 = vpop.xlane.xlu1 %1673  ;;  %2745 = vmatprep.mubr.f32.mxu0 %v8058_v41  ;;  %v1705_v4 = vshll.u32 %v1704_v20, 16 }
 0x373   :  { %v1675_v63 = vcvt.f32.s32 %v1674_v5  ;;  %v8070_v5 = vld [vmem:[#allocation142_spill] sm:$0xff] }
 0x375   :  { %v1678_v7 = vadd.s32 %v1677_v55, %v1675_v63  ;;  %v1718_v63 = vcvt.f32.s32 %v5922_v37 }
 0x376   :  { %v1688_v39 = vpop.xlane.xlu0 %1687  ;;  %v6303_v12 = vpop.xlane.xlu1 %2047 }
 0x377   :  { %v1689_v9 = vcvt.f32.s32 %v1688_v39  ;;  %vm2444_vm6 = vcmp.eq.s32.totalorder %v5422_v32, %v1678_v7  ;;  %vm2049_vm7 = vcmp.eq.f32.partialorder %v5902_v1, %v6303_v12  ;;  %v1719_v44 = vshll.u32 %v1718_v63, 16  ;;  %v8076_v63 = vld [vmem:[#allocation149_spill] sm:$0xff] }
 0x378   :  { %v4249_v46 = vsel %vm2444_vm6, 1.0, %v8058_v41  ;;  %4313 = vmatmul.mubr.msk.f32.gmra.mxu0 %vm2444_vm6, %v8065_v19  ;;  %v2050_v54 = vsel %vm2049_vm7, %v2045_v38, inf }
 0x379   :  { %v1692_v18 = vadd.s32 %v1691_v48, %v1689_v9  ;;  %v3479_v8 = vadd.f32 %v4249_v46, %v3478_v13  ;;  %2051 = vmin.xlane.f32.xlu0 %v2050_v54  ;;  %2751 = vmatprep.mubr.f32.mxu0 %v8058_v41  ;;  %v8072_v46 = vld [vmem:[#allocation145_spill] sm:$0xff] }
 0x37a   :  { %v1394_v10 = vpop.xlane.xlu0 %1393  ;;  %v2057_v54 = vand.u32 65535, %v8072_v46 }
 0x37b   :  { %vm1467_vm8 = vcmp.le.f32.partialorder %v8070_v5, %v1394_v10  ;;  %vm2445_vm9 = vcmp.eq.s32.totalorder %v5422_v32, %v1692_v18 }
 0x37c   :  { %v6315_v55 = vsel %vm1467_vm8, %v5422_v32, 128  ;;  %v4250_v1 = vsel %vm2445_vm9, 1.0, %v8058_v41  ;;  %4314 = vmatmul.mubr.msk.f32.gmra.mxu0 %vm2445_vm9, %v8065_v19 }
 0x37d   :  { %8071 = vst [vmem:[#allocation165_spill] sm:$0xff] %v6315_v55  ;;  %v2324_v48 = vshra.s32 %v6315_v55, 16  ;;  %v3480_v38 = vadd.f32 %v4250_v1, %v3479_v8  ;;  %2757 = vmatprep.mubr.f32.mxu0 %v8058_v41  ;;  %v8073_v55 = vld [vmem:[#allocation146_spill] sm:$0xff] }
 0x37e   :  { %v1702_v13 = vpop.xlane.xlu1 %1701 }
 0x37f   :  { %v1703_v7 = vcvt.f32.s32 %v1702_v13  ;;  %v6322_v39 = vcvt.s32.f32 %v2324_v48 }
 0x381   :  { %v1706_v9 = vadd.s32 %v1705_v4, %v1703_v7  ;;  %2327 = vmin.xlane.f32.xlu1 %v6322_v39  ;;  %v2059_v4 = vcvt.s32.f32 %v2057_v54  ;;  %v8077_v7 = vld [vmem:[#allocation131_spill] sm:$0xff] }
 0x382   :  { %v1716_v18 = vpop.xlane.xlu0 %1715  ;;  %v1396_v10 = vpop.xlane.xlu1 %1395 }
 0x383   :  { %v1717_v5 = vcvt.f32.s32 %v1716_v18  ;;  %vm1468_vm10 = vcmp.le.f32.partialorder %v8073_v55, %v1396_v10  ;;  %vm2446_vm11 = vcmp.eq.s32.totalorder %v5422_v32, %v1706_v9  ;;  %v1732_v55 = vcvt.f32.s32 %v8076_v63  ;;  %v8078_v10 = vld [vmem:[#allocation148_spill] sm:$0xff] }
 0x384   :  { %v6329_v8 = vsel %vm1468_vm10, %v5422_v32, 128  ;;  %v4251_v37 = vsel %vm2446_vm11, 1.0, %v8058_v41  ;;  %4315 = vmatmul.mubr.msk.f32.gmra.mxu0 %vm2446_vm11, %v8065_v19  ;;  %v2071_v54 = vand.u32 65535, %v8078_v10 }
 0x385   :  { %8074 = vst [vmem:[#allocation147_spill] sm:$0xff] %v6329_v8  ;;  %v1720_v20 = vadd.s32 %v1719_v44, %v1717_v5  ;;  %v2338_v1 = vshra.s32 %v6329_v8, 16  ;;  %v3481_v48 = vadd.f32 %v4251_v37, %v3480_v38  ;;  %2763 = vmatprep.mubr.f32.mxu0 %v8058_v41  ;;  %v1733_v5 = vshll.u32 %v1732_v55, 16 }
 0x386   :  { %v6335_v13 = vpop.xlane.xlu0 %2061  ;;  %v1746_v37 = vcvt.f32.s32 %v5952_v47 }
 0x387   :  { %8075 = vst [vmem:[#allocation166_spill] sm:$0xff] %v6335_v13  ;;  %vm2447_vm12 = vcmp.eq.s32.totalorder %v5422_v32, %v1720_v20  ;;  %vm2063_vm13 = vcmp.eq.f32.partialorder %v8077_v7, %v6335_v13  ;;  %v6341_v9 = vcvt.s32.f32 %v2338_v1  ;;  %v2073_v13 = vcvt.s32.f32 %v2071_v54 }
 0x388   :  { %v4252_v46 = vsel %vm2447_vm12, 1.0, %v8058_v41  ;;  %4316 = vmatmul.mubr.msk.f32.gmra.mxu0 %vm2447_vm12, %v8065_v19  ;;  %v2064_v18 = vsel %vm2063_vm13, %v2059_v4, inf  ;;  %v1747_v8 = vshll.u32 %v1746_v37, 16 }
 0x389   :  { %v3482_v38 = vadd.f32 %v4252_v46, %v3481_v48  ;;  %2065 = vmin.xlane.f32.xlu0 %v2064_v18  ;;  %2341 = vmin.xlane.f32.xlu1 %v6341_v9  ;;  %v8080_v48 = vld [vmem:[#allocation132_spill] sm:$0xff] }
 0x38a   :  { %v1730_v44 = vpop.xlane.xlu1 %1729  ;;  %2769 = vmatprep.mubr.f32.mxu0 %v8058_v41 }
 0x38b   :  { %v1731_v20 = vcvt.f32.s32 %v1730_v44  ;;  %v8081_v44 = vld [vmem:[#allocation156_spill] sm:$0xff] }
 0x38c   :  { %v1760_v54 = vcvt.f32.s32 %v8081_v44 }
 0x38d   :  { %v1734_v1 = vadd.s32 %v1733_v5, %v1731_v20  ;;  %v8082_v5 = vld [vmem:[#allocation150_spill] sm:$0xff] }
 0x38e   :  { %v1744_v63 = vpop.xlane.xlu0 %1743  ;;  %v6349_v7 = vpop.xlane.xlu1 %2075 }
 0x38f   :  { %8079 = vst [vmem:[#allocation167_spill] sm:$0xff] %v6349_v7  ;;  %v1745_v4 = vcvt.f32.s32 %v1744_v63  ;;  %vm2448_vm14 = vcmp.eq.s32.totalorder %v5422_v32, %v1734_v1  ;;  %vm2077_vm15 = vcmp.eq.f32.partialorder %v8080_v48, %v6349_v7 }
 0x390   :  { %v4253_v46 = vsel %vm2448_vm14, 1.0, %v8058_v41  ;;  %4317 = vmatmul.mubr.msk.f32.gmra.mxu0 %vm2448_vm14, %v8065_v19  ;;  %v2078_v55 = vsel %vm2077_vm15, %v2073_v13, inf }
 0x391   :  { %v1748_v18 = vadd.s32 %v1747_v8, %v1745_v4  ;;  %v3483_v47 = vadd.f32 %v4253_v46, %v3482_v38  ;;  %2079 = vmin.xlane.f32.xlu0 %v2078_v55  ;;  %2775 = vmatprep.mubr.f32.mxu0 %v8058_v41  ;;  %v8084_v38 = vld [vmem:[#allocation135_spill] sm:$0xff]  ;;  %v1761_v4 = vshll.u32 %v1760_v54, 16 }
 0x392   :  { %v1398_v10 = vpop.xlane.xlu0 %1397  ;;  %v1774_v1 = vcvt.f32.s32 %v8084_v38 }
 0x393   :  { %vm1469_vm0 = vcmp.le.f32.partialorder %v8082_v5, %v1398_v10  ;;  %vm2449_vm1 = vcmp.eq.s32.totalorder %v5422_v32, %v1748_v18  ;;  %v8085_v18 = vld [vmem:[#allocation133_spill] sm:$0xff] }
 0x394   :  { %v6361_v37 = vsel %vm1469_vm0, %v5422_v32, 128  ;;  %v4254_v20 = vsel %vm2449_vm1, 1.0, %v8058_v41  ;;  %4318 = vmatmul.mubr.msk.f32.gmra.mxu0 %vm2449_vm1, %v8065_v19  ;;  %v2085_v10 = vand.u32 65535, %v8085_v18  ;;  %v1775_v44 = vshll.u32 %v1774_v1, 16 }
 0x395   :  { %8083 = vst [vmem:[#allocation139_spill] sm:$0xff] %v6361_v37  ;;  %v2352_v8 = vshra.s32 %v6361_v37, 16  ;;  %v3484_v13 = vadd.f32 %v4254_v20, %v3483_v47  ;;  %2781 = vmatprep.mubr.f32.mxu0 %v8058_v41  ;;  %v1788_v37 = vcvt.f32.s32 %v6001_v40  ;;  %v8086_v20 = vld [vmem:[#allocation160_spill] sm:$0xff] }
 0x396   :  { %v1758_v63 = vpop.xlane.xlu1 %1757  ;;  %v2087_v18 = vcvt.s32.f32 %v2085_v10 }
 0x397   :  { %v1759_v48 = vcvt.f32.s32 %v1758_v63  ;;  %v6368_v46 = vcvt.s32.f32 %v2352_v8 }
 0x399   :  { %v1762_v55 = vadd.s32 %v1761_v4, %v1759_v48  ;;  %2355 = vmin.xlane.f32.xlu1 %v6368_v46  ;;  %v8087_v4 = vld [vmem:[#allocation178_spill] sm:$0xff]  ;;  %v1802_v48 = vcvt.f32.s32 %v5999_v25 }
 0x39a   :  { %v1772_v5 = vpop.xlane.xlu0 %1771  ;;  %v1400_v7 = vpop.xlane.xlu1 %1399  ;;  %v2099_v40 = vand.u32 65535, %v8087_v4 }
 0x39b   :  { %v1773_v47 = vcvt.f32.s32 %v1772_v5  ;;  %vm1470_vm2 = vcmp.le.f32.partialorder %v8086_v20, %v1400_v7  ;;  %vm2450_vm3 = vcmp.eq.s32.totalorder %v5422_v32, %v1762_v55  ;;  %v1789_v5 = vshll.u32 %v1788_v37, 16 }
 0x39c   :  { %v6376_v54 = vsel %vm1470_vm2, %v5422_v32, 128  ;;  %v4255_v8 = vsel %vm2450_vm3, 1.0, %v8058_v41  ;;  %4319 = vmatmul.mubr.msk.f32.gmra.mxu0 %vm2450_vm3, %v8065_v19  ;;  %v1803_v10 = vshll.u32 %v1802_v48, 16  ;;  %v2101_v4 = vcvt.s32.f32 %v2099_v40 }
 0x39d   :  { %v1776_v38 = vadd.s32 %v1775_v44, %v1773_v47  ;;  %v2366_v63 = vshra.s32 %v6376_v54, 16  ;;  %v3485_v1 = vadd.f32 %v4255_v8, %v3484_v13  ;;  %2787 = vmatprep.mubr.f32.mxu0 %v8058_v41  ;;  %v1830_v40 = vcvt.f32.s32 %v6023_v27  ;;  %v8088_v27 = vld [vmem:[#allocation151_spill] sm:$0xff] }
 0x39e   :  { %v6384_v7 = vpop.xlane.xlu0 %2089  ;;  %v1786_v55 = vpop.xlane.xlu1 %1785 }
 0x39f   :  { %v1787_v20 = vcvt.f32.s32 %v1786_v55  ;;  %vm2451_vm4 = vcmp.eq.s32.totalorder %v5422_v32, %v1776_v38  ;;  %vm2091_vm5 = vcmp.eq.f32.partialorder %v6004_v34, %v6384_v7  ;;  %v6391_v47 = vcvt.s32.f32 %v2366_v63 }
 0x3a0   :  { %v4256_v44 = vsel %vm2451_vm4, 1.0, %v8058_v41  ;;  %4320 = vmatmul.mubr.msk.f32.gmra.mxu0 %vm2451_vm4, %v8065_v19  ;;  %v2092_v13 = vsel %vm2091_vm5, %v2087_v18, inf  ;;  %v1816_v34 = vcvt.f32.s32 %v6012_v59 }
 0x3a1   :  { %v1790_v8 = vadd.s32 %v1789_v5, %v1787_v20  ;;  %v3486_v25 = vadd.f32 %v4256_v44, %v3485_v1  ;;  %2093 = vmin.xlane.f32.xlu0 %v2092_v13  ;;  %2793 = vmatprep.mubr.f32.mxu0 %v8058_v41 }
 0x3a2   :  { %2369 = vmin.xlane.f32.xlu1 %v6391_v47  ;;  %v1800_v37 = vpop.xlane.xlu0 %1799  ;;  %v6395_v38 = vpop.xlane.xlu1 %2103  ;;  %v1817_v20 = vshll.u32 %v1816_v34, 16  ;;  %v8089_v34 = vld [vmem:[#allocation153_spill] sm:$0xff] }
 0x3a3   :  { %v1801_v55 = vcvt.f32.s32 %v1800_v37  ;;  %vm2452_vm6 = vcmp.eq.s32.totalorder %v5422_v32, %v1790_v8  ;;  %vm2105_vm7 = vcmp.eq.f32.partialorder %v6015_v62, %v6395_v38  ;;  %v2113_v37 = vand.u32 65535, %v8088_v27 }
 0x3a4   :  { %v4257_v63 = vsel %vm2452_vm6, 1.0, %v8058_v41  ;;  %4321 = vmatmul.mubr.msk.f32.gmra.mxu0 %vm2452_vm6, %v8065_v19  ;;  %v2106_v1 = vsel %vm2105_vm7, %v2101_v4, inf  ;;  %v1831_v4 = vshll.u32 %v1830_v40, 16 }
 0x3a5   :  { %v1804_v48 = vadd.s32 %v1803_v10, %v1801_v55  ;;  %v3487_v18 = vadd.f32 %v4257_v63, %v3486_v25  ;;  %2107 = vmin.xlane.f32.xlu0 %v2106_v1  ;;  %2799 = vmatprep.mubr.f32.mxu0 %v8058_v41 }
 0x3a6   :  { %v1814_v5 = vpop.xlane.xlu1 %1813  ;;  %v1402_v59 = vpop.xlane.xlu0 %1401 }
 0x3a7   :  { %v1815_v44 = vcvt.f32.s32 %v1814_v5  ;;  %vm1471_vm8 = vcmp.le.f32.partialorder %v6026_v53, %v1402_v59  ;;  %vm2453_vm9 = vcmp.eq.s32.totalorder %v5422_v32, %v1804_v48  ;;  %v1844_v53 = vcvt.f32.s32 %v8089_v34  ;;  %v8090_v48 = vld [vmem:[#allocation134_spill] sm:$0xff] }
 0x3a8   :  { %v6408_v62 = vsel %vm1471_vm8, %v5422_v32, 128  ;;  %v4258_v13 = vsel %vm2453_vm9, 1.0, %v8058_v41  ;;  %4322 = vmatmul.mubr.msk.f32.gmra.mxu0 %vm2453_vm9, %v8065_v19  ;;  %v2115_v34 = vcvt.s32.f32 %v2113_v37 }
 0x3a9   :  { %v1818_v8 = vadd.s32 %v1817_v20, %v1815_v44  ;;  %v2380_v25 = vshra.s32 %v6408_v62, 16  ;;  %v3488_v10 = vadd.f32 %v4258_v13, %v3487_v18  ;;  %2805 = vmatprep.mubr.f32.mxu0 %v8058_v41  ;;  %v2127_v13 = vand.u32 65535, %v6045_v22 }
 0x3aa   :  { %v1828_v55 = vpop.xlane.xlu0 %1827  ;;  %v1404_v63 = vpop.xlane.xlu1 %1403 }
 0x3ab   :  { %v1829_v1 = vcvt.f32.s32 %v1828_v55  ;;  %vm1472_vm10 = vcmp.le.f32.partialorder %v8090_v48, %v1404_v63  ;;  %vm2454_vm11 = vcmp.eq.s32.totalorder %v5422_v32, %v1818_v8  ;;  %v6418_v5 = vcvt.s32.f32 %v2380_v25 }
 0x3ac   :  { %v6421_v59 = vsel %vm1472_vm10, %v5422_v32, 128  ;;  %v4259_v18 = vsel %vm2454_vm11, 1.0, %v8058_v41  ;;  %4323 = vmatmul.mubr.msk.f32.gmra.mxu0 %vm2454_vm11, %v8065_v19  ;;  %v1858_v8 = vcvt.f32.s32 %v6051_v11  ;;  %v1845_v55 = vshll.u32 %v1844_v53, 16 }
 0x3ad   :  { %v1832_v20 = vadd.s32 %v1831_v4, %v1829_v1  ;;  %v2394_v40 = vshra.s32 %v6421_v59, 16  ;;  %v3489_v44 = vadd.f32 %v4259_v18, %v3488_v10  ;;  %2383 = vmin.xlane.f32.xlu1 %v6418_v5  ;;  %2811 = vmatprep.mubr.f32.mxu0 %v8058_v41  ;;  %v2129_v18 = vcvt.s32.f32 %v2127_v13 }
 0x3ae   :  { %v6430_v25 = vpop.xlane.xlu0 %2117  ;;  %v1842_v27 = vpop.xlane.xlu1 %1841  ;;  %v1859_v37 = vshll.u32 %v1858_v8, 16  ;;  %v1886_v13 = vcvt.f32.s32 %v6071_v49  ;;  %v8091_v49 = vld [vmem:[#allocation154_spill] sm:$0xff] }
 0x3af   :  { %v1843_v63 = vcvt.f32.s32 %v1842_v27  ;;  %vm2455_vm12 = vcmp.eq.s32.totalorder %v5422_v32, %v1832_v20  ;;  %vm2119_vm13 = vcmp.eq.f32.partialorder %v6054_v15, %v6430_v25  ;;  %v6437_v1 = vcvt.s32.f32 %v2394_v40 }
 0x3b0   :  { %v4260_v10 = vsel %vm2455_vm12, 1.0, %v8058_v41  ;;  %4324 = vmatmul.mubr.msk.f32.gmra.mxu0 %vm2455_vm12, %v8065_v19  ;;  %v2120_v4 = vsel %vm2119_vm13, %v2115_v34, inf  ;;  %v1872_v15 = vcvt.f32.s32 %v6060_v42 }
 0x3b1   :  { %v1846_v22 = vadd.s32 %v1845_v55, %v1843_v63  ;;  %v3490_v11 = vadd.f32 %v4260_v10, %v3489_v44  ;;  %2121 = vmin.xlane.f32.xlu0 %v2120_v4  ;;  %2817 = vmatprep.mubr.f32.mxu0 %v8058_v41 }
 0x3b2   :  { %2397 = vmin.xlane.f32.xlu1 %v6437_v1  ;;  %v1856_v53 = vpop.xlane.xlu0 %1855  ;;  %v6441_v48 = vpop.xlane.xlu1 %2131  ;;  %v1873_v55 = vshll.u32 %v1872_v15, 16 }
 0x3b3   :  { %v1857_v20 = vcvt.f32.s32 %v1856_v53  ;;  %vm2456_vm14 = vcmp.eq.s32.totalorder %v5422_v32, %v1846_v22  ;;  %vm2133_vm15 = vcmp.eq.f32.partialorder %v6063_v50, %v6441_v48 }
 0x3b4   :  { %v4261_v40 = vsel %vm2456_vm14, 1.0, %v8058_v41  ;;  %4325 = vmatmul.mubr.msk.f32.gmra.mxu0 %vm2456_vm14, %v8065_v19  ;;  %v2134_v44 = vsel %vm2133_vm15, %v2129_v18, inf }
 0x3b5   :  { %v1860_v8 = vadd.s32 %v1859_v37, %v1857_v20  ;;  %v3491_v27 = vadd.f32 %v4261_v40, %v3490_v11  ;;  %2135 = vmin.xlane.f32.xlu0 %v2134_v44  ;;  %2823 = vmatprep.mubr.f32.mxu0 %v8058_v41  ;;  %v2141_v37 = vand.u32 65535, %v8091_v49  ;;  %v8093_v40 = vld [vmem:[#allocation164_spill] sm:$0xff] }
 0x3b6   :  { %v1870_v34 = vpop.xlane.xlu1 %1869  ;;  %v1406_v42 = vpop.xlane.xlu0 %1405  ;;  %v1900_v44 = vcvt.f32.s32 %v8093_v40 }
 0x3b7   :  { %v1871_v63 = vcvt.f32.s32 %v1870_v34  ;;  %vm1473_vm0 = vcmp.le.f32.partialorder %v6074_v61, %v1406_v42  ;;  %vm2457_vm1 = vcmp.eq.s32.totalorder %v5422_v32, %v1860_v8  ;;  %v1887_v61 = vshll.u32 %v1886_v13, 16  ;;  %v8094_v13 = vld [vmem:[#allocation137_spill] sm:$0xff] }
 0x3b8   :  { %v6454_v50 = vsel %vm1473_vm0, %v5422_v32, 128  ;;  %v4262_v10 = vsel %vm2457_vm1, 1.0, %v8058_v41  ;;  %4326 = vmatmul.mubr.msk.f32.gmra.mxu0 %vm2457_vm1, %v8065_v19 }
 0x3b9   :  { %v1874_v4 = vadd.s32 %v1873_v55, %v1871_v63  ;;  %v2408_v22 = vshra.s32 %v6454_v50, 16  ;;  %v3492_v11 = vadd.f32 %v4262_v10, %v3491_v27  ;;  %2829 = vmatprep.mubr.f32.mxu0 %v8058_v41  ;;  %v2155_v55 = vand.u32 65535, %v8094_v13 }
 0x3ba   :  { %v1884_v53 = vpop.xlane.xlu0 %1883  ;;  %v1408_v18 = vpop.xlane.xlu1 %1407 }
 0x3bb   :  { %v6461_v15 = vcvt.s32.f32 %v2408_v22  ;;  %v1885_v20 = vcvt.f32.s32 %v1884_v53  ;;  %vm1474_vm2 = vcmp.le.f32.partialorder %v6089_v57, %v1408_v18  ;;  %vm2458_vm3 = vcmp.eq.s32.totalorder %v5422_v32, %v1874_v4  ;;  %v8095_v53 = vld [vmem:[#allocation155_spill] sm:$0xff] }
 0x3bc   :  { %v6466_v8 = vsel %vm1474_vm2, %v5422_v32, 128  ;;  %v4263_v42 = vsel %vm2458_vm3, 1.0, %v8058_v41  ;;  %4327 = vmatmul.mubr.msk.f32.gmra.mxu0 %vm2458_vm3, %v8065_v19  ;;  %v2143_v22 = vcvt.s32.f32 %v2141_v37  ;;  %v1914_v4 = vcvt.f32.s32 %v6095_v23 }
 0x3bd   :  { %8092 = vst [vmem:[#allocation168_spill] sm:$0xff] %v6461_v15  ;;  %v1888_v27 = vadd.s32 %v1887_v61, %v1885_v20  ;;  %v2422_v34 = vshra.s32 %v6466_v8, 16  ;;  %2411 = vmin.xlane.f32.xlu1 %v6461_v15  ;;  %v3493_v63 = vadd.f32 %v4263_v42, %v3492_v11  ;;  %2835 = vmatprep.mubr.f32.mxu0 %v8058_v41  ;;  %v1901_v18 = vshll.u32 %v1900_v44, 16  ;;  %v8096_v42 = vld [vmem:[#allocation163_spill] sm:$0xff] }
 0x3be   :  { %v6474_v57 = vpop.xlane.xlu0 %2145  ;;  %v1898_v10 = vpop.xlane.xlu1 %1897  ;;  %v2169_v37 = vand.u32 65535, %v8096_v42  ;;  %v1915_v44 = vshll.u32 %v1914_v4, 16 }
 0x3bf   :  { %vm2459_vm4 = vcmp.eq.s32.totalorder %v5422_v32, %v1888_v27  ;;  %v6479_v49 = vcvt.s32.f32 %v2422_v34  ;;  %vm2147_vm5 = vcmp.eq.f32.partialorder %v8095_v53, %v6474_v57  ;;  %v1899_v20 = vcvt.f32.s32 %v1898_v10  ;;  %v8097_v53 = vld [vmem:[#allocation158_spill] sm:$0xff] }
 0x3c0   :  { %v4264_v61 = vsel %vm2459_vm4, 1.0, %v8058_v41  ;;  %v2148_v11 = vsel %vm2147_vm5, %v2143_v22, inf  ;;  %4328 = vmatmul.mubr.msk.f32.gmra.mxu0 %vm2459_vm4, %v8065_v19  ;;  %v2157_v34 = vcvt.s32.f32 %v2155_v55  ;;  %v1928_v15 = vcvt.f32.s32 %v8097_v53 }
 0x3c1   :  { %v3494_v40 = vadd.f32 %v4264_v61, %v3493_v63  ;;  %2149 = vmin.xlane.f32.xlu0 %v2148_v11  ;;  %v1902_v13 = vadd.s32 %v1901_v18, %v1899_v20  ;;  %2425 = vmin.xlane.f32.xlu1 %v6479_v49  ;;  %v8098_v63 = vld [vmem:[#allocation159_spill] sm:$0xff]  ;;  %v8099_v20 = vld [vmem:[#allocation136_spill] sm:$0xff]  ;;  %v1942_v55 = vcvt.f32.s32 %v6109_v60  ;;  %v2197_v60 = vand.u32 65535, %v6137_v43 }
 0x3c2   :  { %v1912_v23 = vpop.xlane.xlu0 %1911  ;;  %v6487_v27 = vpop.xlane.xlu1 %2159  ;;  %2841 = vmatprep.mubr.f32.mxu0 %v8058_v41  ;;  %v2183_v11 = vand.u32 65535, %v8099_v20  ;;  %v8100_v20 = vld [vmem:[#allocation161_spill] sm:$0xff] }
 0x3c3   :  { %v1913_v10 = vcvt.f32.s32 %v1912_v23  ;;  %vm2161_vm6 = vcmp.eq.f32.partialorder %v8098_v63, %v6487_v27  ;;  %vm2460_vm7 = vcmp.eq.s32.totalorder %v5422_v32, %v1902_v13  ;;  %v2171_v23 = vcvt.s32.f32 %v2169_v37 }
 0x3c4   :  { %v2162_v22 = vsel %vm2161_vm6, %v2157_v34, inf  ;;  %v4265_v18 = vsel %vm2460_vm7, 1.0, %v8058_v41  ;;  %4329 = vmatmul.mubr.msk.f32.gmra.mxu0 %vm2460_vm7, %v8065_v19  ;;  %v1929_v63 = vshll.u32 %v1928_v15, 16  ;;  %v2185_v15 = vcvt.s32.f32 %v2183_v11 }
 0x3c5   :  { %v1916_v61 = vadd.s32 %v1915_v44, %v1913_v10  ;;  %2163 = vmin.xlane.f32.xlu0 %v2162_v22  ;;  %v3495_v4 = vadd.f32 %v4265_v18, %v3494_v40  ;;  %2847 = vmatprep.mubr.f32.mxu0 %v8058_v41  ;;  %v1943_v40 = vshll.u32 %v1942_v55, 16  ;;  %v8101_v55 = vld [vmem:[#allocation141_spill] sm:$0xff]  ;;  %v1970_v11 = vcvt.f32.s32 %v6127_v3 }
 0x3c6   :  { %v1926_v42 = vpop.xlane.xlu0 %1925  ;;  %v6498_v53 = vpop.xlane.xlu1 %2173  ;;  %v2225_v3 = vand.u32 65535, %v6167_v45 }
 0x3c7   :  { %vm2461_vm8 = vcmp.eq.s32.totalorder %v5422_v32, %v1916_v61  ;;  %v1927_v13 = vcvt.f32.s32 %v1926_v42  ;;  %vm2175_vm9 = vcmp.eq.f32.partialorder %v6140_v24, %v6498_v53  ;;  %v1956_v61 = vcvt.f32.s32 %v6133_v28 }
 0x3c8   :  { %v4266_v34 = vsel %vm2461_vm8, 1.0, %v8058_v41  ;;  %v2176_v44 = vsel %vm2175_vm9, %v2171_v23, inf  ;;  %4330 = vmatmul.mubr.msk.f32.gmra.mxu0 %vm2461_vm8, %v8065_v19 }
 0x3c9   :  { %v3496_v10 = vadd.f32 %v4266_v34, %v3495_v4  ;;  %v1930_v22 = vadd.s32 %v1929_v63, %v1927_v13  ;;  %2177 = vmin.xlane.f32.xlu0 %v2176_v44  ;;  %2853 = vmatprep.mubr.f32.mxu0 %v8058_v41  ;;  %v2211_v63 = vand.u32 65535, %v8101_v55  ;;  %v2199_v34 = vcvt.s32.f32 %v2197_v60 }
 0x3ca   :  { %v1940_v18 = vpop.xlane.xlu0 %1939  ;;  %v6507_v37 = vpop.xlane.xlu1 %2187  ;;  %v1957_v44 = vshll.u32 %v1956_v61, 16 }
 0x3cb   :  { %vm2462_vm10 = vcmp.eq.s32.totalorder %v5422_v32, %v1930_v22  ;;  %v1941_v24 = vcvt.f32.s32 %v1940_v18  ;;  %vm2189_vm11 = vcmp.eq.f32.partialorder %v8100_v20, %v6507_v37  ;;  %v2213_v20 = vcvt.s32.f32 %v2211_v63 }
 0x3cc   :  { %v4267_v4 = vsel %vm2462_vm10, 1.0, %v8058_v41  ;;  %v2190_v42 = vsel %vm2189_vm11, %v2185_v15, inf  ;;  %4331 = vmatmul.mubr.msk.f32.gmra.mxu0 %vm2462_vm10, %v8065_v19 }
 0x3cd   :  { %v3497_v23 = vadd.f32 %v4267_v4, %v3496_v10  ;;  %v1944_v43 = vadd.s32 %v1943_v40, %v1941_v24  ;;  %2191 = vmin.xlane.f32.xlu0 %v2190_v42  ;;  %2859 = vmatprep.mubr.f32.mxu0 %v8058_v41  ;;  %v1984_v24 = vcvt.f32.s32 %v6162_v2  ;;  %v1971_v4 = vshll.u32 %v1970_v11, 16 }
 0x3ce   :  { %v1954_v13 = vpop.xlane.xlu0 %1953  ;;  %v6518_v28 = vpop.xlane.xlu1 %2201  ;;  %v2239_v2 = vand.u32 65535, %v6183_v30  ;;  %v2227_v11 = vcvt.s32.f32 %v2225_v3 }
 0x3cf   :  { %vm2463_vm12 = vcmp.eq.s32.totalorder %v5422_v32, %v1944_v43  ;;  %v1955_v22 = vcvt.f32.s32 %v1954_v13  ;;  %vm2203_vm13 = vcmp.eq.f32.partialorder %v6164_v33, %v6518_v28  ;;  %v1985_v55 = vshll.u32 %v1984_v24, 16 }
 0x3d0   :  { %v4268_v10 = vsel %vm2463_vm12, 1.0, %v8058_v41  ;;  %v2204_v40 = vsel %vm2203_vm13, %v2199_v34, inf  ;;  %4332 = vmatmul.mubr.msk.f32.gmra.mxu0 %vm2463_vm12, %v8065_v19  ;;  %v1998_v34 = vcvt.f32.s32 %v6199_v31  ;;  %v2241_v31 = vcvt.s32.f32 %v2239_v2 }
 0x3d1   :  { %v3498_v18 = vadd.f32 %v4268_v10, %v3497_v23  ;;  %v1958_v15 = vadd.s32 %v1957_v44, %v1955_v22  ;;  %2205 = vmin.xlane.f32.xlu1 %v2204_v40  ;;  %2865 = vmatprep.mubr.f32.mxu0 %v8058_v41  ;;  %v2253_v40 = vand.u32 65535, %v6206_v21  ;;  %v2267_v21 = vand.u32 65535, %v6223_v51 }
 0x3d2   :  { %v1968_v60 = vpop.xlane.xlu0 %1967  ;;  %v6528_v61 = vpop.xlane.xlu1 %2215  ;;  %v1999_v3 = vshll.u32 %v1998_v34, 16  ;;  %v2281_v51 = vand.u32 65535, %v6233_v58 }
 0x3d3   :  { %vm2464_vm14 = vcmp.eq.s32.totalorder %v5422_v32, %v1958_v15  ;;  %v1969_v33 = vcvt.f32.s32 %v1968_v60  ;;  %vm2217_vm15 = vcmp.eq.f32.partialorder %v6186_v26, %v6528_v61 }
 0x3d4   :  { %v4269_v42 = vsel %vm2464_vm14, 1.0, %v8058_v41  ;;  %v2218_v23 = vsel %vm2217_vm15, %v2213_v20, inf  ;;  %4333 = vmatmul.mubr.msk.f32.gmra.mxu0 %vm2464_vm14, %v8065_v19 }
 0x3d5   :  { %v3499_v43 = vadd.f32 %v4269_v42, %v3498_v18  ;;  %v1972_v45 = vadd.s32 %v1971_v4, %v1969_v33  ;;  %2219 = vmin.xlane.f32.xlu0 %v2218_v23  ;;  %2871 = vmatprep.mubr.f32.mxu0 %v8058_v41  ;;  %v2255_v42 = vcvt.s32.f32 %v2253_v40  ;;  %v2012_v23 = vcvt.f32.s32 %v6240_v52 }
 0x3d6   :  { %v1982_v13 = vpop.xlane.xlu0 %1981  ;;  %v6537_v63 = vpop.xlane.xlu1 %2229 }
 0x3d7   :  { %vm2465_vm0 = vcmp.eq.s32.totalorder %v5422_v32, %v1972_v45  ;;  %v1983_v26 = vcvt.f32.s32 %v1982_v13  ;;  %vm2231_vm1 = vcmp.eq.f32.partialorder %v6209_v0, %v6537_v63  ;;  %v2269_v13 = vcvt.s32.f32 %v2267_v21 }
 0x3d8   :  { %v4270_v44 = vsel %vm2465_vm0, 1.0, %v8058_v41  ;;  %v2232_v22 = vsel %vm2231_vm1, %v2227_v11, inf  ;;  %4334 = vmatmul.mubr.msk.f32.gmra.mxu0 %vm2465_vm0, %v8065_v19  ;;  %v2013_v52 = vshll.u32 %v2012_v23, 16 }
 0x3d9   :  { %v3500_v10 = vadd.f32 %v4270_v44, %v3499_v43  ;;  %v1986_v30 = vadd.s32 %v1985_v55, %v1983_v26  ;;  %2233 = vmin.xlane.f32.xlu1 %v2232_v22  ;;  %2877 = vmatprep.mubr.f32.mxu0 %v8058_v41  ;;  %v2283_v44 = vcvt.s32.f32 %v2281_v51  ;;  %v2026_v22 = vcvt.f32.s32 %v6257_v56 }
 0x3da   :  { %v1996_v18 = vpop.xlane.xlu0 %1995  ;;  %v6547_v15 = vpop.xlane.xlu1 %2243  ;;  %v2295_v56 = vand.u32 65535, %v6269_v16  ;;  %v8103_v16 = vld [vmem:[#allocation138_spill] sm:$0xff] }
 0x3db   :  { %vm2466_vm2 = vcmp.eq.s32.totalorder %v5422_v32, %v1986_v30  ;;  %v1997_v0 = vcvt.f32.s32 %v1996_v18  ;;  %vm2245_vm3 = vcmp.eq.f32.partialorder %v6220_v29, %v6547_v15  ;;  %v2027_v40 = vshll.u32 %v2026_v22, 16  ;;  %v8104_v22 = vld [vmem:[#allocation3_spill] sm:$0xff] }
 0x3dc   :  { %v4271_v24 = vsel %vm2466_vm2, 1.0, %v8058_v41  ;;  %v2246_v60 = vsel %vm2245_vm3, %v2241_v31, inf  ;;  %4335 = vmatmul.mubr.msk.f32.gmra.mxu0 %vm2466_vm2, %v8065_v19  ;;  %v2040_v21 = vcvt.f32.s32 %v8103_v16 }
 0x3dd   :  { %v3501_v20 = vadd.f32 %v4271_v24, %v3500_v10  ;;  %v2000_v4 = vadd.s32 %v1999_v3, %v1997_v0  ;;  %2247 = vmin.xlane.f32.xlu0 %v2246_v60  ;;  %2883 = vmatprep.mubr.f32.mxu0 %v8058_v41  ;;  %v2297_v24 = vcvt.s32.f32 %v2295_v56 }
 0x3de   :  { %v6556_v33 = vpop.xlane.xlu1 %2257 }
 0x3df   :  { %vm2467_vm4 = vcmp.eq.s32.totalorder %v5422_v32, %v2000_v4  ;;  %vm2259_vm5 = vcmp.eq.f32.partialorder %v6227_v14, %v6556_v33 }
 0x3e0   :  { %v4272_v29 = vsel %vm2467_vm4, 1.0, %v8058_v41  ;;  %v2260_v43 = vsel %vm2259_vm5, %v2255_v42, inf  ;;  %4336 = vmatmul.mubr.msk.f32.gmra.mxu0 %vm2467_vm4, %v8065_v19 }
 0x3e1   :  { %v3502_v45 = vadd.f32 %v4272_v29, %v3501_v20  ;;  %2261 = vmin.xlane.f32.xlu1 %v2260_v43  ;;  %2889 = vmatprep.mubr.f32.mxu0 %v8058_v41  ;;  %v8102_v20 = vld [vmem:[#allocation162_spill] sm:$0xff]  ;;  %v2041_v43 = vshll.u32 %v2040_v21, 16 }
 0x3e2   :  { %v2010_v2 = vpop.xlane.xlu0 %2009  ;;  %v6566_v55 = vpop.xlane.xlu1 %2271  ;;  %v2309_v4 = vand.u32 65535, %v8102_v20 }
 0x3e3   :  { %v2011_v11 = vcvt.f32.s32 %v2010_v2  ;;  %vm2273_vm6 = vcmp.eq.f32.partialorder %v6246_v6, %v6566_v55 }
 0x3e4   :  { %v2274_v14 = vsel %vm2273_vm6, %v2269_v13, inf  ;;  %v2311_v29 = vcvt.s32.f32 %v2309_v4 }
 0x3e5   :  { %v2014_v34 = vadd.s32 %v2013_v52, %v2011_v11  ;;  %2275 = vmin.xlane.f32.xlu0 %v2274_v14 }
 0x3e6   :  { %v6571_v26 = vpop.xlane.xlu1 %2285 }
 0x3e7   :  { %vm2468_vm7 = vcmp.eq.s32.totalorder %v5422_v32, %v2014_v34  ;;  %vm2287_vm8 = vcmp.eq.f32.partialorder %v6254_v17, %v6571_v26 }
 0x3e8   :  { %v4273_v58 = vsel %vm2468_vm7, 1.0, %v8058_v41  ;;  %4337 = vmatmul.mubr.msk.f32.gmra.mxu0 %vm2468_vm7, %v8065_v19  ;;  %v2288_v10 = vsel %vm2287_vm8, %v2283_v44, inf }
 0x3e9   :  { %v3503_v30 = vadd.f32 %v4273_v58, %v3502_v45  ;;  %2289 = vmin.xlane.f32.xlu1 %v2288_v10  ;;  %2895 = vmatprep.mubr.f32.mxu0 %v8058_v41  ;;  %v8105_v10 = vld [vmem:[#allocation165_spill] sm:$0xff] }
 0x3ea   :  { %v2024_v6 = vpop.xlane.xlu0 %2023 }
 0x3eb   :  { %v2025_v18 = vcvt.f32.s32 %v2024_v6  ;;  %v8106_v6 = vld [vmem:[#allocation4_spill] sm:$0xff] }
 0x3ed   :  { %v2028_v31 = vadd.s32 %v2027_v40, %v2025_v18 }
 0x3ef   :  { %vm2469_vm9 = vcmp.eq.s32.totalorder %v5422_v32, %v2028_v31 }
 0x3f0   :  { %v4274_v3 = vsel %vm2469_vm9, 1.0, %v8058_v41  ;;  %4338 = vmatmul.mubr.msk.f32.gmra.mxu0 %vm2469_vm9, %v8065_v19 }
 0x3f1   :  { %v3504_v17 = vadd.f32 %v4274_v3, %v3503_v30  ;;  %2901 = vmatprep.mubr.f32.mxu0 %v8058_v41 }
 0x3f2   :  { %v6585_v0 = vpop.xlane.xlu1 %2299 }
 0x3f3   :  { %vm2301_vm10 = vcmp.eq.f32.partialorder %v6276_v35, %v6585_v0  ;;  %v2054_v35 = vcvt.f32.s32 %v6303_v12  ;;  %v2323_v12 = vand.u32 65535, %v8105_v10 }
 0x3f4   :  { %v2302_v60 = vsel %vm2301_vm10, %v2297_v24, inf  ;;  %v8107_v24 = vld [vmem:[#allocation5_spill] sm:$0xff] }
 0x3f5   :  { %2303 = vmin.xlane.f32.xlu0 %v2302_v60  ;;  %v2055_v14 = vshll.u32 %v2054_v35, 16  ;;  %v2325_v16 = vcvt.s32.f32 %v2323_v12  ;;  %v8112_v12 = vld [vmem:[#allocation8_spill] sm:$0xff] }
 0x3fa   :  { %v2038_v42 = vpop.xlane.xlu0 %2037  ;;  %v6591_v23 = vpop.xlane.xlu1 %2313 }
 0x3fb   :  { %v2039_v45 = vcvt.f32.s32 %v2038_v42  ;;  %vm2315_vm11 = vcmp.eq.f32.partialorder %v6295_v36, %v6591_v23 }
 0x3fc   :  { %v2316_v51 = vsel %vm2315_vm11, %v2311_v29, inf  ;;  %v8108_v29 = vld [vmem:[#allocation6_spill] sm:$0xff] }
 0x3fd   :  { %v2042_v2 = vadd.s32 %v2041_v43, %v2039_v45  ;;  %2317 = vmin.xlane.f32.xlu1 %v2316_v51 }
 0x3ff   :  { %vm2470_vm12 = vcmp.eq.s32.totalorder %v5422_v32, %v2042_v2 }
 0x400   :  { %v4275_v13 = vsel %vm2470_vm12, 1.0, %v8058_v41  ;;  %4339 = vmatmul.mubr.msk.f32.gmra.mxu0 %vm2470_vm12, %v8065_v19 }
 0x401   :  { %v3505_v52 = vadd.f32 %v4275_v13, %v3504_v17  ;;  %2907 = vmatprep.mubr.f32.mxu0 %v8058_v41  ;;  %v8109_v13 = vld [vmem:[#allocation7_spill] sm:$0xff] }
 0x402   :  { %v2052_v11 = vpop.xlane.xlu0 %2051 }
 0x403   :  { %v2053_v34 = vcvt.f32.s32 %v2052_v11  ;;  %v8110_v11 = vld [vmem:[#allocation147_spill] sm:$0xff] }
 0x404   :  { %v6600_v44 = vpop.f32.mrf.mxu0 }
 0x405   :  { %v2056_v36 = vadd.s32 %v2055_v14, %v2053_v34  ;;  %v3076_v58 = vsub.f32 %v6600_v44, %v8104_v22  ;;  %v2337_v14 = vand.u32 65535, %v8110_v11  ;;  %v8111_v34 = vld [vmem:[#allocation166_spill] sm:$0xff] }
 0x406   :  { %v6605_v30 = vpop.f32.mrf.mxu0  ;;  %v8116_v11 = vld [vmem:[#allocation10_spill] sm:$0xff] }
 0x407   :  { %vm2471_vm13 = vcmp.eq.s32.totalorder %v5422_v32, %v2056_v36  ;;  %v3077_v40 = vsub.f32 %v6605_v30, %v8106_v6  ;;  %v3204_v3 = vmul.f32 %v3076_v58, %v3076_v58  ;;  %v2068_v36 = vcvt.f32.s32 %v8111_v34 }
 0x408   :  { %v4276_v18 = vsel %vm2471_vm13, 1.0, %v8058_v41  ;;  %v6611_v31 = vpop.f32.mrf.mxu0  ;;  %4340 = vmatmul.mubr.msk.f32.gmra.mxu0 %vm2471_vm13, %v8065_v19 }
 0x409   :  { %v3506_v56 = vadd.f32 %v4276_v18, %v3505_v52  ;;  %v3205_v17 = vmul.f32 %v3077_v40, %v3077_v40  ;;  %v3078_v60 = vsub.f32 %v6611_v31, %v8107_v24  ;;  %2913 = vmatprep.mubr.f32.mxu0 %v8058_v41  ;;  %v2069_v6 = vshll.u32 %v2068_v36, 16 }
 0x40a   :  { %v6617_v20 = vpop.f32.mrf.mxu0  ;;  %v6619_v4 = vpop.xlane.xlu1 %2327 }
 0x40b   :  { %v3332_v21 = vadd.f32 %v3205_v17, %v3204_v3  ;;  %v3206_v42 = vmul.f32 %v3078_v60, %v3078_v60  ;;  %v3079_v43 = vsub.f32 %v6617_v20, %v8108_v29  ;;  %vm2329_vm14 = vcmp.eq.f32.partialorder %v6322_v39, %v6619_v4  ;;  %v8114_v29 = vld [vmem:[#allocation9_spill] sm:$0xff] }
 0x40c   :  { %v6625_v45 = vpop.f32.mrf.mxu0  ;;  %v2330_v51 = vsel %vm2329_vm14, %v2325_v16, inf  ;;  %v2339_v3 = vcvt.s32.f32 %v2337_v14 }
 0x40d   :  { %v3333_v2 = vadd.f32 %v3332_v21, %v3206_v42  ;;  %v3207_v35 = vmul.f32 %v3079_v43, %v3079_v43  ;;  %v3080_v52 = vsub.f32 %v6625_v45, %v8109_v13  ;;  %2331 = vmin.xlane.f32.xlu0 %v2330_v51  ;;  %v8115_v51 = vld [vmem:[#allocation167_spill] sm:$0xff] }
 0x40e   :  { %v6631_v22 = vpop.f32.mrf.mxu0 }
 0x40f   :  { %v3334_v58 = vadd.f32 %v3333_v2, %v3207_v35  ;;  %v3208_v10 = vmul.f32 %v3080_v52, %v3080_v52  ;;  %v3081_v39 = vsub.f32 %v6631_v22, %v8112_v12  ;;  %v2082_v2 = vcvt.f32.s32 %v8115_v51  ;;  %v8117_v12 = vld [vmem:[#allocation11_spill] sm:$0xff] }
 0x411   :  { %v3335_v17 = vadd.f32 %v3334_v58, %v3208_v10  ;;  %v3209_v24 = vmul.f32 %v3081_v39, %v3081_v39 }
 0x412   :  { %v2066_v40 = vpop.xlane.xlu0 %2065  ;;  %v6635_v18 = vpop.xlane.xlu1 %2341 }
 0x413   :  { %8113 = vst [vmem:[#allocation152_spill] sm:$0xff] %v6635_v18  ;;  %v2067_v60 = vcvt.f32.s32 %v2066_v40  ;;  %vm2343_vm15 = vcmp.eq.f32.partialorder %v6341_v9, %v6635_v18  ;;  %v3336_v13 = vadd.f32 %v3335_v17, %v3209_v24  ;;  %v8141_v18 = vld [vmem:[#allocation34_spill] sm:$0xff] }
 0x414   :  { %v6639_v16 = vpop.f32.mrf.mxu0  ;;  %v2344_v21 = vsel %vm2343_vm15, %v2339_v3, inf }
 0x415   :  { %v2070_v42 = vadd.s32 %v2069_v6, %v2067_v60  ;;  %v3082_v43 = vsub.f32 %v6639_v16, %v8114_v29  ;;  %2345 = vmin.xlane.f32.xlu1 %v2344_v21  ;;  %v2083_v6 = vshll.u32 %v2082_v2, 16  ;;  %v8118_v60 = vld [vmem:[#allocation12_spill] sm:$0xff] }
 0x416   :  { %v6644_v35 = vpop.f32.mrf.mxu0 }
 0x417   :  { %vm2472_vm0 = vcmp.eq.s32.totalorder %v5422_v32, %v2070_v42  ;;  %v3210_v52 = vmul.f32 %v3082_v43, %v3082_v43  ;;  %v3083_v14 = vsub.f32 %v6644_v35, %v8116_v11  ;;  %v8119_v43 = vld [vmem:[#allocation139_spill] sm:$0xff] }
 0x418   :  { %v4277_v9 = vsel %vm2472_vm0, 1.0, %v8058_v41  ;;  %v6650_v34 = vpop.f32.mrf.mxu0  ;;  %4341 = vmatmul.mubr.msk.f32.gmra.mxu0 %vm2472_vm0, %v8065_v19 }
 0x419   :  { %v3507_v36 = vadd.f32 %v4277_v9, %v3506_v56  ;;  %v3337_v58 = vadd.f32 %v3336_v13, %v3210_v52  ;;  %v3211_v10 = vmul.f32 %v3083_v14, %v3083_v14  ;;  %v3084_v39 = vsub.f32 %v6650_v34, %v8117_v12  ;;  %2919 = vmatprep.mubr.f32.mxu0 %v8058_v41  ;;  %v8120_v14 = vld [vmem:[#allocation13_spill] sm:$0xff] }
 0x41a   :  { %v6656_v40 = vpop.f32.mrf.mxu0  ;;  %v2080_v3 = vpop.xlane.xlu0 %2079  ;;  %v2351_v56 = vand.u32 65535, %v8119_v43  ;;  %v2365_v43 = vand.u32 65535, %v6376_v54 }
 0x41b   :  { %v3338_v17 = vadd.f32 %v3337_v58, %v3211_v10  ;;  %v3212_v24 = vmul.f32 %v3084_v39, %v3084_v39  ;;  %v3085_v21 = vsub.f32 %v6656_v40, %v8118_v60  ;;  %v2081_v42 = vcvt.f32.s32 %v2080_v3  ;;  %v8122_v3 = vld [vmem:[#allocation14_spill] sm:$0xff] }
 0x41c   :  { %v2353_v12 = vcvt.s32.f32 %v2351_v56 }
 0x41d   :  { %v2084_v29 = vadd.s32 %v2083_v6, %v2081_v42  ;;  %v3339_v51 = vadd.f32 %v3338_v17, %v3212_v24  ;;  %v3213_v13 = vmul.f32 %v3085_v21, %v3085_v21  ;;  %v8123_v42 = vld [vmem:[#allocation15_spill] sm:$0xff] }
 0x41f   :  { %vm2473_vm1 = vcmp.eq.s32.totalorder %v5422_v32, %v2084_v29  ;;  %v3340_v39 = vadd.f32 %v3339_v51, %v3213_v13  ;;  %v2096_v51 = vcvt.f32.s32 %v6384_v7 }
 0x420   :  { %v4278_v52 = vsel %vm2473_vm1, 1.0, %v8058_v41  ;;  %v6663_v11 = vpop.f32.mrf.mxu0  ;;  %4342 = vmatmul.mubr.msk.f32.gmra.mxu0 %vm2473_vm1, %v8065_v19 }
 0x421   :  { %v3508_v2 = vadd.f32 %v4278_v52, %v3507_v36  ;;  %v3086_v9 = vsub.f32 %v6663_v11, %v8120_v14  ;;  %2925 = vmatprep.mubr.f32.mxu0 %v8058_v41  ;;  %v8124_v14 = vld [vmem:[#allocation16_spill] sm:$0xff] }
 0x422   :  { %v6669_v58 = vpop.f32.mrf.mxu0  ;;  %v6671_v10 = vpop.xlane.xlu1 %2355 }
 0x423   :  { %8121 = vst [vmem:[#allocation169_spill] sm:$0xff] %v6671_v10  ;;  %v3214_v6 = vmul.f32 %v3086_v9, %v3086_v9  ;;  %v3087_v17 = vsub.f32 %v6669_v58, %v8122_v3  ;;  %vm2357_vm2 = vcmp.eq.f32.partialorder %v6368_v46, %v6671_v10  ;;  %v2110_v9 = vcvt.f32.s32 %v6395_v38  ;;  %v8135_v10 = vld [vmem:[#allocation28_spill] sm:$0xff] }
 0x424   :  { %v6677_v24 = vpop.f32.mrf.mxu0  ;;  %v2358_v36 = vsel %vm2357_vm2, %v2353_v12, inf  ;;  %v2097_v3 = vshll.u32 %v2096_v51, 16 }
 0x425   :  { %v3341_v60 = vadd.f32 %v3340_v39, %v3214_v6  ;;  %v3215_v21 = vmul.f32 %v3087_v17, %v3087_v17  ;;  %v3088_v29 = vsub.f32 %v6677_v24, %v8123_v42  ;;  %2359 = vmin.xlane.f32.xlu0 %v2358_v36  ;;  %v2367_v36 = vcvt.s32.f32 %v2365_v43  ;;  %v8127_v43 = vld [vmem:[#allocation19_spill] sm:$0xff] }
 0x426   :  { %v6682_v56 = vpop.f32.mrf.mxu0 }
 0x427   :  { %v3342_v13 = vadd.f32 %v3341_v60, %v3215_v21  ;;  %v3216_v52 = vmul.f32 %v3088_v29, %v3088_v29  ;;  %v3089_v46 = vsub.f32 %v6682_v56, %v8124_v14  ;;  %v8126_v60 = vld [vmem:[#allocation17_spill] sm:$0xff]  ;;  %v2111_v14 = vshll.u32 %v2110_v9, 16 }
 0x429   :  { %v3343_v12 = vadd.f32 %v3342_v13, %v3216_v52  ;;  %v3217_v39 = vmul.f32 %v3089_v46, %v3089_v46 }
 0x42a   :  { %v2094_v6 = vpop.xlane.xlu0 %2093 }
 0x42b   :  { %v2095_v17 = vcvt.f32.s32 %v2094_v6  ;;  %v6688_v42 = vpop.xlane.xlu1 %2369  ;;  %v3344_v38 = vadd.f32 %v3343_v12, %v3217_v39 }
 0x42c   :  { %8125 = vst [vmem:[#allocation144_spill] sm:$0xff] %v6688_v42  ;;  %vm2371_vm3 = vcmp.eq.f32.partialorder %v6391_v47, %v6688_v42  ;;  %v6692_v54 = vpop.f32.mrf.mxu0 }
 0x42d   :  { %v2098_v7 = vadd.s32 %v2097_v3, %v2095_v17  ;;  %v3090_v21 = vsub.f32 %v6692_v54, %v8126_v60  ;;  %v2372_v29 = vsel %vm2371_vm3, %v2367_v36, inf  ;;  %v2379_v36 = vand.u32 65535, %v6408_v62 }
 0x42e   :  { %2373 = vmin.xlane.f32.xlu1 %v2372_v29  ;;  %v6696_v13 = vpop.f32.mrf.mxu0  ;;  %v2108_v51 = vpop.xlane.xlu0 %2107 }
 0x42f   :  { %vm2474_vm4 = vcmp.eq.s32.totalorder %v5422_v32, %v2098_v7  ;;  %v3218_v52 = vmul.f32 %v3090_v21, %v3090_v21  ;;  %v3091_v46 = vsub.f32 %v6696_v13, %v8127_v43  ;;  %v2109_v47 = vcvt.f32.s32 %v2108_v51  ;;  %v8128_v7 = vld [vmem:[#allocation20_spill] sm:$0xff]  ;;  %v8129_v51 = vld [vmem:[#allocation22_spill] sm:$0xff] }
 0x430   :  { %v4279_v6 = vsel %vm2474_vm4, 1.0, %v8058_v41  ;;  %v6702_v3 = vpop.f32.mrf.mxu0  ;;  %4343 = vmatmul.mubr.msk.f32.gmra.mxu0 %vm2474_vm4, %v8065_v19 }
 0x431   :  { %v3509_v17 = vadd.f32 %v4279_v6, %v3508_v2  ;;  %v3345_v9 = vadd.f32 %v3344_v38, %v3218_v52  ;;  %v3219_v12 = vmul.f32 %v3091_v46, %v3091_v46  ;;  %v2112_v39 = vadd.s32 %v2111_v14, %v2109_v47  ;;  %2931 = vmatprep.mubr.f32.mxu0 %v8058_v41 }
 0x432   :  { %v3092_v60 = vsub.f32 %v6702_v3, %v8128_v7  ;;  %v6709_v21 = vpop.f32.mrf.mxu0  ;;  %v2381_v47 = vcvt.s32.f32 %v2379_v36  ;;  %v2124_v6 = vcvt.f32.s32 %v6430_v25 }
 0x433   :  { %v3346_v29 = vadd.f32 %v3345_v9, %v3219_v12  ;;  %vm2475_vm5 = vcmp.eq.s32.totalorder %v5422_v32, %v2112_v39  ;;  %v3093_v43 = vsub.f32 %v6709_v21, %v8129_v51  ;;  %v2393_v9 = vand.u32 65535, %v6421_v59 }
 0x434   :  { %v4280_v2 = vsel %vm2475_vm5, 1.0, %v8058_v41  ;;  %v3220_v38 = vmul.f32 %v3092_v60, %v3092_v60  ;;  %4344 = vmatmul.mubr.msk.f32.gmra.mxu0 %vm2475_vm5, %v8065_v19  ;;  %v8131_v60 = vld [vmem:[#allocation23_spill] sm:$0xff]  ;;  %v2138_v59 = vcvt.f32.s32 %v6441_v48 }
 0x435   :  { %v3510_v14 = vadd.f32 %v4280_v2, %v3509_v17  ;;  %v3221_v52 = vmul.f32 %v3093_v43, %v3093_v43  ;;  %2937 = vmatprep.mubr.f32.mxu0 %v8058_v41  ;;  %v2125_v43 = vshll.u32 %v2124_v6, 16  ;;  %v8132_v2 = vld [vmem:[#allocation25_spill] sm:$0xff] }
 0x436   :  { %v3347_v62 = vadd.f32 %v3346_v29, %v3220_v38  ;;  %v6717_v46 = vpop.xlane.xlu1 %2383 }
 0x437   :  { %8130 = vst [vmem:[#allocation170_spill] sm:$0xff] %v6717_v46  ;;  %vm2385_vm6 = vcmp.eq.f32.partialorder %v6418_v5, %v6717_v46  ;;  %v8134_v46 = vld [vmem:[#allocation26_spill] sm:$0xff] }
 0x438   :  { %v3348_v12 = vadd.f32 %v3347_v62, %v3221_v52  ;;  %v6723_v39 = vpop.f32.mrf.mxu0  ;;  %v2386_v7 = vsel %vm2385_vm6, %v2381_v47, inf  ;;  %v2395_v62 = vcvt.s32.f32 %v2393_v9 }
 0x439   :  { %v3094_v17 = vsub.f32 %v6723_v39, %v8131_v60  ;;  %2387 = vmin.xlane.f32.xlu0 %v2386_v7 }
 0x43a   :  { %v6727_v51 = vpop.f32.mrf.mxu0  ;;  %v2122_v29 = vpop.xlane.xlu0 %2121 }
 0x43b   :  { %v3222_v36 = vmul.f32 %v3094_v17, %v3094_v17  ;;  %v3095_v25 = vsub.f32 %v6727_v51, %v8132_v2  ;;  %v2123_v38 = vcvt.f32.s32 %v2122_v29  ;;  %v6731_v5 = vpop.xlane.xlu1 %2397 }
 0x43c   :  { %8133 = vst [vmem:[#allocation157_spill] sm:$0xff] %v6731_v5  ;;  %vm2399_vm7 = vcmp.eq.f32.partialorder %v6437_v1, %v6731_v5  ;;  %v6736_v52 = vpop.f32.mrf.mxu0  ;;  %v2139_v5 = vshll.u32 %v2138_v59, 16  ;;  %v8136_v59 = vld [vmem:[#allocation29_spill] sm:$0xff] }
 0x43d   :  { %v3349_v47 = vadd.f32 %v3348_v12, %v3222_v36  ;;  %v3223_v7 = vmul.f32 %v3095_v25, %v3095_v25  ;;  %v2126_v60 = vadd.s32 %v2125_v43, %v2123_v38  ;;  %v3096_v6 = vsub.f32 %v6736_v52, %v8134_v46 }
 0x43e   :  { %v2400_v17 = vsel %vm2399_vm7, %v2395_v62, inf  ;;  %v6740_v42 = vpop.f32.mrf.mxu0  ;;  %v2136_v29 = vpop.xlane.xlu0 %2135  ;;  %v2407_v25 = vand.u32 65535, %v6454_v50 }
 0x43f   :  { %v3350_v2 = vadd.f32 %v3349_v47, %v3223_v7  ;;  %vm2476_vm8 = vcmp.eq.s32.totalorder %v5422_v32, %v2126_v60  ;;  %v3224_v48 = vmul.f32 %v3096_v6, %v3096_v6  ;;  %2401 = vmin.xlane.f32.xlu1 %v2400_v17  ;;  %v3097_v1 = vsub.f32 %v6740_v42, %v8135_v10 }
 0x440   :  { %v4281_v9 = vsel %vm2476_vm8, 1.0, %v8058_v41  ;;  %v2137_v12 = vcvt.f32.s32 %v2136_v29  ;;  %4345 = vmatmul.mubr.msk.f32.gmra.mxu0 %vm2476_vm8, %v8065_v19  ;;  %v2421_v60 = vand.u32 65535, %v6466_v8  ;;  %v2152_v6 = vcvt.f32.s32 %v6474_v57  ;;  %v8140_v57 = vld [vmem:[#allocation32_spill] sm:$0xff] }
 0x441   :  { %v3511_v43 = vadd.f32 %v4281_v9, %v3510_v14  ;;  %v3351_v46 = vadd.f32 %v3350_v2, %v3224_v48  ;;  %v3225_v36 = vmul.f32 %v3097_v1, %v3097_v1  ;;  %2943 = vmatprep.mubr.f32.mxu0 %v8058_v41  ;;  %v2409_v14 = vcvt.s32.f32 %v2407_v25  ;;  %v8138_v2 = vld [vmem:[#allocation31_spill] sm:$0xff]  ;;  %v8139_v1 = vld [vmem:[#allocation168_spill] sm:$0xff] }
 0x442   :  { %v2140_v38 = vadd.s32 %v2139_v5, %v2137_v12  ;;  %v2153_v25 = vshll.u32 %v2152_v6, 16 }
 0x443   :  { %v3352_v62 = vadd.f32 %v3351_v46, %v3225_v36  ;;  %v2423_v36 = vcvt.s32.f32 %v2421_v60 }
 0x444   :  { %vm2477_vm9 = vcmp.eq.s32.totalorder %v5422_v32, %v2140_v38  ;;  %v6750_v47 = vpop.f32.mrf.mxu0  ;;  %v2166_v38 = vcvt.f32.s32 %v6487_v27  ;;  %v2180_v27 = vcvt.f32.s32 %v6498_v53 }
 0x445   :  { %v4282_v10 = vsel %vm2477_vm9, 1.0, %v8058_v41  ;;  %v3098_v7 = vsub.f32 %v6750_v47, %v8136_v59  ;;  %4346 = vmatmul.mubr.msk.f32.gmra.mxu0 %vm2477_vm9, %v8065_v19 }
 0x446   :  { %v3512_v17 = vadd.f32 %v4282_v10, %v3511_v43  ;;  %v6758_v50 = vpop.f32.mrf.mxu0  ;;  %v6760_v5 = vpop.xlane.xlu1 %2411  ;;  %2949 = vmatprep.mubr.f32.mxu0 %v8058_v41  ;;  %v2181_v53 = vshll.u32 %v2180_v27, 16 }
 0x447   :  { %8137 = vst [vmem:[#allocation171_spill] sm:$0xff] %v6760_v5  ;;  %v3226_v29 = vmul.f32 %v3098_v7, %v3098_v7  ;;  %v3099_v48 = vsub.f32 %v6758_v50, %v8138_v2  ;;  %vm2413_vm10 = vcmp.eq.f32.partialorder %v8139_v1, %v6760_v5 }
 0x448   :  { %v6767_v9 = vpop.f32.mrf.mxu0  ;;  %v2414_v12 = vsel %vm2413_vm10, %v2409_v14, inf }
 0x449   :  { %v3353_v8 = vadd.f32 %v3352_v62, %v3226_v29  ;;  %v3227_v46 = vmul.f32 %v3099_v48, %v3099_v48  ;;  %v3100_v43 = vsub.f32 %v6767_v9, %v8140_v57  ;;  %2415 = vmin.xlane.f32.xlu0 %v2414_v12  ;;  %v2167_v12 = vshll.u32 %v2166_v38, 16 }
 0x44a   :  { %v6772_v10 = vpop.f32.mrf.mxu0  ;;  %v2150_v59 = vpop.xlane.xlu0 %2149 }
 0x44b   :  { %v3354_v7 = vadd.f32 %v3353_v8, %v3227_v46  ;;  %v3228_v2 = vmul.f32 %v3100_v43, %v3100_v43  ;;  %v3101_v1 = vsub.f32 %v6772_v10, %v8141_v18  ;;  %v2151_v5 = vcvt.f32.s32 %v2150_v59  ;;  %v6776_v14 = vpop.xlane.xlu1 %2425  ;;  %v8143_v59 = vld [vmem:[#allocation35_spill] sm:$0xff] }
 0x44c   :  { %8142 = vst [vmem:[#allocation172_spill] sm:$0xff] %v6776_v14  ;;  %vm2427_vm11 = vcmp.eq.f32.partialorder %v6479_v49, %v6776_v14 }
 0x44d   :  { %v3355_v62 = vadd.f32 %v3354_v7, %v3228_v2  ;;  %v3229_v29 = vmul.f32 %v3101_v1, %v3101_v1  ;;  %v2154_v60 = vadd.s32 %v2153_v25, %v2151_v5  ;;  %v2428_v6 = vsel %vm2427_vm11, %v2423_v36, inf  ;;  %v8144_v2 = vld [vmem:[#allocation37_spill] sm:$0xff] }
 0x44e   :  { %2429 = vmin.xlane.f32.xlu1 %v2428_v6  ;;  %v2164_v48 = vpop.xlane.xlu0 %2163  ;;  %v2194_v36 = vcvt.f32.s32 %v6507_v37 }
 0x44f   :  { %v3356_v8 = vadd.f32 %v3355_v62, %v3229_v29  ;;  %vm2478_vm12 = vcmp.eq.s32.totalorder %v5422_v32, %v2154_v60  ;;  %v2165_v46 = vcvt.f32.s32 %v2164_v48 }
 0x450   :  { %v4283_v18 = vsel %vm2478_vm12, 1.0, %v8058_v41  ;;  %v6783_v57 = vpop.f32.mrf.mxu0  ;;  %4347 = vmatmul.mubr.msk.f32.gmra.mxu0 %vm2478_vm12, %v8065_v19  ;;  %v2195_v37 = vshll.u32 %v2194_v36, 16 }
 0x451   :  { %v3513_v49 = vadd.f32 %v4283_v18, %v3512_v17  ;;  %v2168_v43 = vadd.s32 %v2167_v12, %v2165_v46  ;;  %v3102_v5 = vsub.f32 %v6783_v57, %v8143_v59  ;;  %2955 = vmatprep.mubr.f32.mxu0 %v8058_v41  ;;  %v2208_v12 = vcvt.f32.s32 %v6518_v28  ;;  %v8145_v46 = vld [vmem:[#allocation38_spill] sm:$0xff] }
 0x452   :  { %v6790_v25 = vpop.f32.mrf.mxu0  ;;  %v2178_v38 = vpop.xlane.xlu0 %2177  ;;  %v2222_v28 = vcvt.f32.s32 %v6528_v61  ;;  %v2236_v61 = vcvt.f32.s32 %v6537_v63 }
 0x453   :  { %vm2479_vm13 = vcmp.eq.s32.totalorder %v5422_v32, %v2168_v43  ;;  %v3230_v7 = vmul.f32 %v3102_v5, %v3102_v5  ;;  %v3103_v1 = vsub.f32 %v6790_v25, %v8144_v2  ;;  %v2179_v62 = vcvt.f32.s32 %v2178_v38  ;;  %v8146_v38 = vld [vmem:[#allocation40_spill] sm:$0xff] }
 0x454   :  { %v4284_v17 = vsel %vm2479_vm13, 1.0, %v8058_v41  ;;  %v2777_v29 = vpop.f32.mrf.mxu0  ;;  %4348 = vmatmul.mubr.msk.f32.gmra.mxu0 %vm2479_vm13, %v8065_v19 }
 0x455   :  { %v3514_v60 = vadd.f32 %v4284_v17, %v3513_v49  ;;  %v3357_v6 = vadd.f32 %v3356_v8, %v3230_v7  ;;  %v3231_v27 = vmul.f32 %v3103_v1, %v3103_v1  ;;  %v2182_v48 = vadd.s32 %v2181_v53, %v2179_v62  ;;  %2961 = vmatprep.mubr.f32.mxu0 %v8058_v41 }
 0x456   :  { %v3104_v18 = vsub.f32 %v2777_v29, %v8145_v46  ;;  %v2779_v43 = vpop.f32.mrf.mxu0  ;;  %v2192_v59 = vpop.xlane.xlu0 %2191  ;;  %v2209_v17 = vshll.u32 %v2208_v12, 16 }
 0x457   :  { %v3358_v5 = vadd.f32 %v3357_v6, %v3231_v27  ;;  %vm2480_vm14 = vcmp.eq.s32.totalorder %v5422_v32, %v2182_v48  ;;  %v3105_v2 = vsub.f32 %v2779_v43, %v8146_v38  ;;  %v2193_v14 = vcvt.f32.s32 %v2192_v59  ;;  %v8147_v59 = vld [vmem:[#allocation41_spill] sm:$0xff] }
 0x458   :  { %v4285_v49 = vsel %vm2480_vm14, 1.0, %v8058_v41  ;;  %v3232_v8 = vmul.f32 %v3104_v18, %v3104_v18  ;;  %4349 = vmatmul.mubr.msk.f32.gmra.mxu0 %vm2480_vm14, %v8065_v19 }
 0x459   :  { %v3515_v53 = vadd.f32 %v4285_v49, %v3514_v60  ;;  %v3233_v7 = vmul.f32 %v3105_v2, %v3105_v2  ;;  %v2196_v36 = vadd.s32 %v2195_v37, %v2193_v14  ;;  %2967 = vmatprep.mubr.f32.mxu0 %v8058_v41  ;;  %v2223_v37 = vshll.u32 %v2222_v28, 16  ;;  %v8148_v2 = vld [vmem:[#allocation43_spill] sm:$0xff] }
 0x45a   :  { %v3359_v1 = vadd.f32 %v3358_v5, %v3232_v8  ;;  %v2206_v62 = vpop.xlane.xlu1 %2205 }
 0x45b   :  { %vm2481_vm15 = vcmp.eq.s32.totalorder %v5422_v32, %v2196_v36  ;;  %v2207_v6 = vcvt.f32.s32 %v2206_v62  ;;  %v2237_v62 = vshll.u32 %v2236_v61, 16 }
 0x45c   :  { %v3360_v27 = vadd.f32 %v3359_v1, %v3233_v7  ;;  %v4286_v48 = vsel %vm2481_vm15, 1.0, %v8058_v41  ;;  %v2783_v46 = vpop.f32.mrf.mxu0  ;;  %4350 = vmatmul.mubr.msk.f32.gmra.mxu0 %vm2481_vm15, %v8065_v19 }
 0x45d   :  { %v3516_v18 = vadd.f32 %v4286_v48, %v3515_v53  ;;  %v2210_v60 = vadd.s32 %v2209_v17, %v2207_v6  ;;  %v3106_v14 = vsub.f32 %v2783_v46, %v8147_v59  ;;  %2973 = vmatprep.mubr.f32.mxu0 %v8058_v41  ;;  %v2250_v17 = vcvt.f32.s32 %v6547_v15  ;;  %v8149_v6 = vld [vmem:[#allocation44_spill] sm:$0xff] }
 0x45e   :  { %v2785_v5 = vpop.f32.mrf.mxu0  ;;  %v2220_v12 = vpop.xlane.xlu0 %2219 }
 0x45f   :  { %vm2482_vm0 = vcmp.eq.s32.totalorder %v5422_v32, %v2210_v60  ;;  %v3234_v38 = vmul.f32 %v3106_v14, %v3106_v14  ;;  %v3107_v49 = vsub.f32 %v2785_v5, %v8148_v2  ;;  %v2221_v8 = vcvt.f32.s32 %v2220_v12  ;;  %3572 = vmatprep.subr.mxu1 %v2785_v5  ;;  %v8151_v12 = vld [vmem:[#allocation47_spill] sm:$0xff] }
 0x460   :  { %v4287_v7 = vsel %vm2482_vm0, 1.0, %v8058_v41  ;;  %v6815_v53 = vpop.f32.mrf.mxu0  ;;  %4351 = vmatmul.mubr.msk.f32.gmra.mxu0 %vm2482_vm0, %v8065_v19  ;;  %3573 = vmatpush1.msra.mxu1 %v2783_v46  ;;  %v8150_v46 = vld [vmem:[#allocation46_spill] sm:$0xff]  ;;  %v2251_v2 = vshll.u32 %v2250_v17, 16 }
 0x461   :  { %v3517_v36 = vadd.f32 %v4287_v7, %v3516_v18  ;;  %v3361_v28 = vadd.f32 %v3360_v27, %v3234_v38  ;;  %v3235_v1 = vmul.f32 %v3107_v49, %v3107_v49  ;;  %v2224_v63 = vadd.s32 %v2223_v37, %v2221_v8  ;;  %3574 = vmatprep.subr.mxu1 %v2779_v43 }
 0x462   :  { %v3108_v48 = vsub.f32 %v6815_v53, %v8149_v6  ;;  %v6821_v60 = vpop.f32.mrf.mxu0  ;;  %3575 = vmatpush1.msra.mxu1 %v2777_v29  ;;  %v2234_v59 = vpop.xlane.xlu1 %2233  ;;  %2979 = vmatprep.mubr.f32.mxu0 %v8058_v41  ;;  %v8153_v6 = vld [vmem:[#allocation50_spill] sm:$0xff] }
 0x463   :  { %v3362_v14 = vadd.f32 %v3361_v28, %v3235_v1  ;;  %vm2483_vm1 = vcmp.eq.s32.totalorder %v5422_v32, %v2224_v63  ;;  %v3109_v27 = vsub.f32 %v6821_v60, %v8150_v46  ;;  %v2235_v18 = vcvt.f32.s32 %v2234_v59  ;;  %3576 = vmatprep.subr.mxu1 %v6790_v25 }
 0x464   :  { %v4288_v15 = vsel %vm2483_vm1, 1.0, %v8058_v41  ;;  %v3236_v43 = vmul.f32 %v3108_v48, %v3108_v48  ;;  %v6829_v37 = vpop.f32.mrf.mxu0  ;;  %4352 = vmatmul.mubr.msk.f32.gmra.mxu0 %vm2483_vm1, %v8065_v19  ;;  %3577 = vmatpush1.msra.mxu1 %v6783_v57  ;;  %v2264_v25 = vcvt.f32.s32 %v6556_v33  ;;  %vm3551_vm1 = vcmp.eq.s32.totalorder %v5422_v32, 1 }
 0x465   :  { %v3518_v29 = vadd.f32 %v4288_v15, %v3517_v36  ;;  %v3237_v61 = vmul.f32 %v3109_v27, %v3109_v27  ;;  %v2238_v5 = vadd.s32 %v2237_v62, %v2235_v18  ;;  %v3110_v38 = vsub.f32 %v6829_v37, %v8151_v12  ;;  %3578 = vmatprep.subr.mxu1 %v6772_v10  ;;  %v8152_v36 = vld [vmem:[#allocation49_spill] sm:$0xff]  ;;  %v8154_v18 = vld [vmem:[#allocation52_spill] sm:$0xff] }
 0x466   :  { %v3363_v49 = vadd.f32 %v3362_v14, %v3236_v43  ;;  %v6837_v8 = vpop.f32.mrf.mxu0  ;;  %3579 = vmatpush1.msra.mxu1 %v6767_v9  ;;  %v2248_v7 = vpop.xlane.xlu0 %2247  ;;  %2985 = vmatprep.mubr.f32.mxu0 %v8058_v41  ;;  %v2265_v59 = vshll.u32 %v2264_v25, 16  ;;  %v8155_v12 = vld [vmem:[#allocation53_spill] sm:$0xff] }
 0x467   :  { %vm2484_vm2 = vcmp.eq.s32.totalorder %v5422_v32, %v2238_v5  ;;  %v3238_v57 = vmul.f32 %v3110_v38, %v3110_v38  ;;  %v3111_v28 = vsub.f32 %v6837_v8, %v8152_v36  ;;  %v2249_v1 = vcvt.f32.s32 %v2248_v7  ;;  %3580 = vmatprep.subr.mxu1 %v6758_v50 }
 0x468   :  { %v3364_v10 = vadd.f32 %v3363_v49, %v3237_v61  ;;  %v4289_v33 = vsel %vm2484_vm2, 1.0, %v8058_v41  ;;  %v6846_v63 = vpop.f32.mrf.mxu0  ;;  %4353 = vmatmul.mubr.msk.f32.gmra.mxu0 %vm2484_vm2, %v8065_v19  ;;  %3581 = vmatpush1.msra.mxu1 %v6750_v47  ;;  %v2278_v50 = vcvt.f32.s32 %v6566_v55  ;;  %vm3550_vm2 = vcmp.eq.s32.totalorder %v5422_v32, 0 }
 0x469   :  { %v3519_v9 = vadd.f32 %v4289_v33, %v3518_v29  ;;  %v3239_v62 = vmul.f32 %v3111_v28, %v3111_v28  ;;  %v2252_v17 = vadd.s32 %v2251_v2, %v2249_v1  ;;  %v3112_v48 = vsub.f32 %v6846_v63, %v8153_v6  ;;  %3582 = vmatprep.subr.mxu1 %v6740_v42 }
 0x46a   :  { %v3365_v14 = vadd.f32 %v3364_v10, %v3238_v57  ;;  %v6854_v46 = vpop.f32.mrf.mxu0  ;;  %3583 = vmatpush1.msra.mxu1 %v6736_v52  ;;  %v2262_v27 = vpop.xlane.xlu1 %2261  ;;  %2991 = vmatprep.mubr.f32.mxu0 %v8058_v41  ;;  %v2279_v2 = vshll.u32 %v2278_v50, 16  ;;  %v8156_v57 = vld [vmem:[#allocation55_spill] sm:$0xff] }
 0x46b   :  { %vm2485_vm3 = vcmp.eq.s32.totalorder %v5422_v32, %v2252_v17  ;;  %v3240_v47 = vmul.f32 %v3112_v48, %v3112_v48  ;;  %v3113_v15 = vsub.f32 %v6854_v46, %v8154_v18  ;;  %v2263_v43 = vcvt.f32.s32 %v2262_v27  ;;  %3584 = vmatprep.subr.mxu1 %v6727_v51 }
 0x46c   :  { %v3366_v42 = vadd.f32 %v3365_v14, %v3239_v62  ;;  %v4290_v55 = vsel %vm2485_vm3, 1.0, %v8058_v41  ;;  %v6863_v29 = vpop.f32.mrf.mxu0  ;;  %4354 = vmatmul.mubr.msk.f32.gmra.mxu0 %vm2485_vm3, %v8065_v19  ;;  %3585 = vmatpush1.msra.mxu1 %v6723_v39  ;;  %v2292_v51 = vcvt.f32.s32 %v6571_v26  ;;  %vm3554_vm3 = vcmask 57344  }
 0x46d   :  { %v3520_v52 = vadd.f32 %v4290_v55, %v3519_v9  ;;  %v3241_v61 = vmul.f32 %v3113_v15, %v3113_v15  ;;  %v2266_v5 = vadd.s32 %v2265_v59, %v2263_v43  ;;  %v3114_v38 = vsub.f32 %v6863_v29, %v8155_v12  ;;  %3586 = vmatprep.subr.mxu1 %v6709_v21  ;;  %v8157_v9 = vld [vmem:[#allocation56_spill] sm:$0xff]  ;;  %v8158_v59 = vld [vmem:[#allocation58_spill] sm:$0xff]  ;;  %v8159_v43 = vld [vmem:[#allocation59_spill] sm:$0xff] }
 0x46e   :  { %v3367_v25 = vadd.f32 %v3366_v42, %v3240_v47  ;;  %v6871_v49 = vpop.f32.mrf.mxu0  ;;  %3587 = vmatpush1.msra.mxu1 %v6702_v3  ;;  %v2276_v7 = vpop.xlane.xlu0 %2275  ;;  %2997 = vmatprep.mubr.f32.mxu0 %v8058_v41  ;;  %v2293_v17 = vshll.u32 %v2292_v51, 16 }
 0x46f   :  { %vm2486_vm4 = vcmp.eq.s32.totalorder %v5422_v32, %v2266_v5  ;;  %v3242_v39 = vmul.f32 %v3114_v38, %v3114_v38  ;;  %v3115_v36 = vsub.f32 %v6871_v49, %v8156_v57  ;;  %v2277_v28 = vcvt.f32.s32 %v2276_v7  ;;  %3588 = vmatprep.subr.mxu1 %v6696_v13  ;;  %v8162_v57 = vld [vmem:[#allocation64_spill] sm:$0xff] }
 0x470   :  { %v3368_v21 = vadd.f32 %v3367_v25, %v3241_v61  ;;  %v4291_v26 = vsel %vm2486_vm4, 1.0, %v8058_v41  ;;  %v6880_v1 = vpop.f32.mrf.mxu0  ;;  %4355 = vmatmul.mubr.msk.f32.gmra.mxu0 %vm2486_vm4, %v8065_v19  ;;  %3589 = vmatpush1.msra.mxu1 %v6692_v54  ;;  %v8160_v61 = vld [vmem:[#allocation61_spill] sm:$0xff]  ;;  %v2306_v7 = vcvt.f32.s32 %v6585_v0  ;;  %vm3774_vm4 = vcmp.lt.s32.totalorder %v5422_v32, 16 }
 0x471   :  { %v3521_v3 = vadd.f32 %v4291_v26, %v3520_v52  ;;  %v3243_v10 = vmul.f32 %v3115_v36, %v3115_v36  ;;  %v2280_v33 = vadd.s32 %v2279_v2, %v2277_v28  ;;  %v3116_v62 = vsub.f32 %v6880_v1, %v8157_v9  ;;  %3590 = vmatprep.subr.mxu1 %v6682_v56  ;;  %v8161_v2 = vld [vmem:[#allocation62_spill] sm:$0xff]  ;;  %v8163_v26 = vld [vmem:[#allocation65_spill] sm:$0xff] }
 0x472   :  { %v3369_v6 = vadd.f32 %v3368_v21, %v3242_v39  ;;  %v6887_v13 = vpop.f32.mrf.mxu0  ;;  %3591 = vmatpush1.msra.mxu1 %v6677_v24  ;;  %v2290_v48 = vpop.xlane.xlu1 %2289  ;;  %3003 = vmatprep.mubr.f32.mxu0 %v8058_v41 }
 0x473   :  { %vm2487_vm5 = vcmp.eq.s32.totalorder %v5422_v32, %v2280_v33  ;;  %v3244_v54 = vmul.f32 %v3116_v62, %v3116_v62  ;;  %v3117_v50 = vsub.f32 %v6887_v13, %v8158_v59  ;;  %v2291_v14 = vcvt.f32.s32 %v2290_v48  ;;  %3592 = vmatprep.subr.mxu1 %v6669_v58  ;;  %v8164_v62 = vld [vmem:[#allocation67_spill] sm:$0xff] }
 0x474   :  { %v3370_v27 = vadd.f32 %v3369_v6, %v3243_v10  ;;  %v4292_v56 = vsel %vm2487_vm5, 1.0, %v8058_v41  ;;  %v6896_v47 = vpop.f32.mrf.mxu0  ;;  %4356 = vmatmul.mubr.msk.f32.gmra.mxu0 %vm2487_vm5, %v8065_v19  ;;  %3593 = vmatpush1.msra.mxu1 %v6663_v11  ;;  %vm3801_vm5 = vcmp.lt.s32.totalorder %v5422_v32, 15 }
 0x475   :  { %v3522_v24 = vadd.f32 %v4292_v56, %v3521_v3  ;;  %v3245_v18 = vmul.f32 %v3117_v50, %v3117_v50  ;;  %v2294_v15 = vadd.s32 %v2293_v17, %v2291_v14  ;;  %v3118_v42 = vsub.f32 %v6896_v47, %v8159_v43  ;;  %3594 = vmatprep.subr.mxu1 %v6656_v40 }
 0x476   :  { %v3371_v55 = vadd.f32 %v3370_v27, %v3244_v54  ;;  %v6903_v52 = vpop.f32.mrf.mxu0  ;;  %3595 = vmatpush1.msra.mxu1 %v6650_v34  ;;  %3009 = vmatprep.mubr.f32.mxu0 %v8058_v41  ;;  %v2307_v3 = vshll.u32 %v2306_v7, 16  ;;  %v8165_v54 = vld [vmem:[#allocation68_spill] sm:$0xff] }
 0x477   :  { %vm2488_vm6 = vcmp.eq.s32.totalorder %v5422_v32, %v2294_v15  ;;  %v3246_v58 = vmul.f32 %v3118_v42, %v3118_v42  ;;  %v3119_v11 = vsub.f32 %v6903_v52, %v8160_v61  ;;  %3596 = vmatprep.subr.mxu1 %v6644_v35 }
 0x478   :  { %v3372_v5 = vadd.f32 %v3371_v55, %v3245_v18  ;;  %v4293_v12 = vsel %vm2488_vm6, 1.0, %v8058_v41  ;;  %v6912_v38 = vpop.f32.mrf.mxu0  ;;  %4357 = vmatmul.mubr.msk.f32.gmra.mxu0 %vm2488_vm6, %v8065_v19  ;;  %3597 = vmatpush1.msra.mxu1 %v6639_v16  ;;  %v8167_v55 = vld [vmem:[#allocation71_spill] sm:$0xff]  ;;  %vm3828_vm6 = vcmp.lt.s32.totalorder %v5422_v32, 1 }
 0x479   :  { %v3523_v34 = vadd.f32 %v4293_v12, %v3522_v24  ;;  %v3247_v40 = vmul.f32 %v3119_v11, %v3119_v11  ;;  %v3120_v51 = vsub.f32 %v6912_v38, %v8161_v2  ;;  %3598 = vmatprep.subr.mxu1 %v6631_v22  ;;  %3015 = vmatprep.mubr.f32.mxu0 %v8058_v41  ;;  %v8166_v24 = vld [vmem:[#allocation70_spill] sm:$0xff] }
 0x47a   :  { %v3373_v25 = vadd.f32 %v3372_v5, %v3246_v58  ;;  %v6920_v35 = vpop.f32.mrf.mxu0  ;;  %3599 = vmatpush1.msra.mxu1 %v6625_v45 }
 0x47b   :  { %v3248_v39 = vmul.f32 %v3120_v51, %v3120_v51  ;;  %v3121_v16 = vsub.f32 %v6920_v35, %v8162_v57  ;;  %3600 = vmatprep.subr.mxu1 %v6617_v20  ;;  %v8168_v51 = vld [vmem:[#allocation73_spill] sm:$0xff] }
 0x47c   :  { %v3374_v36 = vadd.f32 %v3373_v25, %v3247_v40  ;;  %3601 = vmatpush1.msra.mxu1 %v6611_v31  ;;  %v6928_v22 = vpop.f32.mrf.mxu0 }
 0x47d   :  { %v3249_v28 = vmul.f32 %v3121_v16, %v3121_v16  ;;  %3602 = vmatprep.subr.mxu1 %v6605_v30  ;;  %v3122_v45 = vsub.f32 %v6928_v22, %v8163_v26  ;;  %v8169_v16 = vld [vmem:[#allocation74_spill] sm:$0xff] }
 0x47e   :  { %v3375_v21 = vadd.f32 %v3374_v36, %v3248_v39  ;;  %3603 = vmatpush1.msra.mxu1 %v6600_v44  ;;  %v2304_v0 = vpop.xlane.xlu0 %2303  ;;  %v6934_v10 = vpop.f32.mrf.mxu0  ;;  %v2320_v44 = vcvt.f32.s32 %v6591_v23 }
 0x47f   :  { %v2305_v33 = vcvt.f32.s32 %v2304_v0  ;;  %v3250_v9 = vmul.f32 %v3122_v45, %v3122_v45  ;;  %v3123_v31 = vsub.f32 %v6934_v10, %v8164_v62  ;;  %v8170_v0 = vld [vmem:[#allocation76_spill] sm:$0xff] }
 0x480   :  { %v3376_v20 = vadd.f32 %v3375_v21, %v3249_v28  ;;  %v6938_v6 = vpop.f32.mrf.mxu0  ;;  %v2321_v11 = vshll.u32 %v2320_v44, 16 }
 0x481   :  { %v2308_v17 = vadd.s32 %v2307_v3, %v2305_v33  ;;  %v3251_v48 = vmul.f32 %v3123_v31, %v3123_v31  ;;  %v3124_v59 = vsub.f32 %v6938_v6, %v8165_v54  ;;  %v8171_v31 = vld [vmem:[#allocation77_spill] sm:$0xff] }
 0x482   :  { %v3377_v30 = vadd.f32 %v3376_v20, %v3250_v9  ;;  %v6944_v50 = vpop.f32.mrf.mxu0 }
 0x483   :  { %vm2489_vm7 = vcmp.eq.s32.totalorder %v5422_v32, %v2308_v17  ;;  %v3252_v56 = vmul.f32 %v3124_v59, %v3124_v59  ;;  %v3125_v18 = vsub.f32 %v6944_v50, %v8166_v24  ;;  %v8172_v59 = vld [vmem:[#allocation79_spill] sm:$0xff]  ;;  %v8173_v24 = vld [vmem:[#allocation80_spill] sm:$0xff] }
 0x484   :  { %v3378_v14 = vadd.f32 %v3377_v30, %v3251_v48  ;;  %v4294_v27 = vsel %vm2489_vm7, 1.0, %v8058_v41  ;;  %4358 = vmatmul.mubr.msk.f32.gmra.mxu0 %vm2489_vm7, %v8065_v19  ;;  %v6950_v43 = vpop.f32.mrf.mxu0  ;;  %vm3759_vm7 = vcmp.lt.s32.totalorder %v5422_v32, 17 }
 0x485   :  { %v3524_v15 = vadd.f32 %v4294_v27, %v3523_v34  ;;  %3021 = vmatprep.mubr.f32.mxu0 %v8058_v41  ;;  %v3253_v23 = vmul.f32 %v3125_v18, %v3125_v18  ;;  %v3126_v58 = vsub.f32 %v6950_v43, %v8167_v55 }
 0x486   :  { %v3379_v42 = vadd.f32 %v3378_v14, %v3252_v56  ;;  %v2318_v61 = vpop.xlane.xlu1 %2317  ;;  %v6955_v5 = vpop.f32.mrf.mxu0 }
 0x487   :  { %v2319_v12 = vcvt.f32.s32 %v2318_v61  ;;  %v3254_v2 = vmul.f32 %v3126_v58, %v3126_v58  ;;  %v3127_v25 = vsub.f32 %v6955_v5, %v8168_v51  ;;  %v8174_v58 = vld [vmem:[#allocation82_spill] sm:$0xff] }
 0x488   :  { %v3380_v40 = vadd.f32 %v3379_v42, %v3253_v23  ;;  %v6959_v7 = vpop.f32.mrf.mxu0 }
 0x489   :  { %v2322_v34 = vadd.s32 %v2321_v11, %v2319_v12  ;;  %v3255_v57 = vmul.f32 %v3127_v25, %v3127_v25  ;;  %v3128_v36 = vsub.f32 %v6959_v7, %v8169_v16 }
 0x48a   :  { %v3381_v39 = vadd.f32 %v3380_v40, %v3254_v2  ;;  %v6964_v28 = vpop.f32.mrf.mxu0  ;;  %v8175_v2 = vld [vmem:[#allocation83_spill] sm:$0xff] }
 0x48b   :  { %vm2490_vm8 = vcmp.eq.s32.totalorder %v5422_v32, %v2322_v34  ;;  %v3256_v45 = vmul.f32 %v3128_v36, %v3128_v36  ;;  %v3129_v3 = vsub.f32 %v6964_v28, %v8170_v0 }
 0x48c   :  { %v3382_v21 = vadd.f32 %v3381_v39, %v3255_v57  ;;  %v4295_v26 = vsel %vm2490_vm8, 1.0, %v8058_v41  ;;  %4359 = vmatmul.mubr.msk.f32.gmra.mxu0 %vm2490_vm8, %v8065_v19  ;;  %v6970_v20 = vpop.f32.mrf.mxu0  ;;  %vm3865_vm8 = vcmp.lt.s32.totalorder %v5422_v32, 127 }
 0x48d   :  { %v3525_v33 = vadd.f32 %v4295_v26, %v3524_v15  ;;  %3027 = vmatprep.mubr.f32.mxu0 %v8058_v41  ;;  %v3257_v62 = vmul.f32 %v3129_v3, %v3129_v3  ;;  %v3130_v17 = vsub.f32 %v6970_v20, %v8171_v31  ;;  %v2334_v15 = vcvt.f32.s32 %v6619_v4  ;;  %v8178_v31 = vld [vmem:[#allocation152_spill] sm:$0xff] }
 0x48e   :  { %v3383_v9 = vadd.f32 %v3382_v21, %v3256_v45  ;;  %v6975_v30 = vpop.f32.mrf.mxu0  ;;  %v8176_v21 = vld [vmem:[#allocation85_spill] sm:$0xff] }
 0x48f   :  { %v3258_v54 = vmul.f32 %v3130_v17, %v3130_v17  ;;  %v3131_v44 = vsub.f32 %v6975_v30, %v8172_v59  ;;  %v2335_v34 = vshll.u32 %v2334_v15, 16  ;;  %v2348_v17 = vcvt.f32.s32 %v8178_v31 }
 0x490   :  { %v3384_v48 = vadd.f32 %v3383_v9, %v3257_v62  ;;  %v6979_v14 = vpop.f32.mrf.mxu0  ;;  %v8177_v9 = vld [vmem:[#allocation86_spill] sm:$0xff] }
 0x491   :  { %v3259_v56 = vmul.f32 %v3131_v44, %v3131_v44  ;;  %v3132_v18 = vsub.f32 %v6979_v14, %v8173_v24 }
 0x492   :  { %v3385_v27 = vadd.f32 %v3384_v48, %v3258_v54  ;;  %v2863_v42 = vpop.f32.mrf.mxu0 }
 0x493   :  { %v3260_v55 = vmul.f32 %v3132_v18, %v3132_v18  ;;  %v3133_v61 = vsub.f32 %v2863_v42, %v8174_v58 }
 0x494   :  { %v3386_v23 = vadd.f32 %v3385_v27, %v3259_v56  ;;  %v2867_v11 = vpop.f32.mrf.mxu0  ;;  %v8179_v27 = vld [vmem:[#allocation88_spill] sm:$0xff] }
 0x495   :  { %v3261_v40 = vmul.f32 %v3133_v61, %v3133_v61  ;;  %v3134_v51 = vsub.f32 %v2867_v11, %v8175_v2 }
 0x496   :  { %v3387_v12 = vadd.f32 %v3386_v23, %v3260_v55  ;;  %v2332_v25 = vpop.xlane.xlu0 %2331  ;;  %v2869_v39 = vpop.f32.mrf.mxu0  ;;  %v8180_v55 = vld [vmem:[#allocation89_spill] sm:$0xff] }
 0x497   :  { %v2333_v57 = vcvt.f32.s32 %v2332_v25  ;;  %v3262_v36 = vmul.f32 %v3134_v51, %v3134_v51  ;;  %v3135_v26 = vsub.f32 %v2869_v39, %v8176_v21 }
 0x498   :  { %v3388_v16 = vadd.f32 %v3387_v12, %v3261_v40  ;;  %v2873_v4 = vpop.f32.mrf.mxu0  ;;  %v2349_v12 = vshll.u32 %v2348_v17, 16 }
 0x499   :  { %v2336_v45 = vadd.s32 %v2335_v34, %v2333_v57  ;;  %v3263_v3 = vmul.f32 %v3135_v26, %v3135_v26  ;;  %v3136_v62 = vsub.f32 %v2873_v4, %v8177_v9  ;;  %v8181_v34 = vld [vmem:[#allocation91_spill] sm:$0xff] }
 0x49a   :  { %v3389_v0 = vadd.f32 %v3388_v16, %v3262_v36  ;;  %v2875_v48 = vpop.f32.mrf.mxu0 }
 0x49b   :  { %vm2491_vm9 = vcmp.eq.s32.totalorder %v5422_v32, %v2336_v45  ;;  %v3264_v44 = vmul.f32 %v3136_v62, %v3136_v62  ;;  %v3137_v56 = vsub.f32 %v2875_v48, %v8179_v27  ;;  %v3557_v45 = vld [vmem:[%s7588_s4 + $0x8] sm:$0xff] }
 0x49c   :  { %v3390_v54 = vadd.f32 %v3389_v0, %v3263_v3  ;;  %v4296_v59 = vsel %vm2491_vm9, 1.0, %v8058_v41  ;;  %4360 = vmatmul.mubr.msk.f32.gmra.mxu0 %vm2491_vm9, %v8065_v19  ;;  %v2879_v18 = vpop.f32.mrf.mxu0  ;;  %3636 = vmatprep.mubr.f32.mxu1 %v3557_v45  ;;  %v8192_v45 = vld [vmem:[#allocation172_spill] sm:$0xff]  ;;  %vm3892_vm9 = vcmp.lt.s32.totalorder %v5422_v32, 113 }
 0x49d   :  { %v3526_v24 = vadd.f32 %v4296_v59, %v3525_v33  ;;  %3033 = vmatprep.mubr.f32.mxu0 %v8058_v41  ;;  %v3265_v23 = vmul.f32 %v3137_v56, %v3137_v56  ;;  %v3138_v58 = vsub.f32 %v2879_v18, %v8180_v55  ;;  %v8187_v59 = vld [vmem:[#allocation94_spill] sm:$0xff]  ;;  %v8188_v56 = vld [vmem:[#allocation95_spill] sm:$0xff] }
 0x49e   :  { %v3391_v15 = vadd.f32 %v3390_v54, %v3264_v44  ;;  %v2346_v61 = vpop.xlane.xlu1 %2345  ;;  %v2881_v40 = vpop.f32.mrf.mxu0 }
 0x49f   :  { %v2347_v2 = vcvt.f32.s32 %v2346_v61  ;;  %v3266_v25 = vmul.f32 %v3138_v58, %v3138_v58  ;;  %v3139_v57 = vsub.f32 %v2881_v40, %v8181_v34  ;;  %3604 = vmatprep.subr.mxu1 %v2881_v40 }
 0x4a0   :  { %v3392_v51 = vadd.f32 %v3391_v15, %v3265_v23  ;;  %3605 = vmatpush2.msra.mxu1 %v2879_v18  ;;  %v8189_v23 = vld [vmem:[#allocation171_spill] sm:$0xff] }
 0x4a1   :  { %v2350_v16 = vadd.s32 %v2349_v12, %v2347_v2  ;;  %v3267_v33 = vmul.f32 %v3139_v57, %v3139_v57  ;;  %3606 = vmatprep.subr.mxu1 %v2875_v48  ;;  %v2418_v55 = vcvt.f32.s32 %v8189_v23 }
 0x4a2   :  { %v3393_v36 = vadd.f32 %v3392_v51, %v3266_v25  ;;  %3607 = vmatpush2.msra.mxu1 %v2873_v4  ;;  %v8190_v51 = vld [vmem:[#allocation97_spill] sm:$0xff] }
 0x4a3   :  { %vm2492_vm10 = vcmp.eq.s32.totalorder %v5422_v32, %v2350_v16  ;;  %3608 = vmatprep.subr.mxu1 %v2869_v39  ;;  %v8182_v39 = vld [vmem:[#allocation169_spill] sm:$0xff]  ;;  %v2419_v57 = vshll.u32 %v2418_v55, 16 }
 0x4a4   :  { %v6997_v21 = vadd.f32 %v3393_v36, %v3267_v33  ;;  %v4297_v26 = vsel %vm2492_vm10, 1.0, %v8058_v41  ;;  %4361 = vmatmul.mubr.msk.f32.gmra.mxu0 %vm2492_vm10, %v8065_v19  ;;  %3609 = vmatpush2.msra.mxu1 %v2867_v11  ;;  %v2362_v4 = vcvt.f32.s32 %v8182_v39  ;;  %v8191_v36 = vld [vmem:[#allocation98_spill] sm:$0xff]  ;;  %vm3919_vm10 = vcmp.lt.s32.totalorder %v5422_v32, 112 }
 0x4a5   :  { %v3527_v0 = vadd.f32 %v4297_v26, %v3526_v24  ;;  %3039 = vmatprep.mubr.f32.mxu0 %v8058_v41  ;;  %3610 = vmatprep.subr.mxu1 %v2863_v42 }
 0x4a6   :  { %3611 = vmatpush2.msra.mxu1 %v6979_v14  ;;  %v2363_v11 = vshll.u32 %v2362_v4, 16 }
 0x4a7   :  { %3612 = vmatprep.subr.mxu1 %v6975_v30  ;;  %v8186_v30 = vld [vmem:[#allocation92_spill] sm:$0xff] }
 0x4a8   :  { %3613 = vmatpush2.msra.mxu1 %v6970_v20 }
 0x4a9   :  { %3614 = vmatprep.subr.mxu1 %v6964_v28 }
 0x4aa   :  { %3615 = vmatpush2.msra.mxu1 %v6959_v7 }
 0x4ab   :  { %3616 = vmatprep.subr.mxu1 %v6955_v5  ;;  %v8183_v5 = vld [vmem:[#allocation144_spill] sm:$0xff] }
 0x4ac   :  { %3617 = vmatpush2.msra.mxu1 %v6950_v43  ;;  %v2376_v43 = vcvt.f32.s32 %v8183_v5 }
 0x4ad   :  { %3618 = vmatprep.subr.mxu1 %v6944_v50 }
 0x4ae   :  { %v2360_v42 = vpop.xlane.xlu0 %2359  ;;  %3619 = vmatpush2.msra.mxu1 %v6938_v6 }
 0x4af   :  { %v2361_v14 = vcvt.f32.s32 %v2360_v42  ;;  %3620 = vmatprep.subr.mxu1 %v6934_v10 }
 0x4b0   :  { %3621 = vmatpush2.msra.mxu1 %v6928_v22  ;;  %v2377_v22 = vshll.u32 %v2376_v43, 16 }
 0x4b1   :  { %v2364_v20 = vadd.s32 %v2363_v11, %v2361_v14  ;;  %3622 = vmatprep.subr.mxu1 %v6920_v35 }
 0x4b2   :  { %3623 = vmatpush2.msra.mxu1 %v6912_v38 }
 0x4b3   :  { %vm2493_vm11 = vcmp.eq.s32.totalorder %v5422_v32, %v2364_v20  ;;  %3624 = vmatprep.subr.mxu1 %v6903_v52  ;;  %v7044_v52 = vpop.f32.mrf.mxu0  ;;  %v8193_v20 = vld [vmem:[#allocation100_spill] sm:$0xff] }
 0x4b4   :  { %v4298_v50 = vsel %vm2493_vm11, 1.0, %v8058_v41  ;;  %4362 = vmatmul.mubr.msk.f32.gmra.mxu0 %vm2493_vm11, %v8065_v19  ;;  %3625 = vmatpush2.msra.mxu1 %v6896_v47  ;;  %v3140_v3 = vsub.f32 %v7044_v52, %v8186_v30  ;;  %vm3942_vm11 = vcmp.lt.s32.totalorder %v5422_v32, 111 }
 0x4b5   :  { %v3528_v6 = vadd.f32 %v4298_v50, %v3527_v0  ;;  %3045 = vmatprep.mubr.f32.mxu0 %v8058_v41  ;;  %3626 = vmatprep.subr.mxu1 %v6887_v13  ;;  %v2432_v0 = vcvt.f32.s32 %v8192_v45 }
 0x4b6   :  { %3627 = vmatpush2.msra.mxu1 %v6880_v1  ;;  %v3268_v54 = vmul.f32 %v3140_v3, %v3140_v3  ;;  %v8196_v3 = vld [vmem:[#allocation104_spill] sm:$0xff] }
 0x4b7   :  { %v2374_v35 = vpop.xlane.xlu1 %2373  ;;  %3628 = vmatprep.subr.mxu1 %v6871_v49  ;;  %v3556_v49 = vld [vmem:[%s7588_s4] sm:$0xff]  ;;  %v2433_v50 = vshll.u32 %v2432_v0, 16 }
 0x4b8   :  { %v2375_v38 = vcvt.f32.s32 %v2374_v35  ;;  %3629 = vmatpush2.msra.mxu1 %v6863_v29  ;;  %v3395_v58 = vadd.f32 %v6997_v21, %v3268_v54 }
 0x4b9   :  { %3630 = vmatprep.subr.mxu1 %v6854_v46 }
 0x4ba   :  { %v2378_v10 = vadd.s32 %v2377_v22, %v2375_v38  ;;  %3631 = vmatpush2.msra.mxu1 %v6846_v63  ;;  %v8184_v63 = vld [vmem:[#allocation170_spill] sm:$0xff]  ;;  %v8194_v38 = vld [vmem:[#allocation101_spill] sm:$0xff] }
 0x4bb   :  { %3632 = vmatprep.subr.mxu1 %v6837_v8  ;;  %v2390_v46 = vcvt.f32.s32 %v8184_v63 }
 0x4bc   :  { %vm2494_vm12 = vcmp.eq.s32.totalorder %v5422_v32, %v2378_v10  ;;  %3633 = vmatpush2.msra.mxu1 %v6829_v37  ;;  %v8185_v37 = vld [vmem:[#allocation157_spill] sm:$0xff] }
 0x4bd   :  { %v4299_v13 = vsel %vm2494_vm12, 1.0, %v8058_v41  ;;  %4363 = vmatmul.mubr.msk.f32.gmra.mxu0 %vm2494_vm12, %v8065_v19  ;;  %3634 = vmatprep.subr.mxu1 %v6821_v60  ;;  %v2391_v1 = vshll.u32 %v2390_v46, 16  ;;  %v2404_v7 = vcvt.f32.s32 %v8185_v37  ;;  %v7050_v60 = vpop.f32.mrf.mxu0  ;;  %vm4141_vm12 = vcmask 1040384  }
 0x4be   :  { %v3529_v29 = vadd.f32 %v4299_v13, %v3528_v6  ;;  %3051 = vmatprep.mubr.f32.mxu0 %v8058_v41  ;;  %3635 = vmatpush2.msra.mxu1 %v6815_v53  ;;  %v3141_v44 = vsub.f32 %v7050_v60, %v8187_v59 }
 0x4bf   :  { %3637 = vmatmul.mubr.f32.vlgmr.msra.gmra.mxu1 %v3556_v49  ;;  %v2405_v53 = vshll.u32 %v2404_v7, 16  ;;  %v7055_v48 = vpop.f32.mrf.mxu0 }
 0x4c0   :  { %v3142_v24 = vsub.f32 %v7055_v48, %v8188_v56  ;;  %v3269_v61 = vmul.f32 %v3141_v44, %v3141_v44 }
 0x4c1   :  { %v7062_v18 = vpop.f32.mrf.mxu0 }
 0x4c2   :  { %v2388_v8 = vpop.xlane.xlu0 %2387  ;;  %v3270_v2 = vmul.f32 %v3142_v24, %v3142_v24  ;;  %v3143_v25 = vsub.f32 %v7062_v18, %v8190_v51  ;;  %v3396_v16 = vadd.f32 %v3395_v58, %v3269_v61 }
 0x4c3   :  { %v2389_v47 = vcvt.f32.s32 %v2388_v8  ;;  %v7069_v40 = vpop.f32.mrf.mxu0 }
 0x4c4   :  { %v3144_v33 = vsub.f32 %v7069_v40, %v8191_v36  ;;  %v3397_v39 = vadd.f32 %v3396_v16, %v3270_v2  ;;  %v3271_v4 = vmul.f32 %v3143_v25, %v3143_v25  ;;  %v8199_v25 = vld [vmem:[#allocation109_spill] sm:$0xff]  ;;  %v8200_v36 = vld [vmem:[#allocation110_spill] sm:$0xff] }
 0x4c5   :  { %v2392_v28 = vadd.s32 %v2391_v1, %v2389_v47  ;;  %v7076_v21 = vpop.f32.mrf.mxu0  ;;  %v8195_v47 = vld [vmem:[#allocation103_spill] sm:$0xff] }
 0x4c6   :  { %v3272_v14 = vmul.f32 %v3144_v33, %v3144_v33  ;;  %v3145_v5 = vsub.f32 %v7076_v21, %v8193_v20  ;;  %v3398_v22 = vadd.f32 %v3397_v39, %v3271_v4 }
 0x4c7   :  { %vm2495_vm13 = vcmp.eq.s32.totalorder %v5422_v32, %v2392_v28  ;;  %v7078_v11 = vpop.f32.mrf.mxu0 }
 0x4c8   :  { %v4300_v9 = vsel %vm2495_vm13, 1.0, %v8058_v41  ;;  %v2402_v62 = vpop.xlane.xlu1 %2401  ;;  %4364 = vmatmul.mubr.msk.f32.gmra.mxu0 %vm2495_vm13, %v8065_v19  ;;  %v3146_v10 = vsub.f32 %v7078_v11, %v8194_v38  ;;  %v3399_v63 = vadd.f32 %v3398_v22, %v3272_v14  ;;  %v3273_v46 = vmul.f32 %v3145_v5, %v3145_v5  ;;  %v8201_v14 = vld [vmem:[#allocation112_spill] sm:$0xff] }
 0x4c9   :  { %v3530_v31 = vadd.f32 %v4300_v9, %v3529_v29  ;;  %v2403_v17 = vcvt.f32.s32 %v2402_v62  ;;  %3057 = vmatprep.mubr.f32.mxu0 %v8058_v41  ;;  %v7088_v49 = vpop.f32.mrf.mxu0 }
 0x4ca   :  { %v3274_v1 = vmul.f32 %v3146_v10, %v3146_v10  ;;  %v3147_v37 = vsub.f32 %v7088_v49, %v8195_v47  ;;  %v3400_v30 = vadd.f32 %v3399_v63, %v3273_v46 }
 0x4cb   :  { %v2406_v27 = vadd.s32 %v2405_v53, %v2403_v17  ;;  %v7090_v8 = vpop.f32.mrf.mxu0 }
 0x4cc   :  { %v3148_v9 = vsub.f32 %v7090_v8, %v8196_v3  ;;  %v3275_v17 = vmul.f32 %v3147_v37, %v3147_v37  ;;  %v8204_v37 = vld [vmem:[#allocation116_spill] sm:$0xff] }
 0x4cd   :  { %vm2496_vm14 = vcmp.eq.s32.totalorder %v5422_v32, %v2406_v27  ;;  %v7099_v62 = vpop.f32.mrf.mxu0  ;;  %v8197_v27 = vld [vmem:[#allocation106_spill] sm:$0xff] }
 0x4ce   :  { %v4301_v15 = vsel %vm2496_vm14, 1.0, %v8058_v41  ;;  %4365 = vmatmul.mubr.msk.f32.gmra.mxu0 %vm2496_vm14, %v8065_v19  ;;  %v3276_v44 = vmul.f32 %v3148_v9, %v3148_v9  ;;  %v3149_v56 = vsub.f32 %v7099_v62, %v8197_v27 }
 0x4cf   :  { %v3531_v12 = vadd.f32 %v4301_v15, %v3530_v31  ;;  %3063 = vmatprep.mubr.f32.mxu0 %v8058_v41  ;;  %v3401_v31 = vadd.f32 %v3400_v30, %v3274_v1 }
 0x4d0   :  { %v3277_v61 = vmul.f32 %v3149_v56, %v3149_v56 }
 0x4d1   :  { %v3402_v24 = vadd.f32 %v3401_v31, %v3275_v17 }
 0x4d2   :  { %v2416_v34 = vpop.xlane.xlu0 %2415 }
 0x4d3   :  { %v2417_v26 = vcvt.f32.s32 %v2416_v34  ;;  %v3403_v58 = vadd.f32 %v3402_v24, %v3276_v44 }
 0x4d5   :  { %v2420_v42 = vadd.s32 %v2419_v57, %v2417_v26  ;;  %v3404_v16 = vadd.f32 %v3403_v58, %v3277_v61 }
 0x4d7   :  { %vm2497_vm15 = vcmp.eq.s32.totalorder %v5422_v32, %v2420_v42  ;;  %v2430_v43 = vpop.xlane.xlu1 %2429 }
 0x4d8   :  { %v4302_v6 = vsel %vm2497_vm15, 1.0, %v8058_v41  ;;  %v2431_v35 = vcvt.f32.s32 %v2430_v43  ;;  %4366 = vmatmul.mubr.msk.f32.gmra.mxu0 %vm2497_vm15, %v8065_v19  ;;  %v7101_v59 = vpop.f32.mrf.mxu0 }
 0x4d9   :  { %v3532_v13 = vadd.f32 %v4302_v6, %v3531_v12  ;;  %3069 = vmatprep.mubr.f32.mxu0 %v8058_v41 }
 0x4da   :  { %v2434_v29 = vadd.s32 %v2433_v50, %v2431_v35  ;;  %v7107_v23 = vpop.f32.mrf.mxu0  ;;  %v8202_v50 = vld [vmem:[#allocation113_spill] sm:$0xff] }
 0x4db   :  { %v3151_v34 = vsub.f32 %v7107_v23, %v8199_v25 }
 0x4dc   :  { %vm2498_vm0 = vcmp.eq.s32.totalorder %v5422_v32, %v2434_v29 }
 0x4dd   :  { %v4303_v7 = vsel %vm2498_vm0, 1.0, %v8058_v41  ;;  %4367 = vmatmul.mubr.msk.f32.gmra.mxu0 %vm2498_vm0, %v8065_v19  ;;  %v8198_v19 = vld [vmem:[#allocation107_spill] sm:$0xff]  ;;  %v3279_v39 = vmul.f32 %v3151_v34, %v3151_v34  ;;  %v8208_v34 = vld [vmem:[#allocation18_spill] sm:$0xff] }
 0x4de   :  { %v3533_v28 = vadd.f32 %v4303_v7, %v3532_v13  ;;  %v3150_v15 = vsub.f32 %v7101_v59, %v8198_v19  ;;  %v8203_v13 = vld [vmem:[#allocation115_spill] sm:$0xff] }
 0x4e0   :  { %v3534_v53 = vrot.slane %v3533_v28, 4  ;;  %v7109_v12 = vpop.f32.mrf.mxu0  ;;  %v3278_v51 = vmul.f32 %v3150_v15, %v3150_v15 }
 0x4e1   :  { %v3152_v33 = vsub.f32 %v7109_v12, %v8200_v36 }
 0x4e2   :  { %v3535_v54 = vadd.f32 %v3534_v53, %v3533_v28  ;;  %v7115_v26 = vpop.f32.mrf.mxu0  ;;  %v3405_v0 = vadd.f32 %v3404_v16, %v3278_v51  ;;  %v8205_v53 = vld [vmem:[#allocation118_spill] sm:$0xff] }
 0x4e3   :  { %v3280_v42 = vmul.f32 %v3152_v33, %v3152_v33  ;;  %v3153_v20 = vsub.f32 %v7115_v26, %v8201_v14  ;;  %v8210_v14 = vld [vmem:[#allocation24_spill] sm:$0xff] }
 0x4e4   :  { %v3536_v41 = vrot.slane %v3535_v54, 2  ;;  %v3406_v43 = vadd.f32 %v3405_v0, %v3279_v39 }
 0x4e5   :  { %v3281_v38 = vmul.f32 %v3153_v20, %v3153_v20 }
 0x4e6   :  { %v3537_v55 = vadd.f32 %v3536_v41, %v3535_v54  ;;  %v3407_v22 = vadd.f32 %v3406_v43, %v3280_v42  ;;  %v8206_v41 = vld [vmem:[#allocation119_spill] sm:$0xff] }
 0x4e8   :  { %v3538_v2 = vrot.slane %v3537_v55, 1  ;;  %v3408_v46 = vadd.f32 %v3407_v22, %v3281_v38  ;;  %v8211_v22 = vld [vmem:[#allocation27_spill] sm:$0xff] }
 0x4ea   :  { %v3539_v57 = vadd.f32 %v3538_v2, %v3537_v55  ;;  %v8207_v55 = vld [vmem:[#allocation121_spill] sm:$0xff] }
 0x4ec   :  { %v3540_v45 = vmul.f32 0.001953125, %v3539_v57 }
 0x4ee   :  { %v3541_v4 = vadd.f32 1e-10, %v3540_v45 }
 0x4f0   :  { %v7119_v5 = vpop.f32.mrf.mxu0  ;;  %4392 = vlog2.f32 %v3541_v4 }
 0x4f1   :  { %v3154_v6 = vsub.f32 %v7119_v5, %v8202_v50 }
 0x4f2   :  { %v7123_v35 = vpop.f32.mrf.mxu0 }
 0x4f3   :  { %v3282_v10 = vmul.f32 %v3154_v6, %v3154_v6  ;;  %v3155_v29 = vsub.f32 %v7123_v35, %v8203_v13 }
 0x4f4   :  { %v7127_v63 = vpop.f32.mrf.mxu0 }
 0x4f5   :  { %v3409_v1 = vadd.f32 %v3408_v46, %v3282_v10  ;;  %v3283_v47 = vmul.f32 %v3155_v29, %v3155_v29  ;;  %v3156_v7 = vsub.f32 %v7127_v63, %v8204_v37  ;;  %v8212_v46 = vld [vmem:[#allocation30_spill] sm:$0xff] }
 0x4f6   :  { %v7131_v28 = vpop.f32.mrf.mxu0 }
 0x4f7   :  { %v3410_v3 = vadd.f32 %v3409_v1, %v3283_v47  ;;  %v3284_v9 = vmul.f32 %v3156_v7, %v3156_v7  ;;  %v3157_v31 = vsub.f32 %v7131_v28, %v8205_v53 }
 0x4f9   :  { %v3411_v27 = vadd.f32 %v3410_v3, %v3284_v9  ;;  %v3285_v56 = vmul.f32 %v3157_v31, %v3157_v31  ;;  %v8213_v3 = vld [vmem:[#allocation33_spill] sm:$0xff] }
 0x4fb   :  { %v3412_v61 = vadd.f32 %v3411_v27, %v3285_v56  ;;  %v8214_v27 = vld [vmem:[#allocation36_spill] sm:$0xff] }
 0x4fd   :  { %v4393_v30 = vpop.eup %4392 }
 0x4fe   :  { %v3543_v17 = vmul.f32 0.6931472, %v4393_v30 }
 0x500   :  { %v7135_v54 = vpop.f32.mrf.mxu0  ;;  %v3544_v44 = vmul.f32 %v3543_v17, %v3540_v45  ;;  %v8209_v45 = vld [vmem:[#allocation21_spill] sm:$0xff] }
 0x501   :  { %v3158_v24 = vsub.f32 %v7135_v54, %v8206_v41 }
 0x502   :  { %3545 = vadd.xlane.f32.xlu1 %v3544_v44  ;;  %v2941_v19 = vpop.f32.mrf.mxu0 }
 0x503   :  { %v3286_v15 = vmul.f32 %v3158_v24, %v3158_v24  ;;  %v3159_v58 = vsub.f32 %v2941_v19, %v8207_v55 }
 0x505   :  { %v2945_v2 = vpop.f32.mrf.mxu0  ;;  %v3413_v51 = vadd.f32 %v3412_v61, %v3286_v15  ;;  %v3287_v25 = vmul.f32 %v3159_v58, %v3159_v58  ;;  %v8215_v58 = vld [vmem:[#allocation39_spill] sm:$0xff] }
 0x506   :  { %v3160_v57 = vsub.f32 %v2945_v2, %v8208_v34 }
 0x507   :  { %v2947_v16 = vpop.f32.mrf.mxu0  ;;  %v3414_v36 = vadd.f32 %v3413_v51, %v3287_v25 }
 0x508   :  { %v3288_v33 = vmul.f32 %v3160_v57, %v3160_v57  ;;  %v3161_v0 = vsub.f32 %v2947_v16, %v8209_v45  ;;  %v8216_v57 = vld [vmem:[#allocation42_spill] sm:$0xff] }
 0x50a   :  { %v3415_v39 = vadd.f32 %v3414_v36, %v3288_v33  ;;  %v3289_v4 = vmul.f32 %v3161_v0, %v3161_v0  ;;  %v8217_v0 = vld [vmem:[#allocation45_spill] sm:$0xff] }
 0x50c   :  { %v3416_v50 = vadd.f32 %v3415_v39, %v3289_v4 }
 0x510   :  { %v2951_v42 = vpop.f32.mrf.mxu0 }
 0x511   :  { %v3162_v20 = vsub.f32 %v2951_v42, %v8210_v14 }
 0x512   :  { %v2953_v43 = vpop.f32.mrf.mxu0 }
 0x513   :  { %v3290_v6 = vmul.f32 %v3162_v20, %v3162_v20  ;;  %v3163_v38 = vsub.f32 %v2953_v43, %v8211_v22  ;;  %v8218_v20 = vld [vmem:[#allocation48_spill] sm:$0xff] }
 0x514   :  { %v2957_v10 = vpop.f32.mrf.mxu0 }
 0x515   :  { %v3417_v13 = vadd.f32 %v3416_v50, %v3290_v6  ;;  %v3291_v29 = vmul.f32 %v3163_v38, %v3163_v38  ;;  %v3164_v1 = vsub.f32 %v2957_v10, %v8212_v46  ;;  %v3561_v6 = vld [vmem:[%s7588_s4 + $0x28] sm:$0xff]  ;;  %v8221_v46 = vld [vmem:[#allocation57_spill] sm:$0xff] }
 0x516   :  { %v2959_v47 = vpop.f32.mrf.mxu0  ;;  %3642 = vmatprep.mubr.f32.mxu1 %v3561_v6 }
 0x517   :  { %v3418_v7 = vadd.f32 %v3417_v13, %v3291_v29  ;;  %v3292_v30 = vmul.f32 %v3164_v1, %v3164_v1  ;;  %v3165_v9 = vsub.f32 %v2959_v47, %v8213_v3  ;;  %v8219_v13 = vld [vmem:[#allocation51_spill] sm:$0xff] }
 0x518   :  { %v2963_v37 = vpop.f32.mrf.mxu0 }
 0x519   :  { %v3419_v17 = vadd.f32 %v3418_v7, %v3292_v30  ;;  %v3293_v44 = vmul.f32 %v3165_v9, %v3165_v9  ;;  %v3166_v56 = vsub.f32 %v2963_v37, %v8214_v27  ;;  %v8223_v30 = vld [vmem:[#allocation63_spill] sm:$0xff]  ;;  %v8224_v9 = vld [vmem:[#allocation66_spill] sm:$0xff] }
 0x51a   :  { %v2965_v53 = vpop.f32.mrf.mxu0 }
 0x51b   :  { %v3420_v15 = vadd.f32 %v3419_v17, %v3293_v44  ;;  %v3294_v55 = vmul.f32 %v3166_v56, %v3166_v56  ;;  %v3167_v61 = vsub.f32 %v2965_v53, %v8215_v58  ;;  %v8225_v44 = vld [vmem:[#allocation69_spill] sm:$0xff] }
 0x51c   :  { %v2969_v31 = vpop.f32.mrf.mxu0 }
 0x51d   :  { %v3421_v25 = vadd.f32 %v3420_v15, %v3294_v55  ;;  %v3295_v34 = vmul.f32 %v3167_v61, %v3167_v61  ;;  %v3168_v36 = vsub.f32 %v2969_v31, %v8216_v57  ;;  %v8227_v61 = vld [vmem:[#allocation75_spill] sm:$0xff] }
 0x51e   :  { %v2971_v41 = vpop.f32.mrf.mxu0 }
 0x51f   :  { %v3422_v33 = vadd.f32 %v3421_v25, %v3295_v34  ;;  %v3296_v45 = vmul.f32 %v3168_v36, %v3168_v36  ;;  %v3169_v39 = vsub.f32 %v2971_v41, %v8217_v0  ;;  %v8228_v36 = vld [vmem:[#allocation78_spill] sm:$0xff] }
 0x520   :  { %v2975_v24 = vpop.f32.mrf.mxu0 }
 0x521   :  { %v3423_v4 = vadd.f32 %v3422_v33, %v3296_v45  ;;  %v3297_v14 = vmul.f32 %v3169_v39, %v3169_v39  ;;  %v3170_v50 = vsub.f32 %v2975_v24, %v8218_v20 }
 0x522   :  { %v2977_v51 = vpop.f32.mrf.mxu0 }
 0x523   :  { %3661 = vmatprep.subr.mxu1 %v2977_v51  ;;  %v3424_v22 = vadd.f32 %v3423_v4, %v3297_v14  ;;  %v3298_v38 = vmul.f32 %v3170_v50, %v3170_v50  ;;  %v3171_v29 = vsub.f32 %v2977_v51, %v8219_v13  ;;  %v8229_v4 = vld [vmem:[#allocation81_spill] sm:$0xff] }
 0x524   :  { %3662 = vmatpush1.msra.mxu1 %v2975_v24  ;;  %v8226_v24 = vld [vmem:[#allocation72_spill] sm:$0xff] }
 0x525   :  { %3663 = vmatprep.subr.mxu1 %v2971_v41 }
 0x526   :  { %3664 = vmatpush1.msra.mxu1 %v2969_v31 }
 0x527   :  { %3665 = vmatprep.subr.mxu1 %v2965_v53 }
 0x528   :  { %3666 = vmatpush1.msra.mxu1 %v2963_v37  ;;  %v8222_v37 = vld [vmem:[#allocation60_spill] sm:$0xff] }
 0x529   :  { %3667 = vmatprep.subr.mxu1 %v2959_v47 }
 0x52a   :  { %3668 = vmatpush1.msra.mxu1 %v2957_v10 }
 0x52b   :  { %3669 = vmatprep.subr.mxu1 %v2953_v43 }
 0x52c   :  { %3670 = vmatpush1.msra.mxu1 %v2951_v42  ;;  %v3560_v42 = vld [vmem:[%s7588_s4 + $0x20] sm:$0xff] }
 0x52d   :  { %3671 = vmatprep.subr.mxu1 %v2947_v16  ;;  %v7160_v16 = vpop.f32.mrf.mxu0  ;;  %3643 = vmatmul.mubr.f32.gmra.mxu1 %v3560_v42 }
 0x52e   :  { %3672 = vmatpush1.msra.mxu1 %v2945_v2  ;;  %v8220_v2 = vld [vmem:[#allocation54_spill] sm:$0xff] }
 0x52f   :  { %3673 = vmatprep.subr.mxu1 %v2941_v19  ;;  %v3425_v19 = vadd.f32 %v3424_v22, %v3298_v38  ;;  %v3172_v43 = vsub.f32 %v7160_v16, %v8220_v2  ;;  %v8230_v22 = vld [vmem:[#allocation84_spill] sm:$0xff]  ;;  %v8232_v2 = vld [vmem:[#allocation90_spill] sm:$0xff] }
 0x530   :  { %3674 = vmatpush1.msra.mxu1 %v7135_v54  ;;  %v3565_v54 = vld [vmem:[%s7588_s4 + $0x48] sm:$0xff] }
 0x531   :  { %3675 = vmatprep.subr.mxu1 %v7131_v28  ;;  %v3299_v28 = vmul.f32 %v3171_v29, %v3171_v29  ;;  %3648 = vmatprep.mubr.f32.mxu1 %v3565_v54 }
 0x532   :  { %3676 = vmatpush1.msra.mxu1 %v7127_v63  ;;  %v3564_v63 = vld [vmem:[%s7588_s4 + $0x40] sm:$0xff] }
 0x533   :  { %3677 = vmatprep.subr.mxu1 %v7123_v35  ;;  %v7174_v35 = vpop.f32.mrf.mxu0  ;;  %3649 = vmatmul.mubr.f32.gmra.mxu1 %v3564_v63  ;;  %v3426_v10 = vadd.f32 %v3425_v19, %v3299_v28  ;;  %v8231_v19 = vld [vmem:[#allocation87_spill] sm:$0xff] }
 0x534   :  { %3678 = vmatpush1.msra.mxu1 %v7119_v5  ;;  %v3569_v5 = vld [vmem:[%s7588_s4 + $0x68] sm:$0xff]  ;;  %v3173_v1 = vsub.f32 %v7174_v35, %v8221_v46 }
 0x535   :  { %3679 = vmatprep.subr.mxu1 %v7115_v26  ;;  %v3300_v26 = vmul.f32 %v3172_v43, %v3172_v43  ;;  %3654 = vmatprep.mubr.f32.mxu1 %v3569_v5 }
 0x536   :  { %3680 = vmatpush1.msra.mxu1 %v7109_v12  ;;  %v3568_v12 = vld [vmem:[%s7588_s4 + $0x60] sm:$0xff]  ;;  %v3301_v47 = vmul.f32 %v3173_v1, %v3173_v1  ;;  %v8233_v1 = vld [vmem:[#allocation93_spill] sm:$0xff] }
 0x537   :  { %3681 = vmatprep.subr.mxu1 %v7107_v23  ;;  %v7188_v23 = vpop.f32.mrf.mxu0  ;;  %3655 = vmatmul.mubr.f32.gmra.mxu1 %v3568_v12 }
 0x538   :  { %3682 = vmatpush1.msra.mxu1 %v7101_v59  ;;  %v3427_v59 = vadd.f32 %v3426_v10, %v3300_v26  ;;  %v3174_v7 = vsub.f32 %v7188_v23, %v8222_v37 }
 0x539   :  { %3683 = vmatprep.subr.mxu1 %v7099_v62  ;;  %v7196_v62 = vpop.f32.mrf.mxu0 }
 0x53a   :  { %3684 = vmatpush1.msra.mxu1 %v7090_v8  ;;  %v3302_v8 = vmul.f32 %v3174_v7, %v3174_v7  ;;  %v3175_v3 = vsub.f32 %v7196_v62, %v8223_v30 }
 0x53b   :  { %3685 = vmatprep.subr.mxu1 %v7088_v49  ;;  %v3559_v49 = vld [vmem:[%s7588_s4 + $0x18] sm:$0xff] }
 0x53c   :  { %3686 = vmatpush1.msra.mxu1 %v7078_v11  ;;  %3725 = vmatprep.mubr.f32.mxu1 %v3559_v49  ;;  %v3428_v11 = vadd.f32 %v3427_v59, %v3301_v47  ;;  %v8234_v47 = vld [vmem:[#allocation96_spill] sm:$0xff] }
 0x53d   :  { %3687 = vmatprep.subr.mxu1 %v7076_v21  ;;  %v7207_v21 = vpop.f32.mrf.mxu0 }
 0x53e   :  { %3688 = vmatpush1.msra.mxu1 %v7069_v40  ;;  %v3429_v40 = vadd.f32 %v3428_v11, %v3302_v8  ;;  %v3176_v53 = vsub.f32 %v7207_v21, %v8224_v9  ;;  %v8236_v9 = vld [vmem:[#allocation102_spill] sm:$0xff] }
 0x53f   :  { %3689 = vmatprep.subr.mxu1 %v7062_v18  ;;  %v3303_v18 = vmul.f32 %v3175_v3, %v3175_v3  ;;  %v7212_v31 = vpop.f32.mrf.mxu0  ;;  %v8235_v3 = vld [vmem:[#allocation99_spill] sm:$0xff] }
 0x540   :  { %3690 = vmatpush1.msra.mxu1 %v7055_v48  ;;  %v3304_v17 = vmul.f32 %v3176_v53, %v3176_v53  ;;  %v3177_v27 = vsub.f32 %v7212_v31, %v8225_v44 }
 0x541   :  { %3691 = vmatprep.subr.mxu1 %v7050_v60  ;;  %v3430_v48 = vadd.f32 %v3429_v40, %v3303_v18  ;;  %v7216_v56 = vpop.f32.mrf.mxu0 }
 0x542   :  { %3692 = vmatpush1.msra.mxu1 %v7044_v52  ;;  %v3305_v60 = vmul.f32 %v3177_v27, %v3177_v27  ;;  %v3178_v15 = vsub.f32 %v7216_v56, %v8226_v24 }
 0x543   :  { %v3431_v41 = vadd.f32 %v3430_v48, %v3304_v17  ;;  %v7220_v52 = vpop.f32.mrf.mxu0 }
 0x544   :  { %v3306_v58 = vmul.f32 %v3178_v15, %v3178_v15  ;;  %v3179_v51 = vsub.f32 %v7220_v52, %v8227_v61 }
 0x545   :  { %v3432_v55 = vadd.f32 %v3431_v41, %v3305_v60  ;;  %v7224_v25 = vpop.f32.mrf.mxu0  ;;  %v8237_v60 = vld [vmem:[#allocation105_spill] sm:$0xff] }
 0x546   :  { %v3307_v57 = vmul.f32 %v3179_v51, %v3179_v51  ;;  %v3180_v33 = vsub.f32 %v7224_v25, %v8228_v36 }
 0x547   :  { %v3433_v34 = vadd.f32 %v3432_v55, %v3306_v58  ;;  %v7228_v45 = vpop.f32.mrf.mxu0  ;;  %v8238_v55 = vld [vmem:[#allocation108_spill] sm:$0xff] }
 0x548   :  { %v3308_v39 = vmul.f32 %v3180_v33, %v3180_v33  ;;  %v3181_v14 = vsub.f32 %v7228_v45, %v8229_v4  ;;  %v8239_v33 = vld [vmem:[#allocation111_spill] sm:$0xff]  ;;  %v8240_v4 = vld [vmem:[#allocation114_spill] sm:$0xff] }
 0x549   :  { %v3434_v0 = vadd.f32 %v3433_v34, %v3307_v57  ;;  %v7232_v20 = vpop.f32.mrf.mxu0 }
 0x54a   :  { %v3309_v6 = vmul.f32 %v3181_v14, %v3181_v14  ;;  %v3182_v38 = vsub.f32 %v7232_v20, %v8230_v22 }
 0x54b   :  { %v3435_v50 = vadd.f32 %v3434_v0, %v3308_v39  ;;  %v7236_v13 = vpop.f32.mrf.mxu0 }
 0x54c   :  { %v3310_v54 = vmul.f32 %v3182_v38, %v3182_v38  ;;  %v3183_v28 = vsub.f32 %v7236_v13, %v8231_v19 }
 0x54d   :  { %v7238_v29 = vpop.f32.mrf.mxu0  ;;  %v3436_v42 = vadd.f32 %v3435_v50, %v3309_v6 }
 0x54e   :  { %v3184_v43 = vsub.f32 %v7238_v29, %v8232_v2  ;;  %v3311_v10 = vmul.f32 %v3183_v28, %v3183_v28  ;;  %v8242_v2 = vld [vmem:[#allocation120_spill] sm:$0xff] }
 0x54f   :  { %v7244_v63 = vpop.f32.mrf.mxu0  ;;  %v3437_v5 = vadd.f32 %v3436_v42, %v3310_v54  ;;  %v8241_v54 = vld [vmem:[#allocation117_spill] sm:$0xff] }
 0x550   :  { %v3312_v46 = vmul.f32 %v3184_v43, %v3184_v43  ;;  %v3185_v12 = vsub.f32 %v7244_v63, %v8233_v1 }
 0x551   :  { %v7246_v26 = vpop.f32.mrf.mxu0  ;;  %v3438_v59 = vadd.f32 %v3437_v5, %v3311_v10 }
 0x552   :  { %v3186_v37 = vsub.f32 %v7246_v26, %v8234_v47  ;;  %v3313_v11 = vmul.f32 %v3185_v12, %v3185_v12  ;;  %v8243_v12 = vld [vmem:[#allocation122_spill] sm:$0xff] }
 0x553   :  { %v7252_v7 = vpop.f32.mrf.mxu0  ;;  %v3439_v49 = vadd.f32 %v3438_v59, %v3312_v46 }
 0x554   :  { %v3314_v30 = vmul.f32 %v3186_v37, %v3186_v37  ;;  %v3187_v40 = vsub.f32 %v7252_v7, %v8235_v3 }
 0x555   :  { %v3440_v18 = vadd.f32 %v3439_v49, %v3313_v11 }
 0x556   :  { %v3315_v44 = vmul.f32 %v3187_v40, %v3187_v40 }
 0x557   :  { %v3441_v17 = vadd.f32 %v3440_v18, %v3314_v30  ;;  %v8244_v30 = vld [vmem:[#allocation123_spill] sm:$0xff] }
 0x559   :  { %v3442_v15 = vadd.f32 %v3441_v17, %v3315_v44 }
 0x55c   :  { %v7254_v8 = vpop.f32.mrf.mxu0 }
 0x55d   :  { %v3188_v53 = vsub.f32 %v7254_v8, %v8236_v9  ;;  %v8245_v9 = vld [vmem:[#allocation124_spill] sm:$0xff] }
 0x55e   :  { %v7260_v48 = vpop.f32.mrf.mxu0 }
 0x55f   :  { %v3316_v41 = vmul.f32 %v3188_v53, %v3188_v53  ;;  %v3189_v24 = vsub.f32 %v7260_v48, %v8237_v60 }
 0x561   :  { %v3443_v51 = vadd.f32 %v3442_v15, %v3316_v41  ;;  %v3317_v34 = vmul.f32 %v3189_v24, %v3189_v24  ;;  %v8246_v24 = vld [vmem:[#allocation125_spill] sm:$0xff] }
 0x563   :  { %v3444_v39 = vadd.f32 %v3443_v51, %v3317_v34  ;;  %v8247_v34 = vld [vmem:[#allocation126_spill] sm:$0xff] }
 0x564   :  { %v7262_v27 = vpop.f32.mrf.mxu0 }
 0x565   :  { %v3190_v58 = vsub.f32 %v7262_v27, %v8238_v55 }
 0x566   :  { %v7268_v61 = vpop.f32.mrf.mxu0 }
 0x567   :  { %v3318_v36 = vmul.f32 %v3190_v58, %v3190_v58  ;;  %v3191_v0 = vsub.f32 %v7268_v61, %v8239_v33 }
 0x569   :  { %v3445_v6 = vadd.f32 %v3444_v39, %v3318_v36  ;;  %v3319_v22 = vmul.f32 %v3191_v0, %v3191_v0 }
 0x56b   :  { %v3446_v28 = vadd.f32 %v3445_v6, %v3319_v22 }
 0x574   :  { %v7270_v57 = vpop.f32.mrf.mxu0 }
 0x575   :  { %v3192_v14 = vsub.f32 %v7270_v57, %v8240_v4  ;;  %v8248_v4 = vld [vmem:[#allocation127_spill] sm:$0xff] }
 0x576   :  { %v3043_v50 = vpop.f32.mrf.mxu0 }
 0x577   :  { %v3320_v42 = vmul.f32 %v3192_v14, %v3192_v14  ;;  %v3193_v19 = vsub.f32 %v3043_v50, %v8241_v54  ;;  %v8249_v54 = vld [vmem:[#allocation128_spill] sm:$0xff] }
 0x579   :  { %v3447_v10 = vadd.f32 %v3446_v28, %v3320_v42  ;;  %v3321_v46 = vmul.f32 %v3193_v19, %v3193_v19 }
 0x57b   :  { %v3448_v47 = vadd.f32 %v3447_v10, %v3321_v46  ;;  %v8250_v10 = vld [vmem:[#allocation129_spill] sm:$0xff] }
 0x57d   :  { %v3047_v38 = vpop.f32.mrf.mxu0 }
 0x57e   :  { %v3194_v43 = vsub.f32 %v3047_v38, %v8242_v2 }
 0x57f   :  { %v3049_v5 = vpop.f32.mrf.mxu0 }
 0x580   :  { %v3322_v1 = vmul.f32 %v3194_v43, %v3194_v43  ;;  %v3195_v59 = vsub.f32 %v3049_v5, %v8243_v12 }
 0x582   :  { %v3449_v49 = vadd.f32 %v3448_v47, %v3322_v1  ;;  %v3323_v11 = vmul.f32 %v3195_v59, %v3195_v59  ;;  %v8251_v47 = vld [vmem:[#allocation130_spill] sm:$0xff] }
 0x584   :  { %v3450_v17 = vadd.f32 %v3449_v49, %v3323_v11 }
 0x588   :  { %v3053_v37 = vpop.f32.mrf.mxu0 }
 0x589   :  { %v3196_v3 = vsub.f32 %v3053_v37, %v8244_v30 }
 0x58a   :  { %v3055_v40 = vpop.f32.mrf.mxu0 }
 0x58b   :  { %v3324_v18 = vmul.f32 %v3196_v3, %v3196_v3  ;;  %v3197_v53 = vsub.f32 %v3055_v40, %v8245_v9 }
 0x58d   :  { %v3451_v41 = vadd.f32 %v3450_v17, %v3324_v18  ;;  %v3325_v60 = vmul.f32 %v3197_v53, %v3197_v53 }
 0x58e   :  { %v3059_v44 = vpop.f32.mrf.mxu0 }
 0x58f   :  { %v3198_v15 = vsub.f32 %v3059_v44, %v8246_v24  ;;  %v3452_v58 = vadd.f32 %v3451_v41, %v3325_v60 }
 0x590   :  { %v3061_v55 = vpop.f32.mrf.mxu0 }
 0x591   :  { %v3326_v51 = vmul.f32 %v3198_v15, %v3198_v15  ;;  %v3199_v36 = vsub.f32 %v3061_v55, %v8247_v34 }
 0x593   :  { %v3453_v33 = vadd.f32 %v3452_v58, %v3326_v51  ;;  %v3327_v0 = vmul.f32 %v3199_v36, %v3199_v36 }
 0x595   :  { %v3454_v22 = vadd.f32 %v3453_v33, %v3327_v0 }
 0x598   :  { %v3065_v39 = vpop.f32.mrf.mxu0 }
 0x599   :  { %v3200_v14 = vsub.f32 %v3065_v39, %v8248_v4 }
 0x59a   :  { %v3067_v6 = vpop.f32.mrf.mxu0 }
 0x59b   :  { %v3328_v42 = vmul.f32 %v3200_v14, %v3200_v14  ;;  %v3201_v19 = vsub.f32 %v3067_v6, %v8249_v54 }
 0x59d   :  { %v3455_v28 = vadd.f32 %v3454_v22, %v3328_v42  ;;  %v3329_v2 = vmul.f32 %v3201_v19, %v3201_v19  ;;  %v3071_v43 = vpop.f32.mrf.mxu0 }
 0x59e   :  { %v3202_v46 = vsub.f32 %v3071_v43, %v8250_v10 }
 0x59f   :  { %v3456_v1 = vadd.f32 %v3455_v28, %v3329_v2  ;;  %v3073_v12 = vpop.f32.mrf.mxu0 }
 0x5a0   :  { %v3330_v59 = vmul.f32 %v3202_v46, %v3202_v46  ;;  %v3203_v49 = vsub.f32 %v3073_v12, %v8251_v47  ;;  %3693 = vmatprep.subr.mxu1 %v3073_v12 }
 0x5a1   :  { %3694 = vmatpush2.msra.mxu1 %v3071_v43 }
 0x5a2   :  { %v3457_v11 = vadd.f32 %v3456_v1, %v3330_v59  ;;  %v3331_v30 = vmul.f32 %v3203_v49, %v3203_v49  ;;  %3695 = vmatprep.subr.mxu1 %v3067_v6 }
 0x5a3   :  { %3696 = vmatpush2.msra.mxu1 %v3065_v39 }
 0x5a4   :  { %v3458_v3 = vadd.f32 %v3457_v11, %v3331_v30  ;;  %3697 = vmatprep.subr.mxu1 %v3061_v55 }
 0x5a5   :  { %3698 = vmatpush2.msra.mxu1 %v3059_v44 }
 0x5a6   :  { %3699 = vmatprep.subr.mxu1 %v3055_v40  ;;  %3459 = vadd.xlane.f32.xlu0 %v3458_v3 }
 0x5a7   :  { %3700 = vmatpush2.msra.mxu1 %v3053_v37 }
 0x5a8   :  { %3701 = vmatprep.subr.mxu1 %v3049_v5 }
 0x5a9   :  { %3702 = vmatpush2.msra.mxu1 %v3047_v38 }
 0x5aa   :  { %3703 = vmatprep.subr.mxu1 %v3043_v50 }
 0x5ab   :  { %3704 = vmatpush2.msra.mxu1 %v7270_v57 }
 0x5ac   :  { %3705 = vmatprep.subr.mxu1 %v7268_v61  ;;  %v3638_v61 = vpop.f32.mrf.mxu1 }
 0x5ad   :  { %3706 = vmatpush2.msra.mxu1 %v7262_v27 }
 0x5ae   :  { %3707 = vmatprep.subr.mxu1 %v7260_v48  ;;  %v3640_v57 = vpop.f32.mrf.mxu1 }
 0x5af   :  { %3708 = vmatpush2.msra.mxu1 %v7254_v8  ;;  %v3546_v8 = vpop.xlane.xlu1 %3545 }
 0x5b0   :  { %3709 = vmatprep.subr.mxu1 %v7252_v7  ;;  %v4399_v7 = vmov 0   ;;  %v3547_v48 = vsub.f32 0.0, %v3546_v8 }
 0x5b1   :  { %3710 = vmatpush2.msra.mxu1 %v7246_v26  ;;  %v14_v26 = vstv %s7589_s6  ;;  %4391 = vset.pattern.permute.xlu0 %v4399_v7 }
 0x5b2   :  { %3711 = vmatprep.subr.mxu1 %v7244_v63  ;;  %15 = vst [vmem:[#allocation2] sm:$0x1] %v14_v26  ;;  %v3548_v27 = vmul.f32 1.442695, %v3547_v48 }
 0x5b3   :  { %3712 = vmatpush2.msra.mxu1 %v7238_v29 }
 0x5b4   :  { %3713 = vmatprep.subr.mxu1 %v7236_v13  ;;  %4394 = vpow2.f32 %v3548_v27 }
 0x5b5   :  { %3714 = vmatpush2.msra.mxu1 %v7232_v20  ;;  %v3558_v20 = vld [vmem:[%s7588_s4 + $0x10] sm:$0xff] }
 0x5b6   :  { %3715 = vmatprep.subr.mxu1 %v7228_v45 }
 0x5b7   :  { %3716 = vmatpush2.msra.mxu1 %v7224_v25 }
 0x5b8   :  { %3717 = vmatprep.subr.mxu1 %v7220_v52  ;;  %v3563_v52 = vld [vmem:[%s7588_s4 + $0x38] sm:$0xff] }
 0x5b9   :  { %3718 = vmatpush2.msra.mxu1 %v7216_v56 }
 0x5ba   :  { %3719 = vmatprep.subr.mxu1 %v7212_v31 }
 0x5bb   :  { %3720 = vmatpush2.msra.mxu1 %v7207_v21  ;;  %v3570_v21 = vld [vmem:[%s7588_s4 + $0x70] sm:$0xff] }
 0x5bc   :  { %3721 = vmatprep.subr.mxu1 %v7196_v62  ;;  %v3562_v62 = vld [vmem:[%s7588_s4 + $0x30] sm:$0xff] }
 0x5bd   :  { %3722 = vmatpush2.msra.mxu1 %v7188_v23  ;;  %v3567_v23 = vld [vmem:[%s7588_s4 + $0x58] sm:$0xff] }
 0x5be   :  { %3723 = vmatprep.subr.mxu1 %v7174_v35  ;;  %v3566_v35 = vld [vmem:[%s7588_s4 + $0x50] sm:$0xff] }
 0x5bf   :  { %3724 = vmatpush2.msra.mxu1 %v7160_v16  ;;  %v3571_v16 = vld [vmem:[%s7588_s4 + $0x78] sm:$0xff] }
 0x5c0   :  { %3726 = vmatmul.mubr.f32.vlgmr.msra.gmra.mxu1 %v3558_v20 }
 0x5c1   :  { %3731 = vmatprep.mubr.f32.mxu1 %v3563_v52  ;;  %v4395_v37 = vpop.eup %4394 }
 0x5c2   :  { %v3552_v9 = vsel %vm3551_vm1, %v4395_v37, 0.0 }
 0x5c4   :  { %3732 = vmatmul.mubr.f32.gmra.mxu1 %v3562_v62 }
 0x5c5   :  { %3737 = vmatprep.mubr.f32.mxu1 %v3567_v23 }
 0x5c8   :  { %3738 = vmatmul.mubr.f32.gmra.mxu1 %v3566_v35 }
 0x5c9   :  { %3743 = vmatprep.mubr.f32.mxu1 %v3571_v16 }
 0x5cc   :  { %3744 = vmatmul.mubr.f32.gmra.mxu1 %v3570_v21 }
 0x5ed   :  { %v7332_v50 = vpop.f32.mrf.mxu1 }
 0x5ef   :  { %v7334_v5 = vpop.f32.mrf.mxu1 }
 0x5f3   :  { %v3650_v53 = vpop.f32.mrf.mxu1 }
 0x5f5   :  { %v3652_v44 = vpop.f32.mrf.mxu1 }
 0x5f7   :  { %v7341_v41 = vpop.f32.mrf.mxu1 }
 0x5f9   :  { %v7343_v60 = vpop.f32.mrf.mxu1 }
 0x62f   :  { %v3460_v31 = vpop.xlane.xlu0 %3459 }
 0x630   :  { %v3461_v56 = vrot.slane %v3460_v31, 4 }
 0x632   :  { %v3462_v25 = vadd.f32 %v3461_v56, %v3460_v31  ;;  %v4368_v56 = vld [vmem:[#allocation2] ss:$0 sm:$0xff] }
 0x634   :  { %v3463_v45 = vrot.slane %v3462_v25, 2 }
 0x636   :  { %v3464_v13 = vadd.f32 %v3463_v45, %v3462_v25 }
 0x638   :  { %v3465_v29 = vrot.slane %v3464_v13, 1 }
 0x63a   :  { %v3466_v63 = vadd.f32 %v3465_v29, %v3464_v13 }
 0x63c   :  { %4378 = vpush %v3466_v63 }
 0x66d   :  { %s4379_s4 = spop %4378 }
 0x66e   :  { %v3468_v38 = vstv %s4379_s4 }
 0x66f   :  { %v3469_v40 = vmul.f32 7.6293945e-06, %v3468_v38 }
 0x671   :  { %v3470_v18 = vmul.f32 1.25, %v3469_v40 }
 0x673   :  { %v3553_v17 = vsel %vm3550_vm2, %v3470_v18, %v3552_v9 }
 0x674   :  { %3555 = vst.msk [vmem:[%s7590_s8] sm:$0x1] %vm3554_vm3, %v3553_v17  ;;  %s4402_s8 = smov 15  }
 0x680   :  { %v3727_v24 = vpop.f32.mrf.mxu1 }
 0x681   :  { %v7345_v15 = vadd.f32 %v3727_v24, %v3638_v61 }
 0x682   :  { %v3729_v58 = vpop.f32.mrf.mxu1 }
 0x683   :  { %3755 = vrot.lane.b32.xlu0 %v7345_v15, %s4400_s13  ;;  %v3766_v55 = vrot.slane %v7345_v15, 1  ;;  %v3793_v51 = vrot.slane %v7345_v15, 2  ;;  %v7352_v34 = vadd.f32 %v3729_v58, %v3640_v57  ;;  %v3820_v36 = vrot.slane %v7345_v15, 3  ;;  %v7444_v58 = vld [vmem:[%s7591_s5 + $0x8] sm:$0xff] }
 0x684   :  { %v3857_v0 = vrot.slane %v7345_v15, 5  ;;  %v3733_v39 = vpop.f32.mrf.mxu1  ;;  %v3884_v14 = vrot.slane %v7345_v15, 6  ;;  %v3911_v42 = vrot.slane %v7345_v15, 7 }
 0x685   :  { %3770 = vrot.lane.b32.xlu1 %v3766_v55, %s4401_s14  ;;  %v3767_v33 = vrot.slane %v7352_v34, 1  ;;  %v3794_v4 = vrot.slane %v7352_v34, 2  ;;  %v3821_v22 = vrot.slane %v7352_v34, 3  ;;  %v3858_v19 = vrot.slane %v7352_v34, 5  ;;  %v7439_v55 = vld [vmem:[%s7591_s5] sm:$0xff] }
 0x686   :  { %v3735_v6 = vpop.f32.mrf.mxu1  ;;  %v3885_v2 = vrot.slane %v7352_v34, 6  ;;  %v3912_v10 = vrot.slane %v7352_v34, 7  ;;  %v3734_v62 = vadd.f32 %v3733_v39, %v7332_v50 }
 0x687   :  { %3797 = vrot.lane.b32.xlu0 %v3793_v51, %s4402_s8  ;;  %v3736_v45 = vadd.f32 %v3735_v6, %v7334_v5  ;;  %v7453_v6 = vmul.f32 %v7439_v55, %v7345_v15 }
 0x688   :  { %v3739_v54 = vpop.f32.mrf.mxu1 }
 0x689   :  { %3757 = vrot.lane.b32.xlu1 %v7352_v34, %s4400_s13  ;;  %v7372_v28 = vadd.f32 %v3739_v54, %v3650_v53 }
 0x68a   :  { %v3741_v46 = vpop.f32.mrf.mxu1 }
 0x68b   :  { %3824 = vrot.lane.b32.xlu0 %v3820_v36, %s4403_s15  ;;  %v3959_v43 = vrot.slane %v7372_v28, 1  ;;  %v3985_v1 = vrot.slane %v7372_v28, 2  ;;  %v7384_v12 = vadd.f32 %v3741_v46, %v3652_v44  ;;  %v4011_v59 = vrot.slane %v7372_v28, 3 }
 0x68c   :  { %v4047_v49 = vrot.slane %v7372_v28, 5  ;;  %v4073_v30 = vrot.slane %v7372_v28, 6  ;;  %v4099_v20 = vrot.slane %v7372_v28, 7  ;;  %v3745_v23 = vpop.f32.mrf.mxu1 }
 0x68d   :  { %3772 = vrot.lane.b32.xlu1 %v3767_v33, %s4401_s14  ;;  %v3960_v47 = vrot.slane %v7384_v12, 1  ;;  %v3986_v11 = vrot.slane %v7384_v12, 2  ;;  %v4012_v3 = vrot.slane %v7384_v12, 3  ;;  %v4048_v52 = vrot.slane %v7384_v12, 5 }
 0x68e   :  { %v4074_v35 = vrot.slane %v7384_v12, 6  ;;  %v3746_v16 = vadd.f32 %v3745_v23, %v7341_v41  ;;  %v4100_v21 = vrot.slane %v7384_v12, 7  ;;  %v3747_v31 = vpop.f32.mrf.mxu1 }
 0x68f   :  { %3861 = vrot.lane.b32.xlu0 %v3857_v0, %s4404_s16  ;;  %v3748_v25 = vadd.f32 %v3747_v31, %v7343_v60 }
 0x691   :  { %3799 = vrot.lane.b32.xlu1 %v3794_v4, %s4402_s8 }
 0x693   :  { %3888 = vrot.lane.b32.xlu0 %v3884_v14, %s4405_s17 }
 0x695   :  { %3826 = vrot.lane.b32.xlu1 %v3821_v22, %s4403_s15  ;;  %v7457_v22 = vmul.f32 %v7444_v58, %v7352_v34 }
 0x697   :  { %3915 = vrot.lane.b32.xlu0 %v3911_v42, %s4406_s18 }
 0x699   :  { %3863 = vrot.lane.b32.xlu1 %v3858_v19, %s4404_s16 }
 0x69b   :  { %3949 = vrot.lane.b32.xlu0 %v7372_v28, %s4400_s13 }
 0x69d   :  { %3890 = vrot.lane.b32.xlu1 %v3885_v2, %s4405_s17 }
 0x69f   :  { %3963 = vrot.lane.b32.xlu0 %v3959_v43, %s4401_s14 }
 0x6a1   :  { %3917 = vrot.lane.b32.xlu1 %v3912_v10, %s4406_s18 }
 0x6a3   :  { %3989 = vrot.lane.b32.xlu0 %v3985_v1, %s4402_s8 }
 0x6a5   :  { %3951 = vrot.lane.b32.xlu1 %v7384_v12, %s4400_s13 }
 0x6a7   :  { %4015 = vrot.lane.b32.xlu0 %v4011_v59, %s4403_s15 }
 0x6a9   :  { %3965 = vrot.lane.b32.xlu1 %v3960_v47, %s4401_s14 }
 0x6ab   :  { %4051 = vrot.lane.b32.xlu0 %v4047_v49, %s4404_s16 }
 0x6ad   :  { %3991 = vrot.lane.b32.xlu1 %v3986_v11, %s4402_s8  ;;  %v7472_v11 = vmul.f32 %v7439_v55, %v7372_v28 }
 0x6af   :  { %4077 = vrot.lane.b32.xlu0 %v4073_v30, %s4405_s17 }
 0x6b1   :  { %4017 = vrot.lane.b32.xlu1 %v4012_v3, %s4403_s15 }
 0x6b3   :  { %4103 = vrot.lane.b32.xlu0 %v4099_v20, %s4406_s18  ;;  %v3851_v20 = vrot.slane %v7453_v6, 4 }
 0x6b5   :  { %4053 = vrot.lane.b32.xlu1 %v4048_v52, %s4404_s16  ;;  %v3852_v52 = vrot.slane %v7457_v22, 4 }
 0x6b7   :  { %3938 = vrot.lane.b32.xlu0 %v3734_v62, %s4407_s19 }
 0x6b9   :  { %4079 = vrot.lane.b32.xlu1 %v4074_v35, %s4405_s17 }
 0x6bb   :  { %4125 = vrot.lane.b32.xlu0 %v3746_v16, %s4407_s19 }
 0x6bd   :  { %4105 = vrot.lane.b32.xlu1 %v4100_v21, %s4406_s18 }
 0x6bf   :  { %4150 = vperm.xlu0 %4391, %v4368_v56  }
 0x6c1   :  { %4127 = vrot.lane.b32.xlu1 %v3748_v25, %s4407_s19 }
 0x6c5   :  { %3940 = vrot.lane.b32.xlu1 %v3736_v45, %s4407_s19 }
 0x6f5   :  { %v3756_v13 = vpop.permute.xlu0 %3755 }
 0x6f7   :  { %v3771_v29 = vpop.permute.xlu1 %3770 }
 0x6f9   :  { %v3798_v63 = vpop.permute.xlu0 %3797 }
 0x6fb   :  { %v3758_v26 = vpop.permute.xlu1 %3757 }
 0x6fc   :  { %v3760_v54 = vsel %vm3759_vm7, %v3756_v13, %v3758_v26  ;;  %v3761_v19 = vsel %vm3759_vm7, %v3758_v26, %v3756_v13  ;;  %v4041_v26 = vrot.slane %v7472_v11, 4 }
 0x6fd   :  { %v3825_v7 = vpop.permute.xlu0 %3824  ;;  %v3762_v34 = vmul.f32 %v3761_v19, %v7439_v55  ;;  %v3763_v47 = vmul.f32 %v3760_v54, %v7444_v58 }
 0x6ff   :  { %v3773_v8 = vpop.permute.xlu1 %3772 }
 0x700   :  { %v3775_v5 = vsel %vm3774_vm4, %v3771_v29, %v3773_v8  ;;  %v3776_v37 = vsel %vm3774_vm4, %v3773_v8, %v3771_v29 }
 0x701   :  { %v3862_v48 = vpop.permute.xlu0 %3861  ;;  %v3779_v18 = vrot.slane %v3776_v37, 7  ;;  %v3780_v9 = vrot.slane %v3775_v5, 7 }
 0x703   :  { %v3800_v27 = vpop.permute.xlu1 %3799  ;;  %v3783_v33 = vmul.f32 %v3779_v18, %v7439_v55  ;;  %v3784_v0 = vmul.f32 %v3780_v9, %v7444_v58 }
 0x704   :  { %v3802_v53 = vsel %vm3801_vm5, %v3798_v63, %v3800_v27  ;;  %v3803_v17 = vsel %vm3801_vm5, %v3800_v27, %v3798_v63  ;;  %v7486_v63 = vmul.f32 %v7444_v58, %v7384_v12 }
 0x705   :  { %v7413_v61 = vpop.permute.xlu0 %3888  ;;  %v3806_v51 = vrot.slane %v3803_v17, 6  ;;  %v3807_v36 = vrot.slane %v3802_v53, 6  ;;  %v3787_v10 = vrot.slane %v3783_v33, 1  ;;  %v3788_v46 = vrot.slane %v3784_v0, 1 }
 0x707   :  { %v3827_v57 = vpop.permute.xlu1 %3826  ;;  %v3810_v2 = vmul.f32 %v3806_v51, %v7439_v55  ;;  %v3811_v43 = vmul.f32 %v3807_v36, %v7444_v58  ;;  %v3791_v62 = vadd.f32 %v3787_v10, %v3762_v34  ;;  %v3792_v23 = vadd.f32 %v3788_v46, %v3763_v47 }
 0x708   :  { %v3829_v41 = vsel %vm3828_vm6, %v3825_v7, %v3827_v57  ;;  %v3830_v60 = vsel %vm3828_vm6, %v3827_v57, %v3825_v7 }
 0x709   :  { %v7416_v50 = vpop.permute.xlu0 %3915  ;;  %v3833_v4 = vrot.slane %v3830_v60, 5  ;;  %v3834_v14 = vrot.slane %v3829_v41, 5  ;;  %v3814_v30 = vrot.slane %v3810_v2, 2  ;;  %v3815_v3 = vrot.slane %v3811_v43, 2 }
 0x70b   :  { %v3864_v38 = vpop.permute.xlu1 %3863  ;;  %v3837_v15 = vmul.f32 %v3833_v4, %v7439_v55  ;;  %v3838_v59 = vmul.f32 %v3834_v14, %v7444_v58  ;;  %v3818_v7 = vadd.f32 %v3814_v30, %v3791_v62  ;;  %v3819_v8 = vadd.f32 %v3815_v3, %v3792_v23 }
 0x70c   :  { %v3866_v35 = vsel %vm3865_vm8, %v3862_v48, %v3864_v38  ;;  %v3867_v16 = vsel %vm3865_vm8, %v3864_v38, %v3862_v48 }
 0x70d   :  { %v7423_v40 = vpop.permute.xlu0 %3949  ;;  %v3841_v31 = vrot.slane %v3837_v15, 3  ;;  %v3842_v56 = vrot.slane %v3838_v59, 3  ;;  %v3870_v48 = vrot.slane %v3866_v35, 3  ;;  %v3871_v27 = vrot.slane %v3867_v16, 3 }
 0x70f   :  { %v7430_v44 = vpop.permute.xlu1 %3890  ;;  %v3845_v37 = vadd.f32 %v3841_v31, %v3818_v7  ;;  %v3846_v18 = vadd.f32 %v3842_v56, %v3819_v8  ;;  %v7504_v51 = vmul.f32 %v3870_v48, %v7439_v55  ;;  %v7507_v36 = vmul.f32 %v3871_v27, %v7444_v58 }
 0x710   :  { %v3893_v4 = vsel %vm3892_vm9, %v7413_v61, %v7430_v44 }
 0x711   :  { %v3964_v24 = vpop.permute.xlu0 %3963 }
 0x713   :  { %v7449_v39 = vpop.permute.xlu1 %3917 }
 0x714   :  { %v3920_v30 = vsel %vm3919_vm10, %v7416_v50, %v7449_v39  ;;  %v3921_v3 = vsel %vm3919_vm10, %v7449_v39, %v7416_v50  ;;  %v4042_v39 = vrot.slane %v7486_v63, 4 }
 0x715   :  { %v3990_v42 = vpop.permute.xlu0 %3989  ;;  %v3924_v7 = vrot.slane %v3920_v30, 1  ;;  %v3925_v50 = vrot.slane %v3921_v3, 1  ;;  %v3753_v30 = vld [vmem:[%s7591_s5 + $0x18] sm:$0xff] }
 0x717   :  { %v3952_v1 = vpop.permute.xlu1 %3951  ;;  %v3928_v6 = vmul.f32 %v3924_v7, %v7439_v55  ;;  %v3929_v22 = vmul.f32 %v3925_v50, %v7444_v58 }
 0x718   :  { %v3953_v53 = vsel %vm3759_vm7, %v7423_v40, %v3952_v1  ;;  %v3954_v17 = vsel %vm3759_vm7, %v3952_v1, %v7423_v40  ;;  %v3894_v40 = vsel %vm3892_vm9, %v7430_v44, %v7413_v61  ;;  %v3897_v61 = vrot.slane %v3893_v4, 2 }
 0x719   :  { %v4016_v49 = vpop.permute.xlu0 %4015  ;;  %v3955_v19 = vmul.f32 %v3954_v17, %v7439_v55  ;;  %v3956_v2 = vmul.f32 %v3953_v53, %v7444_v58  ;;  %v3898_v44 = vrot.slane %v3894_v40, 2  ;;  %v3879_v53 = vrot.slane %v7507_v36, 5 }
 0x71a   :  { %v3901_v17 = vmul.f32 %v3897_v61, %v7439_v55 }
 0x71b   :  { %v3966_v21 = vpop.permute.xlu1 %3965 }
 0x71c   :  { %v3967_v28 = vsel %vm3774_vm4, %v3964_v24, %v3966_v21  ;;  %v3968_v25 = vsel %vm3774_vm4, %v3966_v21, %v3964_v24  ;;  %v3905_v11 = vrot.slane %v3901_v17, 6 }
 0x71d   :  { %v3971_v45 = vrot.slane %v3968_v25, 7  ;;  %v3972_v13 = vrot.slane %v3967_v28, 7  ;;  %v4052_v29 = vpop.permute.xlu0 %4051 }
 0x71f   :  { %v3975_v57 = vmul.f32 %v3971_v45, %v7439_v55  ;;  %v3976_v38 = vmul.f32 %v3972_v13, %v7444_v58  ;;  %v3992_v5 = vpop.permute.xlu1 %3991 }
 0x720   :  { %v3993_v12 = vsel %vm3801_vm5, %v3990_v42, %v3992_v5  ;;  %v3994_v9 = vsel %vm3801_vm5, %v3992_v5, %v3990_v42  ;;  %v3856_v5 = vadd.f32 %v3852_v52, %v3846_v18 }
 0x721   :  { %v3997_v41 = vrot.slane %v3994_v9, 6  ;;  %v3998_v60 = vrot.slane %v3993_v12, 6  ;;  %v4078_v24 = vpop.permute.xlu0 %4077  ;;  %v3979_v33 = vrot.slane %v3975_v57, 1  ;;  %v3980_v0 = vrot.slane %v3976_v38, 1 }
 0x722   :  { %v3878_v9 = vrot.slane %v7504_v51, 5 }
 0x723   :  { %v4001_v14 = vmul.f32 %v3997_v41, %v7439_v55  ;;  %v4002_v42 = vmul.f32 %v3998_v60, %v7444_v58  ;;  %v4018_v54 = vpop.permute.xlu1 %4017  ;;  %v3983_v34 = vadd.f32 %v3979_v33, %v3955_v19  ;;  %v3984_v47 = vadd.f32 %v3980_v0, %v3956_v2 }
 0x724   :  { %v4019_v43 = vsel %vm3828_vm6, %v4016_v49, %v4018_v54  ;;  %v4020_v10 = vsel %vm3828_vm6, %v4018_v54, %v4016_v49  ;;  %v3902_v41 = vmul.f32 %v3898_v44, %v7444_v58  ;;  %v3932_v44 = vrot.slane %v3928_v6, 7 }
 0x725   :  { %v4005_v46 = vrot.slane %v4001_v14, 2  ;;  %v4006_v1 = vrot.slane %v4002_v42, 2  ;;  %v4023_v15 = vrot.slane %v4020_v10, 5  ;;  %v4024_v59 = vrot.slane %v4019_v43, 5  ;;  %v4104_v23 = vpop.permute.xlu0 %4103 }
 0x726   :  { %v3883_v42 = vadd.f32 %v3879_v53, %v3856_v5 }
 0x727   :  { %v4027_v49 = vmul.f32 %v4023_v15, %v7439_v55  ;;  %v4028_v62 = vmul.f32 %v4024_v59, %v7444_v58  ;;  %v4054_v35 = vpop.permute.xlu1 %4053  ;;  %v4009_v16 = vadd.f32 %v4005_v46, %v3983_v34  ;;  %v4010_v21 = vadd.f32 %v4006_v1, %v3984_v47  ;;  %v3752_v47 = vld [vmem:[%s7591_s5 + $0x10] sm:$0xff] }
 0x728   :  { %v4055_v31 = vsel %vm3865_vm8, %v4052_v29, %v4054_v35  ;;  %v4056_v56 = vsel %vm3865_vm8, %v4054_v35, %v4052_v29  ;;  %v3855_v29 = vadd.f32 %v3851_v20, %v3845_v37  ;;  %v3933_v34 = vrot.slane %v3929_v22, 7 }
 0x729   :  { %v4031_v28 = vrot.slane %v4027_v49, 3  ;;  %v4032_v25 = vrot.slane %v4028_v62, 3  ;;  %v4059_v45 = vrot.slane %v4055_v31, 3  ;;  %v4060_v13 = vrot.slane %v4056_v56, 3  ;;  %v3939_v60 = vpop.permute.xlu0 %3938 }
 0x72a   :  { %v3882_v14 = vadd.f32 %v3878_v9, %v3855_v29 }
 0x72b   :  { %v4035_v8 = vadd.f32 %v4031_v28, %v4009_v16  ;;  %v4036_v48 = vadd.f32 %v4032_v25, %v4010_v21  ;;  %v4063_v27 = vmul.f32 %v4059_v45, %v7439_v55  ;;  %v4064_v57 = vmul.f32 %v4060_v13, %v7444_v58  ;;  %v4080_v38 = vpop.permute.xlu1 %4079 }
 0x72c   :  { %v4081_v12 = vsel %vm3892_vm9, %v4078_v24, %v4080_v38  ;;  %v4082_v63 = vsel %vm3892_vm9, %v4080_v38, %v4078_v24  ;;  %v3909_v35 = vadd.f32 %v3905_v11, %v3882_v14 }
 0x72d   :  { %v4085_v20 = vrot.slane %v4081_v12, 2  ;;  %v4086_v52 = vrot.slane %v4082_v63, 2  ;;  %v4045_v37 = vadd.f32 %v4041_v26, %v4035_v8  ;;  %v4046_v18 = vadd.f32 %v4042_v39, %v4036_v48  ;;  %v4126_v1 = vpop.permute.xlu0 %4125 }
 0x72e   :  { %v4067_v24 = vrot.slane %v4063_v27, 5  ;;  %v4068_v33 = vrot.slane %v4064_v57, 5  ;;  %v3906_v26 = vrot.slane %v3902_v41, 6  ;;  %v3936_v45 = vadd.f32 %v3932_v44, %v3909_v35 }
 0x72f   :  { %v4106_v51 = vpop.permute.xlu1 %4105  ;;  %v4089_v36 = vmul.f32 %v4085_v20, %v7439_v55  ;;  %v4090_v0 = vmul.f32 %v4086_v52, %v7444_v58 }
 0x730   :  { %v4107_v4 = vsel %vm3919_vm10, %v4104_v23, %v4106_v51  ;;  %v4108_v40 = vsel %vm3919_vm10, %v4106_v51, %v4104_v23  ;;  %v4071_v10 = vadd.f32 %v4067_v24, %v4045_v37  ;;  %v4072_v46 = vadd.f32 %v4068_v33, %v4046_v18 }
 0x731   :  { %v4111_v54 = vrot.slane %v4107_v4, 1  ;;  %v4112_v19 = vrot.slane %v4108_v40, 1  ;;  %v4093_v2 = vrot.slane %v4089_v36, 6  ;;  %v4094_v43 = vrot.slane %v4090_v0, 6 }
 0x732   :  { %v3910_v16 = vadd.f32 %v3906_v26, %v3883_v42 }
 0x733   :  { %v4115_v15 = vmul.f32 %v4111_v54, %v7439_v55  ;;  %v4116_v59 = vmul.f32 %v4112_v19, %v7444_v58  ;;  %v4128_v61 = vpop.permute.xlu1 %4127  ;;  %v4097_v55 = vadd.f32 %v4093_v2, %v4071_v10  ;;  %v4098_v62 = vadd.f32 %v4094_v43, %v4072_v46 }
 0x734   :  { %v4129_v3 = vsel %vm3942_vm11, %v4126_v1, %v4128_v61  ;;  %v4130_v49 = vsel %vm3942_vm11, %v4128_v61, %v4126_v1  ;;  %v3937_v13 = vadd.f32 %v3933_v34, %v3910_v16 }
 0x735   :  { %v4119_v58 = vrot.slane %v4115_v15, 7  ;;  %v4120_v23 = vrot.slane %v4116_v59, 7  ;;  %v4131_v56 = vmul.f32 %v4129_v3, %v3752_v47  ;;  %v4132_v28 = vmul.f32 %v4130_v49, %v3753_v30 }
 0x737   :  { %v4123_v21 = vadd.f32 %v4119_v58, %v4097_v55  ;;  %v4124_v31 = vadd.f32 %v4120_v23, %v4098_v62  ;;  %v3941_v25 = vpop.permute.xlu1 %3940 }
 0x738   :  { %v3943_v7 = vsel %vm3942_vm11, %v3939_v60, %v3941_v25  ;;  %v3944_v50 = vsel %vm3942_vm11, %v3941_v25, %v3939_v60 }
 0x739   :  { %v4133_v39 = vadd.f32 %v4131_v56, %v4123_v21  ;;  %v4134_v8 = vadd.f32 %v4132_v28, %v4124_v31  ;;  %v3945_v48 = vmul.f32 %v3943_v7, %v3752_v47  ;;  %v3946_v27 = vmul.f32 %v3944_v50, %v3753_v30 }
 0x73a   :  { %v4151_v12 = vpop.permute.xlu0 %4150 }
 0x73b   :  { %v4137_v57 = vrot.slane %v4133_v39, 7  ;;  %v4138_v38 = vrot.slane %v4134_v8, 7  ;;  %v3947_v29 = vadd.f32 %v3945_v48, %v3936_v45  ;;  %v3948_v5 = vadd.f32 %v3946_v27, %v3937_v13 }
 0x73d   :  { %v4142_v63 = vsel %vm4141_vm12, %v3947_v29, %v4137_v57  ;;  %v4143_v9 = vsel %vm4141_vm12, %v3948_v5, %v4138_v38 }
 0x73e   :  { %v4153_v53 = vadd.f32 %v4151_v12, %v4142_v63  ;;  %v4154_v17 = vadd.f32 %v4151_v12, %v4143_v9 }
 0x740   :  { %v4157_v41 = vcombine.low %v4153_v53, %v4154_v17 }
 0x742   :  { %4369 = vst.sshfl [vmem:[%s7592_s7] sm:$0x33 pattern:$0x76325410] %v4157_v41 }

</bundles_post_ra>
